<compile_context>
chip_gen: v5e
topology: v5e:2x2
jax: 0.10.0
libtpu: 0.0.40
codegen_flags: <defaults>
</compile_context>

<pallas_src>
import functools

import numpy as np
import jax
import jax.numpy as jnp
from jax.experimental import pallas as pl
from jax.experimental.pallas import tpu as pltpu


def _round_up(x, m):
    return (x + m - 1) // m * m


# Safe on v5e/v6e (128 MiB physical) and below v7x's 64 MiB per-TC ceiling.
_VMEM_LIMIT = 48 * 1024 * 1024


# --------------------------------------------------------------------------
# tiling policy (shared by init-time weight prep and the matmul wrapper)
# --------------------------------------------------------------------------

def _pad_dims(K, N):
    """Padded (Kp, Np) dims for a (K, N) weight under the tiling policy."""
    Kp = K if K <= 1024 else _round_up(K, 512)       # single K block if small
    Np = N if N <= 512 else _round_up(N, 128)        # lane-pad only when tiled
    return Kp, Np


def _tiles(M, Kp, Np):
    if M <= 256:
        tm, Mp = M, M                                # single M block, no pad
    else:
        tm, Mp = 256, _round_up(M, 256)
    tk = Kp if Kp <= 1024 else 512
    if Np <= 512:
        tn = Np
    else:
        tn = 256 if Np % 256 == 0 else 128
    return Mp, tm, tk, tn


# --------------------------------------------------------------------------
# Pallas kernels
# --------------------------------------------------------------------------

def _matmul_bias_kernel(x_ref, w_ref, b_ref, o_ref, acc_ref, *, apply_relu):
    """Tiled y = x @ w + b (optional ReLU); bf16 in, f32 accumulate."""
    k = pl.program_id(2)

    @pl.when(k == 0)
    def _():
        acc_ref[...] = jnp.zeros_like(acc_ref)

    acc_ref[...] += jnp.dot(x_ref[...], w_ref[...],
                            preferred_element_type=jnp.float32)

    @pl.when(k == pl.num_programs(2) - 1)
    def _():
        y = acc_ref[...] + b_ref[...]
        if apply_relu:
            y = jnp.maximum(y, 0.0)
        o_ref[...] = y.astype(o_ref.dtype)


def matmul_bias(x, w, b, *, apply_relu, out_dtype=jnp.bfloat16):
    """x:(M,K) @ w:(Kp,Np) + b:(1,Np).  w/b are pre-padded at init time.

    Returns (M, Np); caller slices padded N columns off if any.
    """
    M, K = x.shape
    Kp, Np = w.shape
    Mp, tm, tk, tn = _tiles(M, Kp, Np)

    xb = x.astype(jnp.bfloat16)
    if (Mp, Kp) != (M, K):          # only when M > 256 or K was K-tiled
        xb = jnp.zeros((Mp, Kp), jnp.bfloat16).at[:M, :K].set(xb)

    grid = (Mp // tm, Np // tn, Kp // tk)
    out = pl.pallas_call(
        functools.partial(_matmul_bias_kernel, apply_relu=apply_relu),
        out_shape=jax.ShapeDtypeStruct((Mp, Np), out_dtype),
        grid=grid,
        in_specs=[pl.BlockSpec((tm, tk), lambda i, j, k: (i, k)),
                  pl.BlockSpec((tk, tn), lambda i, j, k: (k, j)),
                  pl.BlockSpec((1, tn), lambda i, j, k: (0, j))],
        out_specs=pl.BlockSpec((tm, tn), lambda i, j, k: (i, j)),
        scratch_shapes=[pltpu.VMEM((tm, tn), jnp.float32)],
        compiler_params=pltpu.CompilerParams(
            dimension_semantics=("parallel", "parallel", "arbitrary"),
            vmem_limit_bytes=_VMEM_LIMIT),
    )(xb, w, b)
    if Mp != M:
        out = out[:M]
    return out


def _maxpool3x3s2_kernel(pee_ref, peo_ref, poe_ref, poo_ref, o_ref, *, oh, ow):
    """3x3 / stride-2 max-pool over even/odd phase tensors, all in VMEM."""
    phases = ((pee_ref[...], peo_ref[...]),
              (poe_ref[...], poo_ref[...]))
    acc = None
    for i in range(3):
        for j in range(3):
            p = phases[i % 2][j % 2]
            win = p[i // 2:i // 2 + oh, j // 2:j // 2 + ow, :]
            acc = win if acc is None else jnp.maximum(acc, win)
    o_ref[...] = acc


def maxpool2d_3x3s2(x):
    """x: (N, H, W, C) NHWC -> (N, OH, OW, C).  No KH*KW HBM expansion."""
    N, H, W, C = x.shape
    OH = (H - 3) // 2 + 1
    OW = (W - 3) // 2 + 1
    # Four even/odd phases: same total bytes as x, lets the kernel use only
    # contiguous static slices (stride handled by the phase decomposition).
    phases = (x[:, 0::2, 0::2, :], x[:, 0::2, 1::2, :],
              x[:, 1::2, 0::2, :], x[:, 1::2, 1::2, :])

    def phase_spec(p):
        _, h, w, c = p.shape
        return pl.BlockSpec((None, h, w, c), lambda n: (n, 0, 0, 0))

    return pl.pallas_call(
        functools.partial(_maxpool3x3s2_kernel, oh=OH, ow=OW),
        out_shape=jax.ShapeDtypeStruct((N, OH, OW, C), x.dtype),
        grid=(N,),
        in_specs=[phase_spec(p) for p in phases],
        out_specs=pl.BlockSpec((None, OH, OW, C), lambda n: (n, 0, 0, 0)),
        compiler_params=pltpu.CompilerParams(
            dimension_semantics=("parallel",),
            vmem_limit_bytes=_VMEM_LIMIT),
    )(*phases)


def _classifier_kernel(x_ref, w1_ref, b1_ref, w2_ref, b2_ref, w3_ref, b3_ref,
                       o_ref):
    """fc1+ReLU -> fc2+ReLU -> fc3 fused; weights resident in VMEM."""
    h = jnp.dot(x_ref[...], w1_ref[...],
                preferred_element_type=jnp.float32) + b1_ref[...]
    h = jnp.maximum(h, 0.0)
    h = jnp.dot(h.astype(jnp.bfloat16), w2_ref[...],
                preferred_element_type=jnp.float32) + b2_ref[...]
    h = jnp.maximum(h, 0.0)
    y = jnp.dot(h.astype(jnp.bfloat16), w3_ref[...],
                preferred_element_type=jnp.float32) + b3_ref[...]
    o_ref[...] = y


def classifier_fused(x, w1, b1, w2, b2, w3, b3):
    M = x.shape[0]
    Np = w3.shape[1]
    args = (x.astype(jnp.bfloat16), w1, b1, w2, b2, w3, b3)

    def full2d(a):
        return pl.BlockSpec(a.shape, lambda i: (0, 0))

    return pl.pallas_call(
        _classifier_kernel,
        out_shape=jax.ShapeDtypeStruct((M, Np), jnp.float32),
        grid=(1,),
        in_specs=[full2d(a) for a in args],
        out_specs=pl.BlockSpec((M, Np), lambda i: (0, 0)),
        compiler_params=pltpu.CompilerParams(vmem_limit_bytes=_VMEM_LIMIT),
    )(*args)


# --------------------------------------------------------------------------
# JAX glue: im2col / conv wrapper
# --------------------------------------------------------------------------

def _im2col(x, kh, kw, stride, pad):
    # x: (N, H, W, C) NHWC (bf16).
    # TODO(synk): im2col patches are still staged through HBM (not fused into
    # the conv kernel); acceptable at these shapes, fuse for large inputs.
    N, H, W, C = x.shape
    xpad = jnp.pad(x, ((0, 0), (pad, pad), (pad, pad), (0, 0)))
    OH = (H + 2 * pad - kh) // stride + 1
    OW = (W + 2 * pad - kw) // stride + 1
    cols = []
    for i in range(kh):
        for j in range(kw):
            sl = jax.lax.slice(
                xpad, (0, i, j, 0),
                (N, i + (OH - 1) * stride + 1, j + (OW - 1) * stride + 1, C),
                (1, stride, stride, 1))
            cols.append(sl)                       # (N, OH, OW, C)
    patches = jnp.stack(cols, axis=3)             # (N, OH, OW, KH*KW, C)
    return patches.reshape(N * OH * OW, kh * kw * C), (N, OH, OW)


def conv2d_relu(x, w2d, b, *, kh, kw, stride, pad):
    # x: NHWC bf16; w2d: (Kp, Cout) bf16 pre-reshaped/padded; b: (1, Cout) f32
    cols, (N, OH, OW) = _im2col(x, kh, kw, stride, pad)
    y = matmul_bias(cols, w2d, b, apply_relu=True, out_dtype=jnp.bfloat16)
    return y.reshape(N, OH, OW, w2d.shape[1])


# --------------------------------------------------------------------------
# Parameter init (deterministic, synthetic) + forward
# --------------------------------------------------------------------------

def _feature_output_hw(h, w):
    def conv(s, k, st, p):
        return (s + 2 * p - k) // st + 1
    def pool(s):
        return (s - 3) // 2 + 1
    h = pool(conv(h, 4, 2, 2)); w = pool(conv(w, 4, 2, 2))     # conv1 + pool
    h = pool(conv(h, 5, 1, 2)); w = pool(conv(w, 5, 1, 2))     # conv2 + pool
    h = conv(h, 3, 1, 1);       w = conv(w, 3, 1, 1)           # conv3
    h = conv(h, 3, 1, 1);       w = conv(w, 3, 1, 1)           # conv4
    h = pool(conv(h, 3, 1, 1)); w = pool(conv(w, 3, 1, 1))     # conv5 + pool
    return h, w


def init_alexnet_params(key, input_height=32, input_width=32, ch=64,
                        num_classes=1000):
    hf, wf = _feature_output_hw(input_height, input_width)
    size = ch * hf * wf
    # mirror the torch float32 computation: int(a) * int(1 + log(a)/log(2))
    a = np.float32(size)
    b2 = np.float32(2.0)
    width = int(a) * int(np.float32(1.0) + np.log(a) / np.log(b2))

    keys = jax.random.split(key, 16)
    s = 0.05

    def nrm(k, shape):
        return s * jax.random.normal(k, shape, dtype=jnp.float32)

    # All reshapes / transposes / padding done ONCE here, never per forward.
    def prep_conv(w4d, b1d):
        kh, kw, cin, cout = w4d.shape
        K = kh * kw * cin
        Kp, Np = _pad_dims(K, cout)
        wp = jnp.zeros((Kp, Np), jnp.bfloat16).at[:K, :cout].set(
            w4d.reshape(K, cout).astype(jnp.bfloat16))
        bp = jnp.zeros((1, Np), jnp.float32).at[:, :cout].set(
            b1d.reshape(1, -1))
        return wp, bp

    def prep_fc(w_oi, b1d):                      # PyTorch (out, in) layout
        out_dim, in_dim = w_oi.shape
        Kp, Np = _pad_dims(in_dim, out_dim)
        wp = jnp.zeros((Kp, Np), jnp.bfloat16).at[:in_dim, :out_dim].set(
            w_oi.T.astype(jnp.bfloat16))
        bp = jnp.zeros((1, Np), jnp.float32).at[:, :out_dim].set(
            b1d.reshape(1, -1))
        return wp, bp

    c1_w, c1_b = prep_conv(nrm(keys[0], (4, 4, 3, ch)), nrm(keys[1], (ch,)))
    c2_w, c2_b = prep_conv(nrm(keys[2], (5, 5, ch, ch)), nrm(keys[3], (ch,)))
    c3_w, c3_b = prep_conv(nrm(keys[4], (3, 3, ch, ch)), nrm(keys[5], (ch,)))
    c4_w, c4_b = prep_conv(nrm(keys[6], (3, 3, ch, ch)), nrm(keys[7], (ch,)))
    c5_w, c5_b = prep_conv(nrm(keys[8], (3, 3, ch, ch)), nrm(keys[9], (ch,)))
    fc1_w, fc1_b = prep_fc(nrm(keys[10], (width, size)), nrm(keys[11], (width,)))
    fc2_w, fc2_b = prep_fc(nrm(keys[12], (width, width)), nrm(keys[13], (width,)))
    fc3_w, fc3_b = prep_fc(nrm(keys[14], (num_classes, width)),
                           nrm(keys[15], (num_classes,)))

    params = {
        "c1_w": c1_w, "c1_b": c1_b, "c2_w": c2_w, "c2_b": c2_b,
        "c3_w": c3_w, "c3_b": c3_b, "c4_w": c4_w, "c4_b": c4_b,
        "c5_w": c5_w, "c5_b": c5_b,
        "fc1_w": fc1_w, "fc1_b": fc1_b,
        "fc2_w": fc2_w, "fc2_b": fc2_b,
        "fc3_w": fc3_w, "fc3_b": fc3_b,
    }
    return params, size, width


def alexnet_forward(params, x_nchw, num_classes=1000):
    # API boundary is PyTorch NCHW; compute internally in NHWC bf16.
    x = jnp.transpose(x_nchw, (0, 2, 3, 1)).astype(jnp.bfloat16)

    x = conv2d_relu(x, params["c1_w"], params["c1_b"], kh=4, kw=4, stride=2, pad=2)
    x = maxpool2d_3x3s2(x)
    x = conv2d_relu(x, params["c2_w"], params["c2_b"], kh=5, kw=5, stride=1, pad=2)
    x = maxpool2d_3x3s2(x)
    x = conv2d_relu(x, params["c3_w"], params["c3_b"], kh=3, kw=3, stride=1, pad=1)
    x = conv2d_relu(x, params["c4_w"], params["c4_b"], kh=3, kw=3, stride=1, pad=1)
    x = conv2d_relu(x, params["c5_w"], params["c5_b"], kh=3, kw=3, stride=1, pad=1)
    x = maxpool2d_3x3s2(x)

    # flatten in PyTorch NCHW order: x.view(N, -1)
    x = jnp.transpose(x, (0, 3, 1, 2)).reshape(x.shape[0], -1)

    # classifier: Dropout layers are identity at inference time.
    # TODO(synk): training-mode nn.Dropout (RNG mask + 1/(1-p) scaling) not emitted.
    logits = classifier_fused(x, params["fc1_w"], params["fc1_b"],
                              params["fc2_w"], params["fc2_b"],
                              params["fc3_w"], params["fc3_b"])
    return logits[:, :num_classes]


if __name__ == "__main__":
    key = jax.random.PRNGKey(0)
    pkey, xkey = jax.random.split(key)

    params, size, width = init_alexnet_params(
        pkey, input_height=32, input_width=32, ch=64, num_classes=1000)
    # size == 64, width == 448 for the default 32x32x3 configuration.

    # Conv2d(3, ...) hardcodes 3 input channels; 32x32 spatial matches defaults.
    x = jax.random.normal(xkey, (2, 3, 32, 32), dtype=jnp.float32)

    fwd = jax.jit(alexnet_forward)
    out = fwd(params, x)
    out = jax.block_until_ready(out)

    assert out.shape == (2, 1000), out.shape
    assert bool(jnp.all(jnp.isfinite(out)))
    print("KERNEL_OK")
</pallas_src>

<mosaic_0001>
module attributes {stable_mosaic.version = 11 : i64} {
  func.func @_matmul_bias_kernel(%arg0: i32, %arg1: i32, %arg2: i32, %arg3: memref<256x48xbf16, #tpu.memory_space<vmem>>, %arg4: memref<48x64xbf16, #tpu.memory_space<vmem>>, %arg5: memref<1x64xf32, #tpu.memory_space<vmem>>, %arg6: memref<256x64xbf16, #tpu.memory_space<vmem>>, %arg7: memref<256x64xf32, #tpu.memory_space<vmem>>) attributes {dimension_semantics = [#tpu.dimension_semantics<parallel>, #tpu.dimension_semantics<parallel>, #tpu.dimension_semantics<arbitrary>], iteration_bounds = array<i64: 3, 1, 1>, scalar_prefetch = 0 : i64, scratch_operands = 1 : i64, tpu.core_type = #tpu.core_type<tc>, window_params = [{transform_indices = @transform_0, window_bounds = array<i64: 256, 48>}, {transform_indices = @transform_1, window_bounds = array<i64: 48, 64>}, {transform_indices = @transform_2, window_bounds = array<i64: 1, 64>}, {transform_indices = @transform_3, window_bounds = array<i64: 256, 64>}]} {
    %c0_i32 = arith.constant 0 : i32
    %0 = arith.cmpi eq, %arg2, %c0_i32 : i32
    %1 = arith.extui %0 : i1 to i32
    %c0_i32_0 = arith.constant 0 : i32
    %2 = arith.cmpi ne, %1, %c0_i32_0 : i32
    scf.if %2 {
      %cst_10 = arith.constant 0.000000e+00 : f32
      %12 = vector.broadcast %cst_10 : f32 to vector<256x64xf32>
      %c0_11 = arith.constant 0 : index
      %c0_12 = arith.constant 0 : index
      %13 = vector.load %arg7[%c0_11, %c0_12] : memref<256x64xf32, #tpu.memory_space<vmem>>, vector<256x64xf32>
      tpu.vector_store %arg7[%c0_11, %c0_12], %12 {strides = array<i32>} : memref<256x64xf32, #tpu.memory_space<vmem>>, vector<256x64xf32>,
    } else {
    }
    %c0 = arith.constant 0 : index
    %c0_1 = arith.constant 0 : index
    %3 = vector.load %arg7[%c0, %c0_1] : memref<256x64xf32, #tpu.memory_space<vmem>>, vector<256x64xf32>
    %c0_2 = arith.constant 0 : index
    %c0_3 = arith.constant 0 : index
    %4 = vector.load %arg3[%c0_2, %c0_3] : memref<256x48xbf16, #tpu.memory_space<vmem>>, vector<256x48xbf16>
    %c0_4 = arith.constant 0 : index
    %c0_5 = arith.constant 0 : index
    %5 = vector.load %arg4[%c0_4, %c0_5] : memref<48x64xbf16, #tpu.memory_space<vmem>>, vector<48x64xbf16>
    %cst = arith.constant dense<0.000000e+00> : vector<256x64xf32>
    %6 = tpu.matmul %4, %5, %cst {dimension_numbers = #tpu.dot_dimension_numbers<[1], [0], [0], [1], [0, 0, 1, 1], [], []>} : vector<256x48xbf16>, vector<48x64xbf16>, vector<256x64xf32> -> vector<256x64xf32>
    %7 = arith.addf %3, %6 : vector<256x64xf32>
    %c0_6 = arith.constant 0 : index
    %c0_7 = arith.constant 0 : index
    %8 = vector.load %arg7[%c0_6, %c0_7] : memref<256x64xf32, #tpu.memory_space<vmem>>, vector<256x64xf32>
    tpu.vector_store %arg7[%c0_6, %c0_7], %7 {strides = array<i32>} : memref<256x64xf32, #tpu.memory_space<vmem>>, vector<256x64xf32>,
    %c0_i32_8 = arith.constant 0 : i32
    %9 = arith.cmpi eq, %arg2, %c0_i32_8 : i32
    %10 = arith.extui %9 : i1 to i32
    %c0_i32_9 = arith.constant 0 : i32
    %11 = arith.cmpi ne, %10, %c0_i32_9 : i32
    scf.if %11 {
      %c0_10 = arith.constant 0 : index
      %c0_11 = arith.constant 0 : index
      %12 = vector.load %arg7[%c0_10, %c0_11] : memref<256x64xf32, #tpu.memory_space<vmem>>, vector<256x64xf32>
      %c0_12 = arith.constant 0 : index
      %c0_13 = arith.constant 0 : index
      %13 = vector.load %arg5[%c0_12, %c0_13] : memref<1x64xf32, #tpu.memory_space<vmem>>, vector<1x64xf32>
      %14 = vector.broadcast %13 : vector<1x64xf32> to vector<256x64xf32>
      %15 = arith.addf %12, %14 : vector<256x64xf32>
      %cst_14 = arith.constant 0.000000e+00 : f32
      %16 = vector.broadcast %cst_14 : f32 to vector<256x64xf32>
      %17 = arith.maximumf %15, %16 : vector<256x64xf32>
      %18 = arith.truncf %17 : vector<256x64xf32> to vector<256x64xbf16>
      %c0_15 = arith.constant 0 : index
      %c0_16 = arith.constant 0 : index
      %19 = vector.load %arg6[%c0_15, %c0_16] : memref<256x64xbf16, #tpu.memory_space<vmem>>, vector<256x64xbf16>
      tpu.vector_store %arg6[%c0_15, %c0_16], %18 {strides = array<i32>} : memref<256x64xbf16, #tpu.memory_space<vmem>>, vector<256x64xbf16>,
    } else {
    }
    return
  }
  func.func @transform_0(%arg0: i32, %arg1: i32, %arg2: i32) -> (i32, i32) {
    %c0_i32 = arith.constant 0 : i32
    return %arg0, %arg2 : i32, i32
  }
  func.func @transform_1(%arg0: i32, %arg1: i32, %arg2: i32) -> (i32, i32) {
    %c0_i32 = arith.constant 0 : i32
    return %arg2, %arg1 : i32, i32
  }
  func.func @transform_2(%arg0: i32, %arg1: i32, %arg2: i32) -> (i32, i32) {
    %c0_i32 = arith.constant 0 : i32
    %c0_i32_0 = arith.constant 0 : i32
    return %c0_i32, %arg1 : i32, i32
  }
  func.func @transform_3(%arg0: i32, %arg1: i32, %arg2: i32) -> (i32, i32) {
    %c0_i32 = arith.constant 0 : i32
    return %arg0, %arg1 : i32, i32
  }
}

module attributes {stable_mosaic.version = 11 : i64} {
  func.func @_maxpool3x3s2_kernel(%arg0: i32, %arg1: memref<1x9x9x64xbf16, #tpu.memory_space<vmem>>, %arg2: memref<1x9x8x64xbf16, #tpu.memory_space<vmem>>, %arg3: memref<1x8x9x64xbf16, #tpu.memory_space<vmem>>, %arg4: memref<1x8x8x64xbf16, #tpu.memory_space<vmem>>, %arg5: memref<1x8x8x64xbf16, #tpu.memory_space<vmem>>) attributes {dimension_semantics = [#tpu.dimension_semantics<parallel>], iteration_bounds = array<i64: 2>, scalar_prefetch = 0 : i64, scratch_operands = 0 : i64, tpu.core_type = #tpu.core_type<tc>, window_params = [{transform_indices = @transform_0, window_bounds = array<i64: 1, 9, 9, 64>}, {transform_indices = @transform_1, window_bounds = array<i64: 1, 9, 8, 64>}, {transform_indices = @transform_2, window_bounds = array<i64: 1, 8, 9, 64>}, {transform_indices = @transform_3, window_bounds = array<i64: 1, 8, 8, 64>}, {transform_indices = @transform_4, window_bounds = array<i64: 1, 8, 8, 64>}]} {
    %c0 = arith.constant 0 : index
    %c0_0 = arith.constant 0 : index
    %c0_1 = arith.constant 0 : index
    %c0_2 = arith.constant 0 : index
    %0 = vector.load %arg1[%c0, %c0_0, %c0_1, %c0_2] : memref<1x9x9x64xbf16, #tpu.memory_space<vmem>>, vector<1x9x9x64xbf16>
    %1 = vector.shape_cast %0 : vector<1x9x9x64xbf16> to vector<9x9x64xbf16>
    %c0_3 = arith.constant 0 : index
    %c0_4 = arith.constant 0 : index
    %c0_5 = arith.constant 0 : index
    %c0_6 = arith.constant 0 : index
    %2 = vector.load %arg2[%c0_3, %c0_4, %c0_5, %c0_6] : memref<1x9x8x64xbf16, #tpu.memory_space<vmem>>, vector<1x9x8x64xbf16>
    %3 = vector.shape_cast %2 : vector<1x9x8x64xbf16> to vector<9x8x64xbf16>
    %c0_7 = arith.constant 0 : index
    %c0_8 = arith.constant 0 : index
    %c0_9 = arith.constant 0 : index
    %c0_10 = arith.constant 0 : index
    %4 = vector.load %arg3[%c0_7, %c0_8, %c0_9, %c0_10] : memref<1x8x9x64xbf16, #tpu.memory_space<vmem>>, vector<1x8x9x64xbf16>
    %5 = vector.shape_cast %4 : vector<1x8x9x64xbf16> to vector<8x9x64xbf16>
    %c0_11 = arith.constant 0 : index
    %c0_12 = arith.constant 0 : index
    %c0_13 = arith.constant 0 : index
    %c0_14 = arith.constant 0 : index
    %6 = vector.load %arg4[%c0_11, %c0_12, %c0_13, %c0_14] : memref<1x8x8x64xbf16, #tpu.memory_space<vmem>>, vector<1x8x8x64xbf16>
    %7 = vector.shape_cast %6 : vector<1x8x8x64xbf16> to vector<8x8x64xbf16>
    %8 = vector.extract_strided_slice %1 {offsets = [0, 0, 0], sizes = [8, 8, 64], strides = [1, 1, 1]} : vector<9x9x64xbf16> to vector<8x8x64xbf16>
    %9 = vector.extract_strided_slice %3 {offsets = [0, 0, 0], sizes = [8, 8, 64], strides = [1, 1, 1]} : vector<9x8x64xbf16> to vector<8x8x64xbf16>
    %10 = arith.maximumf %8, %9 : vector<8x8x64xbf16>
    %11 = vector.extract_strided_slice %1 {offsets = [0, 1, 0], sizes = [8, 8, 64], strides = [1, 1, 1]} : vector<9x9x64xbf16> to vector<8x8x64xbf16>
    %12 = arith.maximumf %10, %11 : vector<8x8x64xbf16>
    %13 = vector.extract_strided_slice %5 {offsets = [0, 0, 0], sizes = [8, 8, 64], strides = [1, 1, 1]} : vector<8x9x64xbf16> to vector<8x8x64xbf16>
    %14 = arith.maximumf %12, %13 : vector<8x8x64xbf16>
    %15 = arith.maximumf %14, %7 : vector<8x8x64xbf16>
    %16 = vector.extract_strided_slice %5 {offsets = [0, 1, 0], sizes = [8, 8, 64], strides = [1, 1, 1]} : vector<8x9x64xbf16> to vector<8x8x64xbf16>
    %17 = arith.maximumf %15, %16 : vector<8x8x64xbf16>
    %18 = vector.extract_strided_slice %1 {offsets = [1, 0, 0], sizes = [8, 8, 64], strides = [1, 1, 1]} : vector<9x9x64xbf16> to vector<8x8x64xbf16>
    %19 = arith.maximumf %17, %18 : vector<8x8x64xbf16>
    %20 = vector.extract_strided_slice %3 {offsets = [1, 0, 0], sizes = [8, 8, 64], strides = [1, 1, 1]} : vector<9x8x64xbf16> to vector<8x8x64xbf16>
    %21 = arith.maximumf %19, %20 : vector<8x8x64xbf16>
    %22 = vector.extract_strided_slice %1 {offsets = [1, 1, 0], sizes = [8, 8, 64], strides = [1, 1, 1]} : vector<9x9x64xbf16> to vector<8x8x64xbf16>
    %23 = arith.maximumf %21, %22 : vector<8x8x64xbf16>
    %c0_15 = arith.constant 0 : index
    %c0_16 = arith.constant 0 : index
    %c0_17 = arith.constant 0 : index
    %c0_18 = arith.constant 0 : index
    %24 = vector.load %arg5[%c0_15, %c0_16, %c0_17, %c0_18] : memref<1x8x8x64xbf16, #tpu.memory_space<vmem>>, vector<1x8x8x64xbf16>
    %25 = vector.shape_cast %24 : vector<1x8x8x64xbf16> to vector<8x8x64xbf16>
    %26 = vector.shape_cast %23 : vector<8x8x64xbf16> to vector<1x8x8x64xbf16>
    tpu.vector_store %arg5[%c0_15, %c0_16, %c0_17, %c0_18], %26 {strides = array<i32>} : memref<1x8x8x64xbf16, #tpu.memory_space<vmem>>, vector<1x8x8x64xbf16>,
    return
  }
  func.func @transform_0(%arg0: i32) -> (i32, i32, i32, i32) {
    %c0_i32 = arith.constant 0 : i32
    %c0_i32_0 = arith.constant 0 : i32
    %c0_i32_1 = arith.constant 0 : i32
    %c0_i32_2 = arith.constant 0 : i32
    return %arg0, %c0_i32, %c0_i32_0, %c0_i32_1 : i32, i32, i32, i32
  }
  func.func @transform_1(%arg0: i32) -> (i32, i32, i32, i32) {
    %c0_i32 = arith.constant 0 : i32
    %c0_i32_0 = arith.constant 0 : i32
    %c0_i32_1 = arith.constant 0 : i32
    %c0_i32_2 = arith.constant 0 : i32
    return %arg0, %c0_i32, %c0_i32_0, %c0_i32_1 : i32, i32, i32, i32
  }
  func.func @transform_2(%arg0: i32) -> (i32, i32, i32, i32) {
    %c0_i32 = arith.constant 0 : i32
    %c0_i32_0 = arith.constant 0 : i32
    %c0_i32_1 = arith.constant 0 : i32
    %c0_i32_2 = arith.constant 0 : i32
    return %arg0, %c0_i32, %c0_i32_0, %c0_i32_1 : i32, i32, i32, i32
  }
  func.func @transform_3(%arg0: i32) -> (i32, i32, i32, i32) {
    %c0_i32 = arith.constant 0 : i32
    %c0_i32_0 = arith.constant 0 : i32
    %c0_i32_1 = arith.constant 0 : i32
    %c0_i32_2 = arith.constant 0 : i32
    return %arg0, %c0_i32, %c0_i32_0, %c0_i32_1 : i32, i32, i32, i32
  }
  func.func @transform_4(%arg0: i32) -> (i32, i32, i32, i32) {
    %c0_i32 = arith.constant 0 : i32
    %c0_i32_0 = arith.constant 0 : i32
    %c0_i32_1 = arith.constant 0 : i32
    %c0_i32_2 = arith.constant 0 : i32
    return %arg0, %c0_i32, %c0_i32_0, %c0_i32_1 : i32, i32, i32, i32
  }
}

module attributes {stable_mosaic.version = 11 : i64} {
  func.func @_matmul_bias_kernel(%arg0: i32, %arg1: i32, %arg2: i32, %arg3: memref<128x512xbf16, #tpu.memory_space<vmem>>, %arg4: memref<512x64xbf16, #tpu.memory_space<vmem>>, %arg5: memref<1x64xf32, #tpu.memory_space<vmem>>, %arg6: memref<128x64xbf16, #tpu.memory_space<vmem>>, %arg7: memref<128x64xf32, #tpu.memory_space<vmem>>) attributes {dimension_semantics = [#tpu.dimension_semantics<parallel>, #tpu.dimension_semantics<parallel>, #tpu.dimension_semantics<arbitrary>], iteration_bounds = array<i64: 1, 1, 4>, scalar_prefetch = 0 : i64, scratch_operands = 1 : i64, tpu.core_type = #tpu.core_type<tc>, window_params = [{transform_indices = @transform_0, window_bounds = array<i64: 128, 512>}, {transform_indices = @transform_1, window_bounds = array<i64: 512, 64>}, {transform_indices = @transform_2, window_bounds = array<i64: 1, 64>}, {transform_indices = @transform_3, window_bounds = array<i64: 128, 64>}]} {
    %c0_i32 = arith.constant 0 : i32
    %0 = arith.cmpi eq, %arg2, %c0_i32 : i32
    %1 = arith.extui %0 : i1 to i32
    %c0_i32_0 = arith.constant 0 : i32
    %2 = arith.cmpi ne, %1, %c0_i32_0 : i32
    scf.if %2 {
      %cst_9 = arith.constant 0.000000e+00 : f32
      %12 = vector.broadcast %cst_9 : f32 to vector<128x64xf32>
      %c0_10 = arith.constant 0 : index
      %c0_11 = arith.constant 0 : index
      %13 = vector.load %arg7[%c0_10, %c0_11] : memref<128x64xf32, #tpu.memory_space<vmem>>, vector<128x64xf32>
      tpu.vector_store %arg7[%c0_10, %c0_11], %12 {strides = array<i32>} : memref<128x64xf32, #tpu.memory_space<vmem>>, vector<128x64xf32>,
    } else {
    }
    %c0 = arith.constant 0 : index
    %c0_1 = arith.constant 0 : index
    %3 = vector.load %arg7[%c0, %c0_1] : memref<128x64xf32, #tpu.memory_space<vmem>>, vector<128x64xf32>
    %c0_2 = arith.constant 0 : index
    %c0_3 = arith.constant 0 : index
    %4 = vector.load %arg3[%c0_2, %c0_3] : memref<128x512xbf16, #tpu.memory_space<vmem>>, vector<128x512xbf16>
    %c0_4 = arith.constant 0 : index
    %c0_5 = arith.constant 0 : index
    %5 = vector.load %arg4[%c0_4, %c0_5] : memref<512x64xbf16, #tpu.memory_space<vmem>>, vector<512x64xbf16>
    %cst = arith.constant dense<0.000000e+00> : vector<128x64xf32>
    %6 = tpu.matmul %4, %5, %cst {dimension_numbers = #tpu.dot_dimension_numbers<[1], [0], [0], [1], [0, 0, 1, 1], [], []>} : vector<128x512xbf16>, vector<512x64xbf16>, vector<128x64xf32> -> vector<128x64xf32>
    %7 = arith.addf %3, %6 : vector<128x64xf32>
    %c0_6 = arith.constant 0 : index
    %c0_7 = arith.constant 0 : index
    %8 = vector.load %arg7[%c0_6, %c0_7] : memref<128x64xf32, #tpu.memory_space<vmem>>, vector<128x64xf32>
    tpu.vector_store %arg7[%c0_6, %c0_7], %7 {strides = array<i32>} : memref<128x64xf32, #tpu.memory_space<vmem>>, vector<128x64xf32>,
    %c3_i32 = arith.constant 3 : i32
    %9 = arith.cmpi eq, %arg2, %c3_i32 : i32
    %10 = arith.extui %9 : i1 to i32
    %c0_i32_8 = arith.constant 0 : i32
    %11 = arith.cmpi ne, %10, %c0_i32_8 : i32
    scf.if %11 {
      %c0_9 = arith.constant 0 : index
      %c0_10 = arith.constant 0 : index
      %12 = vector.load %arg7[%c0_9, %c0_10] : memref<128x64xf32, #tpu.memory_space<vmem>>, vector<128x64xf32>
      %c0_11 = arith.constant 0 : index
      %c0_12 = arith.constant 0 : index
      %13 = vector.load %arg5[%c0_11, %c0_12] : memref<1x64xf32, #tpu.memory_space<vmem>>, vector<1x64xf32>
      %14 = vector.broadcast %13 : vector<1x64xf32> to vector<128x64xf32>
      %15 = arith.addf %12, %14 : vector<128x64xf32>
      %cst_13 = arith.constant 0.000000e+00 : f32
      %16 = vector.broadcast %cst_13 : f32 to vector<128x64xf32>
      %17 = arith.maximumf %15, %16 : vector<128x64xf32>
      %18 = arith.truncf %17 : vector<128x64xf32> to vector<128x64xbf16>
      %c0_14 = arith.constant 0 : index
      %c0_15 = arith.constant 0 : index
      %19 = vector.load %arg6[%c0_14, %c0_15] : memref<128x64xbf16, #tpu.memory_space<vmem>>, vector<128x64xbf16>
      tpu.vector_store %arg6[%c0_14, %c0_15], %18 {strides = array<i32>} : memref<128x64xbf16, #tpu.memory_space<vmem>>, vector<128x64xbf16>,
    } else {
    }
    return
  }
  func.func @transform_0(%arg0: i32, %arg1: i32, %arg2: i32) -> (i32, i32) {
    %c0_i32 = arith.constant 0 : i32
    return %arg0, %arg2 : i32, i32
  }
  func.func @transform_1(%arg0: i32, %arg1: i32, %arg2: i32) -> (i32, i32) {
    %c0_i32 = arith.constant 0 : i32
    return %arg2, %arg1 : i32, i32
  }
  func.func @transform_2(%arg0: i32, %arg1: i32, %arg2: i32) -> (i32, i32) {
    %c0_i32 = arith.constant 0 : i32
    %c0_i32_0 = arith.constant 0 : i32
    return %c0_i32, %arg1 : i32, i32
  }
  func.func @transform_3(%arg0: i32, %arg1: i32, %arg2: i32) -> (i32, i32) {
    %c0_i32 = arith.constant 0 : i32
    return %arg0, %arg1 : i32, i32
  }
}

module attributes {stable_mosaic.version = 11 : i64} {
  func.func @_maxpool3x3s2_kernel(%arg0: i32, %arg1: memref<1x4x4x64xbf16, #tpu.memory_space<vmem>>, %arg2: memref<1x4x4x64xbf16, #tpu.memory_space<vmem>>, %arg3: memref<1x4x4x64xbf16, #tpu.memory_space<vmem>>, %arg4: memref<1x4x4x64xbf16, #tpu.memory_space<vmem>>, %arg5: memref<1x3x3x64xbf16, #tpu.memory_space<vmem>>) attributes {dimension_semantics = [#tpu.dimension_semantics<parallel>], iteration_bounds = array<i64: 2>, scalar_prefetch = 0 : i64, scratch_operands = 0 : i64, tpu.core_type = #tpu.core_type<tc>, window_params = [{transform_indices = @transform_0, window_bounds = array<i64: 1, 4, 4, 64>}, {transform_indices = @transform_1, window_bounds = array<i64: 1, 4, 4, 64>}, {transform_indices = @transform_2, window_bounds = array<i64: 1, 4, 4, 64>}, {transform_indices = @transform_3, window_bounds = array<i64: 1, 4, 4, 64>}, {transform_indices = @transform_4, window_bounds = array<i64: 1, 3, 3, 64>}]} {
    %c0 = arith.constant 0 : index
    %c0_0 = arith.constant 0 : index
    %c0_1 = arith.constant 0 : index
    %c0_2 = arith.constant 0 : index
    %0 = vector.load %arg1[%c0, %c0_0, %c0_1, %c0_2] : memref<1x4x4x64xbf16, #tpu.memory_space<vmem>>, vector<1x4x4x64xbf16>
    %1 = vector.shape_cast %0 : vector<1x4x4x64xbf16> to vector<4x4x64xbf16>
    %c0_3 = arith.constant 0 : index
    %c0_4 = arith.constant 0 : index
    %c0_5 = arith.constant 0 : index
    %c0_6 = arith.constant 0 : index
    %2 = vector.load %arg2[%c0_3, %c0_4, %c0_5, %c0_6] : memref<1x4x4x64xbf16, #tpu.memory_space<vmem>>, vector<1x4x4x64xbf16>
    %3 = vector.shape_cast %2 : vector<1x4x4x64xbf16> to vector<4x4x64xbf16>
    %c0_7 = arith.constant 0 : index
    %c0_8 = arith.constant 0 : index
    %c0_9 = arith.constant 0 : index
    %c0_10 = arith.constant 0 : index
    %4 = vector.load %arg3[%c0_7, %c0_8, %c0_9, %c0_10] : memref<1x4x4x64xbf16, #tpu.memory_space<vmem>>, vector<1x4x4x64xbf16>
    %5 = vector.shape_cast %4 : vector<1x4x4x64xbf16> to vector<4x4x64xbf16>
    %c0_11 = arith.constant 0 : index
    %c0_12 = arith.constant 0 : index
    %c0_13 = arith.constant 0 : index
    %c0_14 = arith.constant 0 : index
    %6 = vector.load %arg4[%c0_11, %c0_12, %c0_13, %c0_14] : memref<1x4x4x64xbf16, #tpu.memory_space<vmem>>, vector<1x4x4x64xbf16>
    %7 = vector.shape_cast %6 : vector<1x4x4x64xbf16> to vector<4x4x64xbf16>
    %8 = vector.extract_strided_slice %1 {offsets = [0, 0, 0], sizes = [3, 3, 64], strides = [1, 1, 1]} : vector<4x4x64xbf16> to vector<3x3x64xbf16>
    %9 = vector.extract_strided_slice %3 {offsets = [0, 0, 0], sizes = [3, 3, 64], strides = [1, 1, 1]} : vector<4x4x64xbf16> to vector<3x3x64xbf16>
    %10 = arith.maximumf %8, %9 : vector<3x3x64xbf16>
    %11 = vector.extract_strided_slice %1 {offsets = [0, 1, 0], sizes = [3, 3, 64], strides = [1, 1, 1]} : vector<4x4x64xbf16> to vector<3x3x64xbf16>
    %12 = arith.maximumf %10, %11 : vector<3x3x64xbf16>
    %13 = vector.extract_strided_slice %5 {offsets = [0, 0, 0], sizes = [3, 3, 64], strides = [1, 1, 1]} : vector<4x4x64xbf16> to vector<3x3x64xbf16>
    %14 = arith.maximumf %12, %13 : vector<3x3x64xbf16>
    %15 = vector.extract_strided_slice %7 {offsets = [0, 0, 0], sizes = [3, 3, 64], strides = [1, 1, 1]} : vector<4x4x64xbf16> to vector<3x3x64xbf16>
    %16 = arith.maximumf %14, %15 : vector<3x3x64xbf16>
    %17 = vector.extract_strided_slice %5 {offsets = [0, 1, 0], sizes = [3, 3, 64], strides = [1, 1, 1]} : vector<4x4x64xbf16> to vector<3x3x64xbf16>
    %18 = arith.maximumf %16, %17 : vector<3x3x64xbf16>
    %19 = vector.extract_strided_slice %1 {offsets = [1, 0, 0], sizes = [3, 3, 64], strides = [1, 1, 1]} : vector<4x4x64xbf16> to vector<3x3x64xbf16>
    %20 = arith.maximumf %18, %19 : vector<3x3x64xbf16>
    %21 = vector.extract_strided_slice %3 {offsets = [1, 0, 0], sizes = [3, 3, 64], strides = [1, 1, 1]} : vector<4x4x64xbf16> to vector<3x3x64xbf16>
    %22 = arith.maximumf %20, %21 : vector<3x3x64xbf16>
    %23 = vector.extract_strided_slice %1 {offsets = [1, 1, 0], sizes = [3, 3, 64], strides = [1, 1, 1]} : vector<4x4x64xbf16> to vector<3x3x64xbf16>
    %24 = arith.maximumf %22, %23 : vector<3x3x64xbf16>
    %c0_15 = arith.constant 0 : index
    %c0_16 = arith.constant 0 : index
    %c0_17 = arith.constant 0 : index
    %c0_18 = arith.constant 0 : index
    %25 = vector.load %arg5[%c0_15, %c0_16, %c0_17, %c0_18] : memref<1x3x3x64xbf16, #tpu.memory_space<vmem>>, vector<1x3x3x64xbf16>
    %26 = vector.shape_cast %25 : vector<1x3x3x64xbf16> to vector<3x3x64xbf16>
    %27 = vector.shape_cast %24 : vector<3x3x64xbf16> to vector<1x3x3x64xbf16>
    tpu.vector_store %arg5[%c0_15, %c0_16, %c0_17, %c0_18], %27 {strides = array<i32>} : memref<1x3x3x64xbf16, #tpu.memory_space<vmem>>, vector<1x3x3x64xbf16>,
    return
  }
  func.func @transform_0(%arg0: i32) -> (i32, i32, i32, i32) {
    %c0_i32 = arith.constant 0 : i32
    %c0_i32_0 = arith.constant 0 : i32
    %c0_i32_1 = arith.constant 0 : i32
    %c0_i32_2 = arith.constant 0 : i32
    return %arg0, %c0_i32, %c0_i32_0, %c0_i32_1 : i32, i32, i32, i32
  }
  func.func @transform_1(%arg0: i32) -> (i32, i32, i32, i32) {
    %c0_i32 = arith.constant 0 : i32
    %c0_i32_0 = arith.constant 0 : i32
    %c0_i32_1 = arith.constant 0 : i32
    %c0_i32_2 = arith.constant 0 : i32
    return %arg0, %c0_i32, %c0_i32_0, %c0_i32_1 : i32, i32, i32, i32
  }
  func.func @transform_2(%arg0: i32) -> (i32, i32, i32, i32) {
    %c0_i32 = arith.constant 0 : i32
    %c0_i32_0 = arith.constant 0 : i32
    %c0_i32_1 = arith.constant 0 : i32
    %c0_i32_2 = arith.constant 0 : i32
    return %arg0, %c0_i32, %c0_i32_0, %c0_i32_1 : i32, i32, i32, i32
  }
  func.func @transform_3(%arg0: i32) -> (i32, i32, i32, i32) {
    %c0_i32 = arith.constant 0 : i32
    %c0_i32_0 = arith.constant 0 : i32
    %c0_i32_1 = arith.constant 0 : i32
    %c0_i32_2 = arith.constant 0 : i32
    return %arg0, %c0_i32, %c0_i32_0, %c0_i32_1 : i32, i32, i32, i32
  }
  func.func @transform_4(%arg0: i32) -> (i32, i32, i32, i32) {
    %c0_i32 = arith.constant 0 : i32
    %c0_i32_0 = arith.constant 0 : i32
    %c0_i32_1 = arith.constant 0 : i32
    %c0_i32_2 = arith.constant 0 : i32
    return %arg0, %c0_i32, %c0_i32_0, %c0_i32_1 : i32, i32, i32, i32
  }
}

module attributes {stable_mosaic.version = 11 : i64} {
  func.func @_matmul_bias_kernel(%arg0: i32, %arg1: i32, %arg2: i32, %arg3: memref<18x576xbf16, #tpu.memory_space<vmem>>, %arg4: memref<576x64xbf16, #tpu.memory_space<vmem>>, %arg5: memref<1x64xf32, #tpu.memory_space<vmem>>, %arg6: memref<18x64xbf16, #tpu.memory_space<vmem>>, %arg7: memref<18x64xf32, #tpu.memory_space<vmem>>) attributes {dimension_semantics = [#tpu.dimension_semantics<parallel>, #tpu.dimension_semantics<parallel>, #tpu.dimension_semantics<arbitrary>], iteration_bounds = array<i64: 1, 1, 1>, scalar_prefetch = 0 : i64, scratch_operands = 1 : i64, tpu.core_type = #tpu.core_type<tc>, window_params = [{transform_indices = @transform_0, window_bounds = array<i64: 18, 576>}, {transform_indices = @transform_1, window_bounds = array<i64: 576, 64>}, {transform_indices = @transform_2, window_bounds = array<i64: 1, 64>}, {transform_indices = @transform_3, window_bounds = array<i64: 18, 64>}]} {
    %c0_i32 = arith.constant 0 : i32
    %0 = arith.cmpi eq, %arg2, %c0_i32 : i32
    %1 = arith.extui %0 : i1 to i32
    %c0_i32_0 = arith.constant 0 : i32
    %2 = arith.cmpi ne, %1, %c0_i32_0 : i32
    scf.if %2 {
      %cst_10 = arith.constant 0.000000e+00 : f32
      %12 = vector.broadcast %cst_10 : f32 to vector<18x64xf32>
      %c0_11 = arith.constant 0 : index
      %c0_12 = arith.constant 0 : index
      %13 = vector.load %arg7[%c0_11, %c0_12] : memref<18x64xf32, #tpu.memory_space<vmem>>, vector<18x64xf32>
      tpu.vector_store %arg7[%c0_11, %c0_12], %12 {strides = array<i32>} : memref<18x64xf32, #tpu.memory_space<vmem>>, vector<18x64xf32>,
    } else {
    }
    %c0 = arith.constant 0 : index
    %c0_1 = arith.constant 0 : index
    %3 = vector.load %arg7[%c0, %c0_1] : memref<18x64xf32, #tpu.memory_space<vmem>>, vector<18x64xf32>
    %c0_2 = arith.constant 0 : index
    %c0_3 = arith.constant 0 : index
    %4 = vector.load %arg3[%c0_2, %c0_3] : memref<18x576xbf16, #tpu.memory_space<vmem>>, vector<18x576xbf16>
    %c0_4 = arith.constant 0 : index
    %c0_5 = arith.constant 0 : index
    %5 = vector.load %arg4[%c0_4, %c0_5] : memref<576x64xbf16, #tpu.memory_space<vmem>>, vector<576x64xbf16>
    %cst = arith.constant dense<0.000000e+00> : vector<18x64xf32>
    %6 = tpu.matmul %4, %5, %cst {dimension_numbers = #tpu.dot_dimension_numbers<[1], [0], [0], [1], [0, 0, 1, 1], [], []>} : vector<18x576xbf16>, vector<576x64xbf16>, vector<18x64xf32> -> vector<18x64xf32>
    %7 = arith.addf %3, %6 : vector<18x64xf32>
    %c0_6 = arith.constant 0 : index
    %c0_7 = arith.constant 0 : index
    %8 = vector.load %arg7[%c0_6, %c0_7] : memref<18x64xf32, #tpu.memory_space<vmem>>, vector<18x64xf32>
    tpu.vector_store %arg7[%c0_6, %c0_7], %7 {strides = array<i32>} : memref<18x64xf32, #tpu.memory_space<vmem>>, vector<18x64xf32>,
    %c0_i32_8 = arith.constant 0 : i32
    %9 = arith.cmpi eq, %arg2, %c0_i32_8 : i32
    %10 = arith.extui %9 : i1 to i32
    %c0_i32_9 = arith.constant 0 : i32
    %11 = arith.cmpi ne, %10, %c0_i32_9 : i32
    scf.if %11 {
      %c0_10 = arith.constant 0 : index
      %c0_11 = arith.constant 0 : index
      %12 = vector.load %arg7[%c0_10, %c0_11] : memref<18x64xf32, #tpu.memory_space<vmem>>, vector<18x64xf32>
      %c0_12 = arith.constant 0 : index
      %c0_13 = arith.constant 0 : index
      %13 = vector.load %arg5[%c0_12, %c0_13] : memref<1x64xf32, #tpu.memory_space<vmem>>, vector<1x64xf32>
      %14 = vector.broadcast %13 : vector<1x64xf32> to vector<18x64xf32>
      %15 = arith.addf %12, %14 : vector<18x64xf32>
      %cst_14 = arith.constant 0.000000e+00 : f32
      %16 = vector.broadcast %cst_14 : f32 to vector<18x64xf32>
      %17 = arith.maximumf %15, %16 : vector<18x64xf32>
      %18 = arith.truncf %17 : vector<18x64xf32> to vector<18x64xbf16>
      %c0_15 = arith.constant 0 : index
      %c0_16 = arith.constant 0 : index
      %19 = vector.load %arg6[%c0_15, %c0_16] : memref<18x64xbf16, #tpu.memory_space<vmem>>, vector<18x64xbf16>
      tpu.vector_store %arg6[%c0_15, %c0_16], %18 {strides = array<i32>} : memref<18x64xbf16, #tpu.memory_space<vmem>>, vector<18x64xbf16>,
    } else {
    }
    return
  }
  func.func @transform_0(%arg0: i32, %arg1: i32, %arg2: i32) -> (i32, i32) {
    %c0_i32 = arith.constant 0 : i32
    return %arg0, %arg2 : i32, i32
  }
  func.func @transform_1(%arg0: i32, %arg1: i32, %arg2: i32) -> (i32, i32) {
    %c0_i32 = arith.constant 0 : i32
    return %arg2, %arg1 : i32, i32
  }
  func.func @transform_2(%arg0: i32, %arg1: i32, %arg2: i32) -> (i32, i32) {
    %c0_i32 = arith.constant 0 : i32
    %c0_i32_0 = arith.constant 0 : i32
    return %c0_i32, %arg1 : i32, i32
  }
  func.func @transform_3(%arg0: i32, %arg1: i32, %arg2: i32) -> (i32, i32) {
    %c0_i32 = arith.constant 0 : i32
    return %arg0, %arg1 : i32, i32
  }
}

module attributes {stable_mosaic.version = 11 : i64} {
  func.func @_maxpool3x3s2_kernel(%arg0: i32, %arg1: memref<1x2x2x64xbf16, #tpu.memory_space<vmem>>, %arg2: memref<1x2x1x64xbf16, #tpu.memory_space<vmem>>, %arg3: memref<1x1x2x64xbf16, #tpu.memory_space<vmem>>, %arg4: memref<1x1x1x64xbf16, #tpu.memory_space<vmem>>, %arg5: memref<1x1x1x64xbf16, #tpu.memory_space<vmem>>) attributes {dimension_semantics = [#tpu.dimension_semantics<parallel>], iteration_bounds = array<i64: 2>, scalar_prefetch = 0 : i64, scratch_operands = 0 : i64, tpu.core_type = #tpu.core_type<tc>, window_params = [{transform_indices = @transform_0, window_bounds = array<i64: 1, 2, 2, 64>}, {transform_indices = @transform_1, window_bounds = array<i64: 1, 2, 1, 64>}, {transform_indices = @transform_2, window_bounds = array<i64: 1, 1, 2, 64>}, {transform_indices = @transform_3, window_bounds = array<i64: 1, 1, 1, 64>}, {transform_indices = @transform_4, window_bounds = array<i64: 1, 1, 1, 64>}]} {
    %c0 = arith.constant 0 : index
    %c0_0 = arith.constant 0 : index
    %c0_1 = arith.constant 0 : index
    %c0_2 = arith.constant 0 : index
    %0 = vector.load %arg1[%c0, %c0_0, %c0_1, %c0_2] : memref<1x2x2x64xbf16, #tpu.memory_space<vmem>>, vector<1x2x2x64xbf16>
    %1 = vector.shape_cast %0 : vector<1x2x2x64xbf16> to vector<2x2x64xbf16>
    %c0_3 = arith.constant 0 : index
    %c0_4 = arith.constant 0 : index
    %c0_5 = arith.constant 0 : index
    %c0_6 = arith.constant 0 : index
    %2 = vector.load %arg2[%c0_3, %c0_4, %c0_5, %c0_6] : memref<1x2x1x64xbf16, #tpu.memory_space<vmem>>, vector<1x2x1x64xbf16>
    %3 = vector.shape_cast %2 : vector<1x2x1x64xbf16> to vector<2x1x64xbf16>
    %c0_7 = arith.constant 0 : index
    %c0_8 = arith.constant 0 : index
    %c0_9 = arith.constant 0 : index
    %c0_10 = arith.constant 0 : index
    %4 = vector.load %arg3[%c0_7, %c0_8, %c0_9, %c0_10] : memref<1x1x2x64xbf16, #tpu.memory_space<vmem>>, vector<1x1x2x64xbf16>
    %5 = vector.shape_cast %4 : vector<1x1x2x64xbf16> to vector<1x2x64xbf16>
    %c0_11 = arith.constant 0 : index
    %c0_12 = arith.constant 0 : index
    %c0_13 = arith.constant 0 : index
    %c0_14 = arith.constant 0 : index
    %6 = vector.load %arg4[%c0_11, %c0_12, %c0_13, %c0_14] : memref<1x1x1x64xbf16, #tpu.memory_space<vmem>>, vector<1x1x1x64xbf16>
    %7 = vector.shape_cast %6 : vector<1x1x1x64xbf16> to vector<1x1x64xbf16>
    %8 = vector.extract_strided_slice %1 {offsets = [0, 0, 0], sizes = [1, 1, 64], strides = [1, 1, 1]} : vector<2x2x64xbf16> to vector<1x1x64xbf16>
    %9 = vector.extract_strided_slice %3 {offsets = [0, 0, 0], sizes = [1, 1, 64], strides = [1, 1, 1]} : vector<2x1x64xbf16> to vector<1x1x64xbf16>
    %10 = arith.maximumf %8, %9 : vector<1x1x64xbf16>
    %11 = vector.extract_strided_slice %1 {offsets = [0, 1, 0], sizes = [1, 1, 64], strides = [1, 1, 1]} : vector<2x2x64xbf16> to vector<1x1x64xbf16>
    %12 = arith.maximumf %10, %11 : vector<1x1x64xbf16>
    %13 = vector.extract_strided_slice %5 {offsets = [0, 0, 0], sizes = [1, 1, 64], strides = [1, 1, 1]} : vector<1x2x64xbf16> to vector<1x1x64xbf16>
    %14 = arith.maximumf %12, %13 : vector<1x1x64xbf16>
    %15 = arith.maximumf %14, %7 : vector<1x1x64xbf16>
    %16 = vector.extract_strided_slice %5 {offsets = [0, 1, 0], sizes = [1, 1, 64], strides = [1, 1, 1]} : vector<1x2x64xbf16> to vector<1x1x64xbf16>
    %17 = arith.maximumf %15, %16 : vector<1x1x64xbf16>
    %18 = vector.extract_strided_slice %1 {offsets = [1, 0, 0], sizes = [1, 1, 64], strides = [1, 1, 1]} : vector<2x2x64xbf16> to vector<1x1x64xbf16>
    %19 = arith.maximumf %17, %18 : vector<1x1x64xbf16>
    %20 = vector.extract_strided_slice %3 {offsets = [1, 0, 0], sizes = [1, 1, 64], strides = [1, 1, 1]} : vector<2x1x64xbf16> to vector<1x1x64xbf16>
    %21 = arith.maximumf %19, %20 : vector<1x1x64xbf16>
    %22 = vector.extract_strided_slice %1 {offsets = [1, 1, 0], sizes = [1, 1, 64], strides = [1, 1, 1]} : vector<2x2x64xbf16> to vector<1x1x64xbf16>
    %23 = arith.maximumf %21, %22 : vector<1x1x64xbf16>
    %c0_15 = arith.constant 0 : index
    %c0_16 = arith.constant 0 : index
    %c0_17 = arith.constant 0 : index
    %c0_18 = arith.constant 0 : index
    %24 = vector.load %arg5[%c0_15, %c0_16, %c0_17, %c0_18] : memref<1x1x1x64xbf16, #tpu.memory_space<vmem>>, vector<1x1x1x64xbf16>
    %25 = vector.shape_cast %24 : vector<1x1x1x64xbf16> to vector<1x1x64xbf16>
    %26 = vector.shape_cast %23 : vector<1x1x64xbf16> to vector<1x1x1x64xbf16>
    tpu.vector_store %arg5[%c0_15, %c0_16, %c0_17, %c0_18], %26 {strides = array<i32>} : memref<1x1x1x64xbf16, #tpu.memory_space<vmem>>, vector<1x1x1x64xbf16>,
    return
  }
  func.func @transform_0(%arg0: i32) -> (i32, i32, i32, i32) {
    %c0_i32 = arith.constant 0 : i32
    %c0_i32_0 = arith.constant 0 : i32
    %c0_i32_1 = arith.constant 0 : i32
    %c0_i32_2 = arith.constant 0 : i32
    return %arg0, %c0_i32, %c0_i32_0, %c0_i32_1 : i32, i32, i32, i32
  }
  func.func @transform_1(%arg0: i32) -> (i32, i32, i32, i32) {
    %c0_i32 = arith.constant 0 : i32
    %c0_i32_0 = arith.constant 0 : i32
    %c0_i32_1 = arith.constant 0 : i32
    %c0_i32_2 = arith.constant 0 : i32
    return %arg0, %c0_i32, %c0_i32_0, %c0_i32_1 : i32, i32, i32, i32
  }
  func.func @transform_2(%arg0: i32) -> (i32, i32, i32, i32) {
    %c0_i32 = arith.constant 0 : i32
    %c0_i32_0 = arith.constant 0 : i32
    %c0_i32_1 = arith.constant 0 : i32
    %c0_i32_2 = arith.constant 0 : i32
    return %arg0, %c0_i32, %c0_i32_0, %c0_i32_1 : i32, i32, i32, i32
  }
  func.func @transform_3(%arg0: i32) -> (i32, i32, i32, i32) {
    %c0_i32 = arith.constant 0 : i32
    %c0_i32_0 = arith.constant 0 : i32
    %c0_i32_1 = arith.constant 0 : i32
    %c0_i32_2 = arith.constant 0 : i32
    return %arg0, %c0_i32, %c0_i32_0, %c0_i32_1 : i32, i32, i32, i32
  }
  func.func @transform_4(%arg0: i32) -> (i32, i32, i32, i32) {
    %c0_i32 = arith.constant 0 : i32
    %c0_i32_0 = arith.constant 0 : i32
    %c0_i32_1 = arith.constant 0 : i32
    %c0_i32_2 = arith.constant 0 : i32
    return %arg0, %c0_i32, %c0_i32_0, %c0_i32_1 : i32, i32, i32, i32
  }
}

module attributes {stable_mosaic.version = 11 : i64} {
  func.func @_classifier_kernel(%arg0: i32, %arg1: memref<2x64xbf16, #tpu.memory_space<vmem>>, %arg2: memref<64x448xbf16, #tpu.memory_space<vmem>>, %arg3: memref<1x448xf32, #tpu.memory_space<vmem>>, %arg4: memref<448x448xbf16, #tpu.memory_space<vmem>>, %arg5: memref<1x448xf32, #tpu.memory_space<vmem>>, %arg6: memref<448x1024xbf16, #tpu.memory_space<vmem>>, %arg7: memref<1x1024xf32, #tpu.memory_space<vmem>>, %arg8: memref<2x1024xf32, #tpu.memory_space<vmem>>) attributes {dimension_semantics = [#tpu.dimension_semantics<arbitrary>], iteration_bounds = array<i64: 1>, scalar_prefetch = 0 : i64, scratch_operands = 0 : i64, tpu.core_type = #tpu.core_type<tc>, window_params = [{pipeline_mode = #tpu.pipeline_mode<synchronous>, transform_indices = @transform_0, window_bounds = array<i64: 2, 64>}, {pipeline_mode = #tpu.pipeline_mode<synchronous>, transform_indices = @transform_1, window_bounds = array<i64: 64, 448>}, {pipeline_mode = #tpu.pipeline_mode<synchronous>, transform_indices = @transform_2, window_bounds = array<i64: 1, 448>}, {pipeline_mode = #tpu.pipeline_mode<synchronous>, transform_indices = @transform_3, window_bounds = array<i64: 448, 448>}, {pipeline_mode = #tpu.pipeline_mode<synchronous>, transform_indices = @transform_4, window_bounds = array<i64: 1, 448>}, {pipeline_mode = #tpu.pipeline_mode<synchronous>, transform_indices = @transform_5, window_bounds = array<i64: 448, 1024>}, {pipeline_mode = #tpu.pipeline_mode<synchronous>, transform_indices = @transform_6, window_bounds = array<i64: 1, 1024>}, {pipeline_mode = #tpu.pipeline_mode<synchronous>, transform_indices = @transform_7, window_bounds = array<i64: 2, 1024>}]} {
    %c0 = arith.constant 0 : index
    %c0_0 = arith.constant 0 : index
    %0 = vector.load %arg1[%c0, %c0_0] : memref<2x64xbf16, #tpu.memory_space<vmem>>, vector<2x64xbf16>
    %c0_1 = arith.constant 0 : index
    %c0_2 = arith.constant 0 : index
    %1 = vector.load %arg2[%c0_1, %c0_2] : memref<64x448xbf16, #tpu.memory_space<vmem>>, vector<64x448xbf16>
    %cst = arith.constant dense<0.000000e+00> : vector<2x448xf32>
    %2 = tpu.matmul %0, %1, %cst {dimension_numbers = #tpu.dot_dimension_numbers<[1], [0], [0], [1], [0, 0, 1, 1], [], []>} : vector<2x64xbf16>, vector<64x448xbf16>, vector<2x448xf32> -> vector<2x448xf32>
    %c0_3 = arith.constant 0 : index
    %c0_4 = arith.constant 0 : index
    %3 = vector.load %arg3[%c0_3, %c0_4] : memref<1x448xf32, #tpu.memory_space<vmem>>, vector<1x448xf32>
    %4 = vector.broadcast %3 : vector<1x448xf32> to vector<2x448xf32>
    %5 = arith.addf %2, %4 : vector<2x448xf32>
    %cst_5 = arith.constant 0.000000e+00 : f32
    %6 = vector.broadcast %cst_5 : f32 to vector<2x448xf32>
    %7 = arith.maximumf %5, %6 : vector<2x448xf32>
    %8 = arith.truncf %7 : vector<2x448xf32> to vector<2x448xbf16>
    %c0_6 = arith.constant 0 : index
    %c0_7 = arith.constant 0 : index
    %9 = vector.load %arg4[%c0_6, %c0_7] : memref<448x448xbf16, #tpu.memory_space<vmem>>, vector<448x448xbf16>
    %cst_8 = arith.constant dense<0.000000e+00> : vector<2x448xf32>
    %10 = tpu.matmul %8, %9, %cst_8 {dimension_numbers = #tpu.dot_dimension_numbers<[1], [0], [0], [1], [0, 0, 1, 1], [], []>} : vector<2x448xbf16>, vector<448x448xbf16>, vector<2x448xf32> -> vector<2x448xf32>
    %c0_9 = arith.constant 0 : index
    %c0_10 = arith.constant 0 : index
    %11 = vector.load %arg5[%c0_9, %c0_10] : memref<1x448xf32, #tpu.memory_space<vmem>>, vector<1x448xf32>
    %12 = vector.broadcast %11 : vector<1x448xf32> to vector<2x448xf32>
    %13 = arith.addf %10, %12 : vector<2x448xf32>
    %cst_11 = arith.constant 0.000000e+00 : f32
    %14 = vector.broadcast %cst_11 : f32 to vector<2x448xf32>
    %15 = arith.maximumf %13, %14 : vector<2x448xf32>
    %16 = arith.truncf %15 : vector<2x448xf32> to vector<2x448xbf16>
    %c0_12 = arith.constant 0 : index
    %c0_13 = arith.constant 0 : index
    %17 = vector.load %arg6[%c0_12, %c0_13] : memref<448x1024xbf16, #tpu.memory_space<vmem>>, vector<448x1024xbf16>
    %cst_14 = arith.constant dense<0.000000e+00> : vector<2x1024xf32>
    %18 = tpu.matmul %16, %17, %cst_14 {dimension_numbers = #tpu.dot_dimension_numbers<[1], [0], [0], [1], [0, 0, 1, 1], [], []>} : vector<2x448xbf16>, vector<448x1024xbf16>, vector<2x1024xf32> -> vector<2x1024xf32>
    %c0_15 = arith.constant 0 : index
    %c0_16 = arith.constant 0 : index
    %19 = vector.load %arg7[%c0_15, %c0_16] : memref<1x1024xf32, #tpu.memory_space<vmem>>, vector<1x1024xf32>
    %20 = vector.broadcast %19 : vector<1x1024xf32> to vector<2x1024xf32>
    %21 = arith.addf %18, %20 : vector<2x1024xf32>
    %c0_17 = arith.constant 0 : index
    %c0_18 = arith.constant 0 : index
    %22 = vector.load %arg8[%c0_17, %c0_18] : memref<2x1024xf32, #tpu.memory_space<vmem>>, vector<2x1024xf32>
    tpu.vector_store %arg8[%c0_17, %c0_18], %21 {strides = array<i32>} : memref<2x1024xf32, #tpu.memory_space<vmem>>, vector<2x1024xf32>,
    return
  }
  func.func @transform_0(%arg0: i32) -> (i32, i32) {
    %c0_i32 = arith.constant 0 : i32
    %c0_i32_0 = arith.constant 0 : i32
    %c0_i32_1 = arith.constant 0 : i32
    return %c0_i32, %c0_i32_0 : i32, i32
  }
  func.func @transform_1(%arg0: i32) -> (i32, i32) {
    %c0_i32 = arith.constant 0 : i32
    %c0_i32_0 = arith.constant 0 : i32
    %c0_i32_1 = arith.constant 0 : i32
    return %c0_i32, %c0_i32_0 : i32, i32
  }
  func.func @transform_2(%arg0: i32) -> (i32, i32) {
    %c0_i32 = arith.constant 0 : i32
    %c0_i32_0 = arith.constant 0 : i32
    %c0_i32_1 = arith.constant 0 : i32
    return %c0_i32, %c0_i32_0 : i32, i32
  }
  func.func @transform_3(%arg0: i32) -> (i32, i32) {
    %c0_i32 = arith.constant 0 : i32
    %c0_i32_0 = arith.constant 0 : i32
    %c0_i32_1 = arith.constant 0 : i32
    return %c0_i32, %c0_i32_0 : i32, i32
  }
  func.func @transform_4(%arg0: i32) -> (i32, i32) {
    %c0_i32 = arith.constant 0 : i32
    %c0_i32_0 = arith.constant 0 : i32
    %c0_i32_1 = arith.constant 0 : i32
    return %c0_i32, %c0_i32_0 : i32, i32
  }
  func.func @transform_5(%arg0: i32) -> (i32, i32) {
    %c0_i32 = arith.constant 0 : i32
    %c0_i32_0 = arith.constant 0 : i32
    %c0_i32_1 = arith.constant 0 : i32
    return %c0_i32, %c0_i32_0 : i32, i32
  }
  func.func @transform_6(%arg0: i32) -> (i32, i32) {
    %c0_i32 = arith.constant 0 : i32
    %c0_i32_0 = arith.constant 0 : i32
    %c0_i32_1 = arith.constant 0 : i32
    return %c0_i32, %c0_i32_0 : i32, i32
  }
  func.func @transform_7(%arg0: i32) -> (i32, i32) {
    %c0_i32 = arith.constant 0 : i32
    %c0_i32_0 = arith.constant 0 : i32
    %c0_i32_1 = arith.constant 0 : i32
    return %c0_i32, %c0_i32_0 : i32, i32
  }
}

</mosaic_0001>

<bundles_post_ra>
// kernel: alexnet_forward.9
= control target key start
LH: loop header
LB: loop body
LE: loop exit
PB: predicated region body
PF: predicated region fallthrough
CT: control target
= control target key end

     0   :  { %s1151_s12 = smov 0   ;;  %s1153_s13 = smov 0   ;;  %s1401_s0 = inlined_call_operand.vmem [shape: bf16[768,48], index: 0, kind: input, shape index: {}]   ;;  %s1402_s1 = inlined_call_operand.vmem [shape: bf16[48,64], index: 1, kind: input, shape index: {}]   ;;  %s1403_s2 = inlined_call_operand.vmem [shape: f32[1,64], index: 2, kind: input, shape index: {}]   ;;  %s1404_s3 = inlined_call_operand.vmem [shape: bf16[768,64], index: 3, kind: output, shape index: {}]  }
   0x1   :  { %s1155_s14 = smov 0  }
   0x2 LB: > { %s32_s15 = sadd.s32 1, %s1124_s13  ;;  %p953_p0 = scmp.ge.s32.totalorder %s1128_s14, 1  ;;  %s1128_s14 = sphi %s1155_s14, %s13_s14   ;;  %s1124_s13 = sphi %s1153_s13, %s1406_s13   ;;  %s1120_s12 = sphi %s1151_s12, %s1405_s12  }
   0x3   : > { %p34_p1 = scmp.ge.s32.totalorder %s32_s15, 3  ;;  %p188_p2 = scmp.lt.s32.totalorder %s1128_s14, 4 }
   0x5   : > { %s1408_s15 = smov (%p34_p1, %s32_s15), 0  ;;  %p189_p3 = pnand %p953_p0, %p188_p2 }
   0x6   : > { %s954_s18 = sshll.u32 (!%p189_p3), %s1120_s12, 5 }
   0x7   : > { %192 = sbr.rel (%p189_p3) target bundleno = 232 (0xe8), region = 32  ;;  %p230_p4 = scmp.lt.s32.totalorder (!%p189_p3), %s954_s18, 95 }
   0xc   : > { %v1070_v0 = vld [vmem:[%s1402_s1 + $0x10] sm:$0xff]  ;;  %v1069_v1 = vld [vmem:[%s1402_s1 + $0x8] sm:$0xff]  ;;  %s1410_s18 = smov (!%p230_p4, %s954_s18), 95  ;;  %v1068_v2 = vld [vmem:[%s1402_s1] sm:$0xff]  ;;  %vm465_vm0 = vcmask 392192   ;;  %vm264_vm1 = vcmask 523264  }
   0xd   : > { %519 = vmatpush.bf16.msra.mxu0 %v1070_v0  ;;  %1071 = vmatpush.bf16.msra.mxu1 %v1070_v0  ;;  %s955_s21 = sshll.u32 %s1410_s18, 2  ;;  %v1130_v11 = vmov 0.0   ;;  %v1257_v30 = vld [vmem:[%s1403_s2] ss:$0 sm:$0xff]  ;;  %vm803_vm2 = vcmask 519168  }
   0xe   : > { %1072 = vmatpush.bf16.msra.mxu2 %v1070_v0  ;;  %1073 = vmatpush.bf16.msra.mxu3 %v1070_v0  ;;  %s1186_s26 = scalar_lea.vmem %s1401_s0, %s955_s21  ;;  %265 = vst.msk [vmem:[#allocation2] sm:$0xff] %vm264_vm1, %v1130_v11  ;;  %s1270_s4 = scalar_lea.vmem %s1404_s3, %s955_s21 }
   0xf   : > { %v1052_v3 = vld [vmem:[%s1186_s26] sm:$0xff]  ;;  %v1053_v7 = vld [vmem:[%s1186_s26 + $0x8] sm:$0xff]  ;;  %266 = vst.msk [vmem:[#allocation2 + $0x8] sm:$0xff] %vm264_vm1, %v1130_v11  ;;  %v1054_v12 = vld [vmem:[%s1186_s26 + $0x10] sm:$0xff] }
  0x10   : > { %v1056_v4 = vld [vmem:[%s1186_s26 + $0x20] sm:$0xff]  ;;  %v1057_v8 = vld [vmem:[%s1186_s26 + $0x28] sm:$0xff]  ;;  %267 = vst.msk [vmem:[#allocation2 + $0x10] sm:$0xff] %vm264_vm1, %v1130_v11  ;;  %v1058_v13 = vld [vmem:[%s1186_s26 + $0x30] sm:$0xff] }
  0x11   : > { %520 = vmatpush.bf16.msra.mxu0 %v1069_v1  ;;  %1074 = vmatpush.bf16.msra.mxu1 %v1069_v1  ;;  %v1060_v5 = vld [vmem:[%s1186_s26 + $0x40] sm:$0xff]  ;;  %v1061_v9 = vld [vmem:[%s1186_s26 + $0x48] sm:$0xff]  ;;  %268 = vst.msk [vmem:[#allocation2 + $0x18] sm:$0xff] %vm264_vm1, %v1130_v11  ;;  %v1062_v14 = vld [vmem:[%s1186_s26 + $0x50] sm:$0xff] }
  0x12   : > { %1075 = vmatpush.bf16.msra.mxu2 %v1069_v1  ;;  %1076 = vmatpush.bf16.msra.mxu3 %v1069_v1  ;;  %v1064_v6 = vld [vmem:[%s1186_s26 + $0x60] sm:$0xff]  ;;  %v1065_v10 = vld [vmem:[%s1186_s26 + $0x68] sm:$0xff]  ;;  %269 = vst.msk [vmem:[#allocation2 + $0x20] sm:$0xff] %vm264_vm1, %v1130_v11  ;;  %v1066_v15 = vld [vmem:[%s1186_s26 + $0x70] sm:$0xff] }
  0x13   : > { %270 = vst.msk [vmem:[#allocation2 + $0x28] sm:$0xff] %vm264_vm1, %v1130_v11  ;;  %v1055_v16 = vld [vmem:[%s1186_s26 + $0x18] sm:$0xff] }
  0x14   : > { %271 = vst.msk [vmem:[#allocation2 + $0x30] sm:$0xff] %vm264_vm1, %v1130_v11  ;;  %v1059_v17 = vld [vmem:[%s1186_s26 + $0x38] sm:$0xff] }
  0x15   : > { %521 = vmatpush.bf16.msra.mxu0 %v1068_v2  ;;  %1077 = vmatpush.bf16.msra.mxu1 %v1068_v2  ;;  %272 = vst.msk [vmem:[#allocation2 + $0x38] sm:$0xff] %vm264_vm1, %v1130_v11  ;;  %v1063_v18 = vld [vmem:[%s1186_s26 + $0x58] sm:$0xff]  ;;  %v297_v20 = vld [vmem:[#allocation2] sm:$0xff] }
  0x16   : > { %1078 = vmatpush.bf16.msra.mxu2 %v1068_v2  ;;  %1079 = vmatpush.bf16.msra.mxu3 %v1068_v2  ;;  %273 = vst.msk [vmem:[#allocation2 + $0x40] sm:$0xff] %vm264_vm1, %v1130_v11  ;;  %v1067_v19 = vld [vmem:[%s1186_s26 + $0x78] sm:$0xff]  ;;  %v298_v28 = vld [vmem:[#allocation2 + $0x8] sm:$0xff] }
  0x17   : > { %274 = vst.msk [vmem:[#allocation2 + $0x48] sm:$0xff] %vm264_vm1, %v1130_v11  ;;  %v299_v47 = vld [vmem:[#allocation2 + $0x10] sm:$0xff] }
  0x18   : > { %1034 = vmatmul.msk.bf16.vlgmr.msra.gmra.mxu0 %vm465_vm0, %v1052_v3  ;;  %1038 = vmatmul.msk.bf16.vlgmr.msra.gmra.mxu1 %vm465_vm0, %v1056_v4  ;;  %275 = vst.msk [vmem:[#allocation2 + $0x50] sm:$0xff] %vm264_vm1, %v1130_v11 }
  0x19   : > { %1042 = vmatmul.msk.bf16.vlgmr.msra.gmra.mxu2 %vm465_vm0, %v1060_v5  ;;  %1046 = vmatmul.msk.bf16.vlgmr.msra.gmra.mxu3 %vm465_vm0, %v1064_v6  ;;  %276 = vst.msk [vmem:[#allocation2 + $0x58] sm:$0xff] %vm264_vm1, %v1130_v11 }
  0x1a   : > { %277 = vst.msk [vmem:[#allocation2 + $0x60] sm:$0xff] %vm264_vm1, %v1130_v11 }
  0x1b   : > { %278 = vst.msk [vmem:[#allocation2 + $0x68] sm:$0xff] %vm264_vm1, %v1130_v11 }
  0x1c   : > { %279 = vst.msk [vmem:[#allocation2 + $0x70] sm:$0xff] %vm264_vm1, %v1130_v11 }
  0x1d   : > { %280 = vst.msk [vmem:[#allocation2 + $0x78] sm:$0xff] %vm264_vm1, %v1130_v11  ;;  %v305_v21 = vld [vmem:[#allocation2 + $0x40] sm:$0xff] }
  0x1e   : > { %281 = vst.msk [vmem:[#allocation2 + $0x80] sm:$0xff] %vm264_vm1, %v1130_v11  ;;  %v306_v29 = vld [vmem:[#allocation2 + $0x48] sm:$0xff] }
  0x1f   : > { %282 = vst.msk [vmem:[#allocation2 + $0x88] sm:$0xff] %vm264_vm1, %v1130_v11  ;;  %v307_v51 = vld [vmem:[#allocation2 + $0x50] sm:$0xff] }
  0x20   : > { %283 = vst.msk [vmem:[#allocation2 + $0x90] sm:$0xff] %vm264_vm1, %v1130_v11 }
  0x21   : > { %284 = vst.msk [vmem:[#allocation2 + $0x98] sm:$0xff] %vm264_vm1, %v1130_v11 }
  0x22   : > { %285 = vst.msk [vmem:[#allocation2 + $0xa0] sm:$0xff] %vm264_vm1, %v1130_v11 }
  0x23   : > { %286 = vst.msk [vmem:[#allocation2 + $0xa8] sm:$0xff] %vm264_vm1, %v1130_v11 }
  0x24   : > { %287 = vst.msk [vmem:[#allocation2 + $0xb0] sm:$0xff] %vm264_vm1, %v1130_v11 }
  0x25   : > { %288 = vst.msk [vmem:[#allocation2 + $0xb8] sm:$0xff] %vm264_vm1, %v1130_v11  ;;  %v313_v26 = vld [vmem:[#allocation2 + $0x80] sm:$0xff] }
  0x26   : > { %289 = vst.msk [vmem:[#allocation2 + $0xc0] sm:$0xff] %vm264_vm1, %v1130_v11  ;;  %v314_v44 = vld [vmem:[#allocation2 + $0x88] sm:$0xff] }
  0x27   : > { %290 = vst.msk [vmem:[#allocation2 + $0xc8] sm:$0xff] %vm264_vm1, %v1130_v11  ;;  %v315_v5 = vld [vmem:[#allocation2 + $0x90] sm:$0xff] }
  0x28   : > { %1035 = vmatmul.msk.bf16.gmra.mxu0 %vm465_vm0, %v1053_v7  ;;  %1039 = vmatmul.msk.bf16.gmra.mxu1 %vm465_vm0, %v1057_v8  ;;  %291 = vst.msk [vmem:[#allocation2 + $0xd0] sm:$0xff] %vm264_vm1, %v1130_v11 }
  0x29   : > { %1043 = vmatmul.msk.bf16.gmra.mxu2 %vm465_vm0, %v1061_v9  ;;  %1047 = vmatmul.msk.bf16.gmra.mxu3 %vm465_vm0, %v1065_v10  ;;  %292 = vst.msk [vmem:[#allocation2 + $0xd8] sm:$0xff] %vm264_vm1, %v1130_v11 }
  0x2a   : > { %293 = vst.msk [vmem:[#allocation2 + $0xe0] sm:$0xff] %vm264_vm1, %v1130_v11 }
  0x2b   : > { %294 = vst.msk [vmem:[#allocation2 + $0xe8] sm:$0xff] %vm264_vm1, %v1130_v11 }
  0x2c   : > { %295 = vst.msk [vmem:[#allocation2 + $0xf0] sm:$0xff] %vm264_vm1, %v1130_v11 }
  0x2d   : > { %296 = vst.msk [vmem:[#allocation2 + $0xf8] sm:$0xff] %vm264_vm1, %v1130_v11  ;;  %v321_v27 = vld [vmem:[#allocation2 + $0xc0] sm:$0xff] }
  0x2e   : > { %v322_v45 = vld [vmem:[#allocation2 + $0xc8] sm:$0xff] }
  0x2f   : > { %v323_v8 = vld [vmem:[#allocation2 + $0xd0] sm:$0xff] }
  0x38   : > { %1036 = vmatmul.msk.bf16.gmra.mxu0 %vm465_vm0, %v1054_v12  ;;  %1040 = vmatmul.msk.bf16.gmra.mxu1 %vm465_vm0, %v1058_v13  ;;  %v300_v13 = vld [vmem:[#allocation2 + $0x18] sm:$0xff] }
  0x39   : > { %1044 = vmatmul.msk.bf16.gmra.mxu2 %vm465_vm0, %v1062_v14  ;;  %1048 = vmatmul.msk.bf16.gmra.mxu3 %vm465_vm0, %v1066_v15 }
  0x48   : > { %1037 = vmatmul.msk.bf16.gmra.mxu0 %vm465_vm0, %v1055_v16  ;;  %1041 = vmatmul.msk.bf16.gmra.mxu1 %vm465_vm0, %v1059_v17  ;;  %v308_v17 = vld [vmem:[#allocation2 + $0x58] sm:$0xff] }
  0x49   : > { %1045 = vmatmul.msk.bf16.gmra.mxu2 %vm465_vm0, %v1063_v18  ;;  %1049 = vmatmul.msk.bf16.gmra.mxu3 %vm465_vm0, %v1067_v19 }
  0x95   : > { %v523_v22 = vpop.f32.mrf.mxu0  ;;  %v543_v23 = vpop.f32.mrf.mxu1 }
  0x96   : > { %v603_v24 = vadd.f32 %v523_v22, %v297_v20  ;;  %v611_v25 = vadd.f32 %v543_v23, %v305_v21 }
  0x98   : > { %636 = vst.msk [vmem:[#allocation2] sm:$0xff] %vm264_vm1, %v603_v24 }
  0x99   : > { %644 = vst.msk [vmem:[#allocation2 + $0x40] sm:$0xff] %vm264_vm1, %v611_v25 }
  0x9c   : > { %v563_v31 = vpop.f32.mrf.mxu2  ;;  %v583_v32 = vpop.f32.mrf.mxu3 }
  0x9d   : > { %v619_v33 = vadd.f32 %v563_v31, %v313_v26  ;;  %v627_v34 = vadd.f32 %v583_v32, %v321_v27  ;;  %v525_v35 = vpop.f32.mrf.mxu0  ;;  %v545_v36 = vpop.f32.mrf.mxu1 }
  0x9e   : > { %v604_v37 = vadd.f32 %v525_v35, %v298_v28  ;;  %v612_v38 = vadd.f32 %v545_v36, %v306_v29 }
  0x9f   : > { %v671_v39 = vld [vmem:[#allocation2] sm:$0xff]  ;;  %652 = vst.msk [vmem:[#allocation2 + $0x80] sm:$0xff] %vm264_vm1, %v619_v33 }
  0xa0   : > { %v707_v40 = vadd.f32 %v1257_v30, %v671_v39  ;;  %v679_v41 = vld [vmem:[#allocation2 + $0x40] sm:$0xff]  ;;  %660 = vst.msk [vmem:[#allocation2 + $0xc0] sm:$0xff] %vm264_vm1, %v627_v34  ;;  %v316_v34 = vld [vmem:[#allocation2 + $0x98] sm:$0xff] }
  0xa1   : > { %v715_v42 = vadd.f32 %v1257_v30, %v679_v41  ;;  %637 = vst.msk [vmem:[#allocation2 + $0x8] sm:$0xff] %vm264_vm1, %v604_v37 }
  0xa2   : > { %v739_v43 = vmax.f32 %v707_v40, 0.0  ;;  %645 = vst.msk [vmem:[#allocation2 + $0x48] sm:$0xff] %vm264_vm1, %v612_v38  ;;  %v324_v38 = vld [vmem:[#allocation2 + $0xd8] sm:$0xff] }
  0xa3   : > { %v747_v46 = vmax.f32 %v715_v42, 0.0  ;;  %v301_v42 = vld [vmem:[#allocation2 + $0x20] sm:$0xff] }
  0xa4   : > { %v771_v48 = vpack.c.bf16 %v739_v43, %v739_v43  ;;  %v565_v49 = vpop.f32.mrf.mxu2  ;;  %v585_v50 = vpop.f32.mrf.mxu3 }
  0xa5   : > { %v779_v52 = vpack.c.bf16 %v747_v46, %v747_v46  ;;  %v620_v53 = vadd.f32 %v565_v49, %v314_v44  ;;  %v628_v54 = vadd.f32 %v585_v50, %v322_v45  ;;  %v528_v55 = vpop.f32.mrf.mxu0  ;;  %v548_v56 = vpop.f32.mrf.mxu1 }
  0xa6   : > { %804 = vst.msk [vmem:[%s1270_s4] sm:$0xf] %vm803_vm2, %v771_v48  ;;  %v687_v57 = vld [vmem:[#allocation2 + $0x80] sm:$0xff]  ;;  %v605_v58 = vadd.f32 %v528_v55, %v299_v47  ;;  %v613_v61 = vadd.f32 %v548_v56, %v307_v51 }
  0xa7   : > { %812 = vst.msk [vmem:[%s1270_s4 + $0x20] sm:$0xf] %vm803_vm2, %v779_v52  ;;  %v723_v59 = vadd.f32 %v1257_v30, %v687_v57  ;;  %v695_v60 = vld [vmem:[#allocation2 + $0xc0] sm:$0xff] }
  0xa8   : > { %v731_v62 = vadd.f32 %v1257_v30, %v695_v60  ;;  %v672_v63 = vld [vmem:[#allocation2 + $0x8] sm:$0xff]  ;;  %653 = vst.msk [vmem:[#allocation2 + $0x88] sm:$0xff] %vm264_vm1, %v620_v53  ;;  %v309_v47 = vld [vmem:[#allocation2 + $0x60] sm:$0xff] }
  0xa9   : > { %v755_v0 = vmax.f32 %v723_v59, 0.0  ;;  %v708_v1 = vadd.f32 %v1257_v30, %v672_v63  ;;  %v680_v2 = vld [vmem:[#allocation2 + $0x48] sm:$0xff]  ;;  %661 = vst.msk [vmem:[#allocation2 + $0xc8] sm:$0xff] %vm264_vm1, %v628_v54 }
  0xaa   : > { %v763_v3 = vmax.f32 %v731_v62, 0.0  ;;  %v716_v4 = vadd.f32 %v1257_v30, %v680_v2  ;;  %638 = vst.msk [vmem:[#allocation2 + $0x10] sm:$0xff] %vm264_vm1, %v605_v58  ;;  %v317_v62 = vld [vmem:[#allocation2 + $0xa0] sm:$0xff] }
  0xab   : > { %v787_v6 = vpack.c.bf16 %v755_v0, %v755_v0  ;;  %v740_v7 = vmax.f32 %v708_v1, 0.0  ;;  %646 = vst.msk [vmem:[#allocation2 + $0x50] sm:$0xff] %vm264_vm1, %v613_v61 }
  0xac   : > { %v795_v9 = vpack.c.bf16 %v763_v3, %v763_v3  ;;  %v748_v10 = vmax.f32 %v716_v4, 0.0  ;;  %v568_v11 = vpop.f32.mrf.mxu2  ;;  %v588_v12 = vpop.f32.mrf.mxu3  ;;  %v325_v3 = vld [vmem:[#allocation2 + $0xe0] sm:$0xff] }
  0xad   : > { %820 = vst.msk [vmem:[%s1270_s4 + $0x40] sm:$0xf] %vm803_vm2, %v787_v6  ;;  %v772_v14 = vpack.c.bf16 %v740_v7, %v740_v7  ;;  %v621_v15 = vadd.f32 %v568_v11, %v315_v5  ;;  %v530_v16 = vpop.f32.mrf.mxu0  ;;  %v550_v18 = vpop.f32.mrf.mxu1  ;;  %v629_v20 = vadd.f32 %v588_v12, %v323_v8  ;;  %v302_v8 = vld [vmem:[#allocation2 + $0x28] sm:$0xff] }
  0xae   : > { %828 = vst.msk [vmem:[%s1270_s4 + $0x60] sm:$0xf] %vm803_vm2, %v795_v9  ;;  %v780_v19 = vpack.c.bf16 %v748_v10, %v748_v10  ;;  %v606_v22 = vadd.f32 %v530_v16, %v300_v13  ;;  %v614_v25 = vadd.f32 %v550_v18, %v308_v17  ;;  %v310_v11 = vld [vmem:[#allocation2 + $0x68] sm:$0xff] }
  0xaf   : > { %805 = vst.msk [vmem:[%s1270_s4 + $0x4] sm:$0xf] %vm803_vm2, %v772_v14  ;;  %v688_v21 = vld [vmem:[#allocation2 + $0x88] sm:$0xff] }
  0xb0   : > { %813 = vst.msk [vmem:[%s1270_s4 + $0x24] sm:$0xf] %vm803_vm2, %v780_v19  ;;  %v724_v23 = vadd.f32 %v1257_v30, %v688_v21  ;;  %v696_v24 = vld [vmem:[#allocation2 + $0xc8] sm:$0xff] }
  0xb1   : > { %v732_v26 = vadd.f32 %v1257_v30, %v696_v24  ;;  %v673_v27 = vld [vmem:[#allocation2 + $0x10] sm:$0xff]  ;;  %654 = vst.msk [vmem:[#allocation2 + $0x90] sm:$0xff] %vm264_vm1, %v621_v15  ;;  %v318_v19 = vld [vmem:[#allocation2 + $0xa8] sm:$0xff] }
  0xb2   : > { %v756_v28 = vmax.f32 %v724_v23, 0.0  ;;  %v709_v29 = vadd.f32 %v1257_v30, %v673_v27  ;;  %v681_v31 = vld [vmem:[#allocation2 + $0x50] sm:$0xff]  ;;  %662 = vst.msk [vmem:[#allocation2 + $0xd0] sm:$0xff] %vm264_vm1, %v629_v20 }
  0xb3   : > { %v764_v32 = vmax.f32 %v732_v26, 0.0  ;;  %v717_v33 = vadd.f32 %v1257_v30, %v681_v31  ;;  %639 = vst.msk [vmem:[#allocation2 + $0x18] sm:$0xff] %vm264_vm1, %v606_v22  ;;  %v326_v31 = vld [vmem:[#allocation2 + $0xe8] sm:$0xff] }
  0xb4   : > { %v788_v35 = vpack.c.bf16 %v756_v28, %v756_v28  ;;  %v741_v36 = vmax.f32 %v709_v29, 0.0  ;;  %647 = vst.msk [vmem:[#allocation2 + $0x58] sm:$0xff] %vm264_vm1, %v614_v25  ;;  %v570_v37 = vpop.f32.mrf.mxu2  ;;  %v590_v39 = vpop.f32.mrf.mxu3 }
  0xb5   : > { %v796_v40 = vpack.c.bf16 %v764_v32, %v764_v32  ;;  %v749_v41 = vmax.f32 %v717_v33, 0.0  ;;  %v533_v43 = vpop.f32.mrf.mxu0  ;;  %v553_v44 = vpop.f32.mrf.mxu1  ;;  %v622_v46 = vadd.f32 %v570_v37, %v316_v34  ;;  %v630_v49 = vadd.f32 %v590_v39, %v324_v38  ;;  %v311_v39 = vld [vmem:[#allocation2 + $0x70] sm:$0xff] }
  0xb6   : > { %821 = vst.msk [vmem:[%s1270_s4 + $0x44] sm:$0xf] %vm803_vm2, %v788_v35  ;;  %v773_v45 = vpack.c.bf16 %v741_v36, %v741_v36  ;;  %v607_v51 = vadd.f32 %v533_v43, %v301_v42  ;;  %v615_v54 = vadd.f32 %v553_v44, %v309_v47  ;;  %v303_v35 = vld [vmem:[#allocation2 + $0x30] sm:$0xff] }
  0xb7   : > { %829 = vst.msk [vmem:[%s1270_s4 + $0x64] sm:$0xf] %vm803_vm2, %v796_v40  ;;  %v781_v48 = vpack.c.bf16 %v749_v41, %v749_v41  ;;  %v327_v47 = vld [vmem:[#allocation2 + $0xf0] sm:$0xff] }
  0xb8   : > { %806 = vst.msk [vmem:[%s1270_s4 + $0x8] sm:$0xf] %vm803_vm2, %v773_v45  ;;  %v689_v50 = vld [vmem:[#allocation2 + $0x90] sm:$0xff] }
  0xb9   : > { %814 = vst.msk [vmem:[%s1270_s4 + $0x28] sm:$0xf] %vm803_vm2, %v781_v48  ;;  %v725_v52 = vadd.f32 %v1257_v30, %v689_v50  ;;  %v697_v53 = vld [vmem:[#allocation2 + $0xd0] sm:$0xff] }
  0xba   : > { %v733_v55 = vadd.f32 %v1257_v30, %v697_v53  ;;  %v674_v56 = vld [vmem:[#allocation2 + $0x18] sm:$0xff]  ;;  %655 = vst.msk [vmem:[#allocation2 + $0x98] sm:$0xff] %vm264_vm1, %v622_v46  ;;  %v319_v46 = vld [vmem:[#allocation2 + $0xb0] sm:$0xff] }
  0xbb   : > { %v757_v57 = vmax.f32 %v725_v52, 0.0  ;;  %v710_v58 = vadd.f32 %v1257_v30, %v674_v56  ;;  %v682_v59 = vld [vmem:[#allocation2 + $0x58] sm:$0xff]  ;;  %663 = vst.msk [vmem:[#allocation2 + $0xd8] sm:$0xff] %vm264_vm1, %v630_v49 }
  0xbc   : > { %v765_v60 = vmax.f32 %v733_v55, 0.0  ;;  %v718_v61 = vadd.f32 %v1257_v30, %v682_v59  ;;  %640 = vst.msk [vmem:[#allocation2 + $0x20] sm:$0xff] %vm264_vm1, %v607_v51  ;;  %v573_v63 = vpop.f32.mrf.mxu2  ;;  %v593_v0 = vpop.f32.mrf.mxu3 }
  0xbd   : > { %v789_v1 = vpack.c.bf16 %v757_v57, %v757_v57  ;;  %v742_v2 = vmax.f32 %v710_v58, 0.0  ;;  %648 = vst.msk [vmem:[#allocation2 + $0x60] sm:$0xff] %vm264_vm1, %v615_v54  ;;  %v535_v4 = vpop.f32.mrf.mxu0  ;;  %v555_v5 = vpop.f32.mrf.mxu1  ;;  %v623_v10 = vadd.f32 %v573_v63, %v317_v62  ;;  %v631_v13 = vadd.f32 %v593_v0, %v325_v3 }
  0xbe   : > { %v797_v6 = vpack.c.bf16 %v765_v60, %v765_v60  ;;  %v750_v7 = vmax.f32 %v718_v61, 0.0  ;;  %v608_v15 = vadd.f32 %v535_v4, %v302_v8  ;;  %v616_v18 = vadd.f32 %v555_v5, %v310_v11  ;;  %v312_v5 = vld [vmem:[#allocation2 + $0x78] sm:$0xff] }
  0xbf   : > { %822 = vst.msk [vmem:[%s1270_s4 + $0x48] sm:$0xf] %vm803_vm2, %v789_v1  ;;  %v774_v9 = vpack.c.bf16 %v742_v2, %v742_v2  ;;  %v304_v1 = vld [vmem:[#allocation2 + $0x38] sm:$0xff] }
  0xc0   : > { %830 = vst.msk [vmem:[%s1270_s4 + $0x68] sm:$0xf] %vm803_vm2, %v797_v6  ;;  %v782_v12 = vpack.c.bf16 %v750_v7, %v750_v7  ;;  %v320_v11 = vld [vmem:[#allocation2 + $0xb8] sm:$0xff] }
  0xc1   : > { %807 = vst.msk [vmem:[%s1270_s4 + $0xc] sm:$0xf] %vm803_vm2, %v774_v9  ;;  %v690_v14 = vld [vmem:[#allocation2 + $0x98] sm:$0xff] }
  0xc2   : > { %815 = vst.msk [vmem:[%s1270_s4 + $0x2c] sm:$0xf] %vm803_vm2, %v782_v12  ;;  %v726_v16 = vadd.f32 %v1257_v30, %v690_v14  ;;  %v698_v17 = vld [vmem:[#allocation2 + $0xd8] sm:$0xff] }
  0xc3   : > { %v734_v20 = vadd.f32 %v1257_v30, %v698_v17  ;;  %v675_v21 = vld [vmem:[#allocation2 + $0x20] sm:$0xff]  ;;  %656 = vst.msk [vmem:[#allocation2 + $0xa0] sm:$0xff] %vm264_vm1, %v623_v10  ;;  %v328_v12 = vld [vmem:[#allocation2 + $0xf8] sm:$0xff] }
  0xc4   : > { %v758_v22 = vmax.f32 %v726_v16, 0.0  ;;  %v711_v23 = vadd.f32 %v1257_v30, %v675_v21  ;;  %v683_v24 = vld [vmem:[#allocation2 + $0x60] sm:$0xff]  ;;  %664 = vst.msk [vmem:[#allocation2 + $0xe0] sm:$0xff] %vm264_vm1, %v631_v13  ;;  %v575_v25 = vpop.f32.mrf.mxu2  ;;  %v595_v26 = vpop.f32.mrf.mxu3 }
  0xc5   : > { %v766_v27 = vmax.f32 %v734_v20, 0.0  ;;  %v719_v28 = vadd.f32 %v1257_v30, %v683_v24  ;;  %641 = vst.msk [vmem:[#allocation2 + $0x28] sm:$0xff] %vm264_vm1, %v608_v15  ;;  %v624_v29 = vadd.f32 %v575_v25, %v318_v19  ;;  %v538_v32 = vpop.f32.mrf.mxu0  ;;  %v558_v36 = vpop.f32.mrf.mxu1  ;;  %v632_v41 = vadd.f32 %v595_v26, %v326_v31 }
  0xc6   : > { %v790_v33 = vpack.c.bf16 %v758_v22, %v758_v22  ;;  %v743_v34 = vmax.f32 %v711_v23, 0.0  ;;  %649 = vst.msk [vmem:[#allocation2 + $0x68] sm:$0xff] %vm264_vm1, %v616_v18  ;;  %v609_v43 = vadd.f32 %v538_v32, %v303_v35  ;;  %v617_v45 = vadd.f32 %v558_v36, %v311_v39 }
  0xc7   : > { %v798_v37 = vpack.c.bf16 %v766_v27, %v766_v27  ;;  %v751_v38 = vmax.f32 %v719_v28, 0.0  ;;  %657 = vst.msk [vmem:[#allocation2 + $0xa8] sm:$0xff] %vm264_vm1, %v624_v29 }
  0xc8   : > { %823 = vst.msk [vmem:[%s1270_s4 + $0x4c] sm:$0xf] %vm803_vm2, %v790_v33  ;;  %v775_v40 = vpack.c.bf16 %v743_v34, %v743_v34 }
  0xc9   : > { %831 = vst.msk [vmem:[%s1270_s4 + $0x6c] sm:$0xf] %vm803_vm2, %v798_v37  ;;  %v783_v42 = vpack.c.bf16 %v751_v38, %v751_v38 }
  0xca   : > { %808 = vst.msk [vmem:[%s1270_s4 + $0x10] sm:$0xf] %vm803_vm2, %v775_v40  ;;  %v691_v44 = vld [vmem:[#allocation2 + $0xa0] sm:$0xff] }
  0xcb   : > { %816 = vst.msk [vmem:[%s1270_s4 + $0x30] sm:$0xf] %vm803_vm2, %v783_v42  ;;  %v727_v48 = vadd.f32 %v1257_v30, %v691_v44  ;;  %v699_v49 = vld [vmem:[#allocation2 + $0xe0] sm:$0xff] }
  0xcc   : > { %v735_v50 = vadd.f32 %v1257_v30, %v699_v49  ;;  %v676_v51 = vld [vmem:[#allocation2 + $0x28] sm:$0xff]  ;;  %665 = vst.msk [vmem:[#allocation2 + $0xe8] sm:$0xff] %vm264_vm1, %v632_v41  ;;  %v578_v52 = vpop.f32.mrf.mxu2  ;;  %v598_v53 = vpop.f32.mrf.mxu3 }
  0xcd   : > { %v759_v54 = vmax.f32 %v727_v48, 0.0  ;;  %v712_v55 = vadd.f32 %v1257_v30, %v676_v51  ;;  %v684_v56 = vld [vmem:[#allocation2 + $0x68] sm:$0xff]  ;;  %642 = vst.msk [vmem:[#allocation2 + $0x30] sm:$0xff] %vm264_vm1, %v609_v43  ;;  %v625_v57 = vadd.f32 %v578_v52, %v319_v46  ;;  %v633_v58 = vadd.f32 %v598_v53, %v327_v47  ;;  %v540_v2 = vpop.f32.mrf.mxu0  ;;  %v560_v6 = vpop.f32.mrf.mxu1 }
  0xce   : > { %v767_v59 = vmax.f32 %v735_v50, 0.0  ;;  %v720_v60 = vadd.f32 %v1257_v30, %v684_v56  ;;  %v692_v61 = vld [vmem:[#allocation2 + $0xa8] sm:$0xff]  ;;  %650 = vst.msk [vmem:[#allocation2 + $0x70] sm:$0xff] %vm264_vm1, %v617_v45  ;;  %v610_v10 = vadd.f32 %v540_v2, %v304_v1  ;;  %v618_v15 = vadd.f32 %v560_v6, %v312_v5 }
  0xcf   : > { %v791_v62 = vpack.c.bf16 %v759_v54, %v759_v54  ;;  %v744_v63 = vmax.f32 %v712_v55, 0.0  ;;  %v728_v0 = vadd.f32 %v1257_v30, %v692_v61  ;;  %658 = vst.msk [vmem:[#allocation2 + $0xb0] sm:$0xff] %vm264_vm1, %v625_v57 }
  0xd0   : > { %v799_v3 = vpack.c.bf16 %v767_v59, %v767_v59  ;;  %v752_v4 = vmax.f32 %v720_v60, 0.0  ;;  %666 = vst.msk [vmem:[#allocation2 + $0xf0] sm:$0xff] %vm264_vm1, %v633_v58 }
  0xd1   : > { %824 = vst.msk [vmem:[%s1270_s4 + $0x50] sm:$0xf] %vm803_vm2, %v791_v62  ;;  %v776_v7 = vpack.c.bf16 %v744_v63, %v744_v63  ;;  %v760_v8 = vmax.f32 %v728_v0, 0.0 }
  0xd2   : > { %832 = vst.msk [vmem:[%s1270_s4 + $0x70] sm:$0xf] %vm803_vm2, %v799_v3  ;;  %v784_v9 = vpack.c.bf16 %v752_v4, %v752_v4 }
  0xd3   : > { %809 = vst.msk [vmem:[%s1270_s4 + $0x14] sm:$0xf] %vm803_vm2, %v776_v7  ;;  %v792_v13 = vpack.c.bf16 %v760_v8, %v760_v8  ;;  %v700_v14 = vld [vmem:[#allocation2 + $0xe8] sm:$0xff] }
  0xd4   : > { %817 = vst.msk [vmem:[%s1270_s4 + $0x34] sm:$0xf] %vm803_vm2, %v784_v9  ;;  %v736_v16 = vadd.f32 %v1257_v30, %v700_v14  ;;  %v677_v17 = vld [vmem:[#allocation2 + $0x30] sm:$0xff]  ;;  %v580_v18 = vpop.f32.mrf.mxu2  ;;  %v600_v19 = vpop.f32.mrf.mxu3 }
  0xd5   : > { %825 = vst.msk [vmem:[%s1270_s4 + $0x54] sm:$0xf] %vm803_vm2, %v792_v13  ;;  %v713_v20 = vadd.f32 %v1257_v30, %v677_v17  ;;  %v685_v21 = vld [vmem:[#allocation2 + $0x70] sm:$0xff]  ;;  %v626_v22 = vadd.f32 %v580_v18, %v320_v11  ;;  %v634_v23 = vadd.f32 %v600_v19, %v328_v12 }
  0xd6   : > { %v768_v24 = vmax.f32 %v736_v16, 0.0  ;;  %v721_v25 = vadd.f32 %v1257_v30, %v685_v21  ;;  %v693_v26 = vld [vmem:[#allocation2 + $0xb0] sm:$0xff]  ;;  %643 = vst.msk [vmem:[#allocation2 + $0x38] sm:$0xff] %vm264_vm1, %v610_v10 }
  0xd7   : > { %v745_v27 = vmax.f32 %v713_v20, 0.0  ;;  %v729_v28 = vadd.f32 %v1257_v30, %v693_v26  ;;  %v701_v29 = vld [vmem:[#allocation2 + $0xf0] sm:$0xff]  ;;  %651 = vst.msk [vmem:[#allocation2 + $0x78] sm:$0xff] %vm264_vm1, %v618_v15 }
  0xd8   : > { %v800_v31 = vpack.c.bf16 %v768_v24, %v768_v24  ;;  %v753_v32 = vmax.f32 %v721_v25, 0.0  ;;  %v737_v33 = vadd.f32 %v1257_v30, %v701_v29  ;;  %659 = vst.msk [vmem:[#allocation2 + $0xb8] sm:$0xff] %vm264_vm1, %v626_v22 }
  0xd9   : > { %v777_v34 = vpack.c.bf16 %v745_v27, %v745_v27  ;;  %v761_v35 = vmax.f32 %v729_v28, 0.0  ;;  %667 = vst.msk [vmem:[#allocation2 + $0xf8] sm:$0xff] %vm264_vm1, %v634_v23 }
  0xda   : > { %833 = vst.msk [vmem:[%s1270_s4 + $0x74] sm:$0xf] %vm803_vm2, %v800_v31  ;;  %v785_v36 = vpack.c.bf16 %v753_v32, %v753_v32  ;;  %v769_v37 = vmax.f32 %v737_v33, 0.0 }
  0xdb   : > { %810 = vst.msk [vmem:[%s1270_s4 + $0x18] sm:$0xf] %vm803_vm2, %v777_v34  ;;  %v793_v38 = vpack.c.bf16 %v761_v35, %v761_v35 }
  0xdc   : > { %818 = vst.msk [vmem:[%s1270_s4 + $0x38] sm:$0xf] %vm803_vm2, %v785_v36  ;;  %v801_v39 = vpack.c.bf16 %v769_v37, %v769_v37 }
  0xdd   : > { %826 = vst.msk [vmem:[%s1270_s4 + $0x58] sm:$0xf] %vm803_vm2, %v793_v38  ;;  %v678_v40 = vld [vmem:[#allocation2 + $0x38] sm:$0xff] }
  0xde   : > { %834 = vst.msk [vmem:[%s1270_s4 + $0x78] sm:$0xf] %vm803_vm2, %v801_v39  ;;  %v714_v41 = vadd.f32 %v1257_v30, %v678_v40  ;;  %v686_v42 = vld [vmem:[#allocation2 + $0x78] sm:$0xff] }
  0xdf   : > { %v722_v43 = vadd.f32 %v1257_v30, %v686_v42  ;;  %v694_v44 = vld [vmem:[#allocation2 + $0xb8] sm:$0xff] }
  0xe0   : > { %v746_v45 = vmax.f32 %v714_v41, 0.0  ;;  %v730_v46 = vadd.f32 %v1257_v30, %v694_v44  ;;  %v702_v47 = vld [vmem:[#allocation2 + $0xf8] sm:$0xff] }
  0xe1   : > { %v754_v48 = vmax.f32 %v722_v43, 0.0  ;;  %v738_v49 = vadd.f32 %v1257_v30, %v702_v47 }
  0xe2   : > { %v778_v50 = vpack.c.bf16 %v746_v45, %v746_v45  ;;  %v762_v51 = vmax.f32 %v730_v46, 0.0 }
  0xe3   : > { %v786_v52 = vpack.c.bf16 %v754_v48, %v754_v48  ;;  %v770_v53 = vmax.f32 %v738_v49, 0.0 }
  0xe4   : > { %811 = vst.msk [vmem:[%s1270_s4 + $0x1c] sm:$0xf] %vm803_vm2, %v778_v50  ;;  %v794_v54 = vpack.c.bf16 %v762_v51, %v762_v51 }
  0xe5   : > { %819 = vst.msk [vmem:[%s1270_s4 + $0x3c] sm:$0xf] %vm803_vm2, %v786_v52  ;;  %v802_v55 = vpack.c.bf16 %v770_v53, %v770_v53 }
  0xe6   : > { %827 = vst.msk [vmem:[%s1270_s4 + $0x5c] sm:$0xf] %vm803_vm2, %v794_v54 }
  0xe7   : > { %835 = vst.msk [vmem:[%s1270_s4 + $0x7c] sm:$0xf] %vm803_vm2, %v802_v55 }
  0xe8 PF: > { %s13_s14 = sadd.s32 1, %s1128_s14   ;;  %s1405_s12 = smov %s1124_s13 }
  0xe9   : > { %p10_p5 = scmp.ge.s32.totalorder %s13_s14, 5   ;;  %s1406_s13 = smov %s1408_s15 }
  0xeb   :  { %12 = sbr.rel (!%p10_p5) target bundleno = 2 (0x2), region = 76 }

// kernel: alexnet_forward.10
= control target key start
LH: loop header
LB: loop body
LE: loop exit
PB: predicated region body
PF: predicated region fallthrough
CT: control target
= control target key end

     0   :  { %s846_s15 = smov 0   ;;  %s1009_s0 = inlined_call_operand.vmem [shape: bf16[2,9,9,64], index: 0, kind: input, shape index: {}]   ;;  %s1010_s1 = inlined_call_operand.vmem [shape: bf16[2,9,8,64], index: 1, kind: input, shape index: {}]   ;;  %s1011_s2 = inlined_call_operand.vmem [shape: bf16[2,8,9,64], index: 2, kind: input, shape index: {}]   ;;  %s1012_s3 = inlined_call_operand.vmem [shape: bf16[2,8,8,64], index: 3, kind: input, shape index: {}]   ;;  %s1013_s4 = inlined_call_operand.vmem [shape: bf16[2,8,8,64], index: 4, kind: output, shape index: {}]  }
   0x1 LB: > { %s747_s16 = sadd.s32 4294967295, %s819_s15   ;;  %p751_p0 = scmp.ge.s32.totalorder %s819_s15, 1  ;;  %s819_s15 = sphi %s846_s15, %s14_s15  }
   0x2   : > { %p192_p1 = scmp.lt.s32.totalorder %s819_s15, 3 }
   0x4   : > { %p193_p2 = pnand %p751_p0, %p192_p1 }
   0x5   : > { %p233_p3 = scmp.lt.s32.totalorder (!%p193_p2), %s747_s16, 1 }
   0x6   : > { %196 = sbr.rel (%p193_p2) target bundleno = 70 (0x46), region = 36 }
   0xb   : > { %s1015_s16 = smov (!%p233_p3, %s747_s16), 1  ;;  %vm373_vm0 = vcmask 1046528   ;;  %vm647_vm1 = vcmask 519168  }
   0xc   : > { %s803_s17 = smul.u32 72, %s1015_s16  ;;  %s762_s18 = sshll.u32 %s1015_s16, 6 }
   0xd   : > { %s804_s19 = smul.u32 36, %s1015_s16  ;;  %s862_s22 = scalar_lea.vmem %s1011_s2, %s762_s18 }
   0xe   : > { %s867_s25 = scalar_lea.vmem %s1009_s0, %s803_s17  ;;  %s763_s26 = sshll.u32 %s1015_s16, 5  ;;  %v285_v0 = vld [vmem:[%s862_s22] sm:$0xf]  ;;  %v286_v1 = vld [vmem:[%s862_s22 + $0x4] sm:$0x1] }
   0xf   : > { %s875_s29 = scalar_lea.vmem %s1010_s1, %s804_s19  ;;  %s882_s6 = scalar_lea.vmem %s1012_s3, %s763_s26  ;;  %v258_v2 = vld [vmem:[%s867_s25] sm:$0xf]  ;;  %v259_v3 = vld [vmem:[%s867_s25 + $0x4] sm:$0x1]  ;;  %v260_v4 = vld [vmem:[%s867_s25 + $0x8] sm:$0xf]  ;;  %v430_v5 = vunpack.c.l.bf16 %v285_v0  ;;  %v494_v12 = vunpack.c.l.bf16 %v286_v1 }
  0x10   : > { %v261_v6 = vld [vmem:[%s867_s25 + $0xc] sm:$0x1]  ;;  %v889_v7 = vld [vmem:[%s875_s29] sm:$0xff]   ;;  %v287_v8 = vld [vmem:[%s862_s22 + $0x8] sm:$0xf]  ;;  %v309_v9 = vunpack.c.l.bf16 %v258_v2  ;;  %v892_v10 = vunpack.c.l.bf16 %v260_v4  ;;  %v349_v11 = vunpack.c.l.bf16 %v259_v3  ;;  %s947_s9 = scalar_lea.vmem %s1013_s4, %s763_s26 }
  0x11   : > { %v767_v13 = vunpack.c.l.bf16 %v889_v7  ;;  %v768_v14 = vunpack.c.h.bf16 %v889_v7  ;;  %v782_v15 = vld [vmem:[%s882_s6] sm:$0xff]   ;;  %v350_v16 = vunpack.c.l.bf16 %v261_v6  ;;  %v431_v17 = vunpack.c.l.bf16 %v287_v8  ;;  %v898_v21 = vld [vmem:[%s875_s29 + $0x8] sm:$0xff]   ;;  %v262_v26 = vld [vmem:[%s867_s25 + $0x10] sm:$0xf] }
  0x12   : > { %v783_v18 = vunpack.c.l.bf16 %v782_v15  ;;  %v374_v19 = vrot.slane %v309_v9, 1  ;;  %v375_v20 = vrot.slane %v349_v11, 1  ;;  %v377_v24 = vrot.slane %v892_v10, 1  ;;  %v263_v27 = vld [vmem:[%s867_s25 + $0x14] sm:$0x1]  ;;  %v913_v40 = vld [vmem:[%s882_s6 + $0x8] sm:$0xff]  }
  0x13   : > { %v325_v22 = vmax.f32 %v309_v9, %v767_v13  ;;  %v326_v23 = vmax.f32 %v892_v10, %v768_v14  ;;  %v378_v25 = vrot.slane %v350_v16, 1  ;;  %v784_v28 = vunpack.c.h.bf16 %v782_v15  ;;  %v288_v32 = vld [vmem:[%s862_s22 + $0xc] sm:$0x1]  ;;  %v289_v33 = vld [vmem:[%s862_s22 + $0x10] sm:$0xf] }
  0x14   : > { %v376_v29 = vsel %vm373_vm0, %v374_v19, %v375_v20  ;;  %v518_v30 = vrot.slane %v430_v5, 1  ;;  %v519_v31 = vrot.slane %v494_v12, 1  ;;  %v521_v36 = vrot.slane %v431_v17, 1  ;;  %v264_v46 = vld [vmem:[%s867_s25 + $0x18] sm:$0xf]  ;;  %v924_v3 = vld [vmem:[%s875_s29 + $0x10] sm:$0xff]  }
  0x15   : > { %v379_v34 = vsel %vm373_vm0, %v377_v24, %v378_v25  ;;  %v406_v35 = vmax.f32 %v325_v22, %v376_v29  ;;  %v771_v37 = vunpack.c.l.bf16 %v898_v21  ;;  %v311_v41 = vunpack.c.l.bf16 %v262_v26  ;;  %v265_v47 = vld [vmem:[%s867_s25 + $0x1c] sm:$0x1]  ;;  %v291_v53 = vld [vmem:[%s862_s22 + $0x18] sm:$0xf]  ;;  %v290_v60 = vld [vmem:[%s862_s22 + $0x14] sm:$0x1] }
  0x16   : > { %v407_v38 = vmax.f32 %v326_v23, %v379_v34  ;;  %v520_v39 = vsel %vm373_vm0, %v518_v30, %v519_v31  ;;  %v351_v42 = vunpack.c.l.bf16 %v263_v27  ;;  %v432_v44 = vunpack.c.l.bf16 %v289_v33  ;;  %v266_v15 = vld [vmem:[%s867_s25 + $0x20] sm:$0xf]  ;;  %v267_v16 = vld [vmem:[%s867_s25 + $0x24] sm:$0x1]  ;;  %v292_v23 = vld [vmem:[%s862_s22 + $0x1c] sm:$0x1] }
  0x17   : > { %v438_v43 = vmax.f32 %v406_v35, %v430_v5  ;;  %v495_v45 = vunpack.c.l.bf16 %v288_v32  ;;  %v772_v48 = vunpack.c.h.bf16 %v898_v21  ;;  %v327_v50 = vmax.f32 %v311_v41, %v771_v37  ;;  %v940_v35 = vld [vmem:[%s882_s6 + $0x10] sm:$0xff]  }
  0x18   : > { %v439_v49 = vmax.f32 %v407_v38, %v431_v17  ;;  %v380_v51 = vrot.slane %v311_v41, 1  ;;  %v381_v52 = vrot.slane %v351_v42, 1  ;;  %v787_v55 = vunpack.c.l.bf16 %v913_v40  ;;  %v293_v17 = vld [vmem:[%s862_s22 + $0x20] sm:$0xf] }
  0x19   : > { %v470_v54 = vmax.f32 %v438_v43, %v783_v18  ;;  %v522_v56 = vrot.slane %v495_v45, 1  ;;  %v524_v57 = vrot.slane %v432_v44, 1  ;;  %v312_v61 = vunpack.c.l.bf16 %v264_v46  ;;  %v269_v43 = vld [vmem:[%s867_s25 + $0x2c] sm:$0x1] }
  0x1a   : > { %v471_v58 = vmax.f32 %v439_v49, %v784_v28  ;;  %v382_v59 = vsel %vm373_vm0, %v380_v51, %v381_v52  ;;  %v352_v62 = vunpack.c.l.bf16 %v265_v47  ;;  %v433_v2 = vunpack.c.l.bf16 %v291_v53  ;;  %v294_v49 = vld [vmem:[%s862_s22 + $0x24] sm:$0x1] }
  0x1b   : > { %v550_v63 = vmax.f32 %v470_v54, %v520_v39  ;;  %v408_v0 = vmax.f32 %v327_v50, %v382_v59  ;;  %v523_v1 = vsel %vm373_vm0, %v521_v36, %v522_v56  ;;  %v328_v5 = vmax.f32 %v312_v61, %v772_v48  ;;  %v295_v50 = vld [vmem:[%s862_s22 + $0x28] sm:$0xf] }
  0x1c   : > { %v551_v4 = vmax.f32 %v471_v58, %v523_v1  ;;  %v383_v6 = vrot.slane %v312_v61, 1  ;;  %v384_v8 = vrot.slane %v352_v62, 1  ;;  %v788_v12 = vunpack.c.h.bf16 %v913_v40 }
  0x1d   : > { %v575_v9 = vmax.f32 %v550_v63, %v892_v10  ;;  %v440_v11 = vmax.f32 %v408_v0, %v432_v44  ;;  %v496_v13 = vunpack.c.l.bf16 %v290_v60  ;;  %v527_v20 = vrot.slane %v433_v2, 1 }
  0x1e   : > { %v576_v18 = vmax.f32 %v551_v4, %v311_v41  ;;  %v385_v19 = vsel %vm373_vm0, %v383_v6, %v384_v8  ;;  %v775_v22 = vunpack.c.l.bf16 %v924_v3  ;;  %v313_v28 = vunpack.c.l.bf16 %v266_v15  ;;  %v270_v4 = vld [vmem:[%s867_s25 + $0x30] sm:$0xf] }
  0x1f   : > { %v600_v24 = vmax.f32 %v575_v9, %v768_v14  ;;  %v472_v10 = vmax.f32 %v440_v11, %v787_v55  ;;  %v409_v25 = vmax.f32 %v328_v5, %v385_v19  ;;  %v525_v26 = vrot.slane %v496_v13, 1  ;;  %v271_v5 = vld [vmem:[%s867_s25 + $0x34] sm:$0x1]  ;;  %v296_v9 = vld [vmem:[%s862_s22 + $0x2c] sm:$0x1] }
  0x20   : > { %v601_v27 = vmax.f32 %v576_v18, %v771_v37  ;;  %v353_v29 = vunpack.c.l.bf16 %v267_v16  ;;  %v434_v30 = vunpack.c.l.bf16 %v293_v17  ;;  %v497_v36 = vunpack.c.l.bf16 %v292_v23  ;;  %v297_v11 = vld [vmem:[%s862_s22 + $0x30] sm:$0xf] }
  0x21   : > { %v631_v31 = vmax.f32 %v600_v24, %v379_v34  ;;  %v441_v32 = vmax.f32 %v409_v25, %v433_v2  ;;  %v526_v33 = vsel %vm373_vm0, %v524_v57, %v525_v26  ;;  %v329_v37 = vmax.f32 %v313_v28, %v775_v22  ;;  %v268_v34 = vld [vmem:[%s867_s25 + $0x28] sm:$0xf] }
  0x22   : > { %v632_v7 = vmax.f32 %v601_v27, %v382_v59  ;;  %v552_v14 = vmax.f32 %v472_v10, %v526_v33  ;;  %v386_v38 = vrot.slane %v313_v28, 1  ;;  %v387_v41 = vrot.slane %v353_v29, 1  ;;  %v964_v59 = vld [vmem:[%s875_s29 + $0x18] sm:$0xff]  }
  0x23   : > { %v639_v39 = vpack.c.bf16 %v631_v31, %v631_v31  ;;  %v473_v40 = vmax.f32 %v441_v32, %v788_v12  ;;  %v528_v42 = vrot.slane %v497_v36, 1  ;;  %v791_v46 = vunpack.c.l.bf16 %v940_v35  ;;  %v273_v31 = vld [vmem:[%s867_s25 + $0x3c] sm:$0x1] }
  0x24   : > { %v640_v44 = vpack.c.bf16 %v632_v7, %v632_v7  ;;  %v577_v45 = vmax.f32 %v552_v14, %v312_v61  ;;  %v776_v47 = vunpack.c.h.bf16 %v924_v3  ;;  %v388_v51 = vsel %vm373_vm0, %v386_v38, %v387_v41  ;;  %v298_v7 = vld [vmem:[%s862_s22 + $0x34] sm:$0x1]  ;;  %v299_v14 = vld [vmem:[%s862_s22 + $0x38] sm:$0xf] }
  0x25   : > { %648 = vst.msk [vmem:[%s947_s9] sm:$0xf] %vm647_vm1, %v639_v39  ;;  %v529_v52 = vsel %vm373_vm0, %v527_v20, %v528_v42  ;;  %v530_v53 = vrot.slane %v434_v30, 1  ;;  %v314_v54 = vunpack.c.l.bf16 %v268_v34  ;;  %v410_v56 = vmax.f32 %v329_v37, %v388_v51 }
  0x26   : > { %649 = vst.msk [vmem:[%s947_s9 + $0x4] sm:$0xf] %vm647_vm1, %v640_v44  ;;  %v602_v55 = vmax.f32 %v577_v45, %v772_v48  ;;  %v553_v57 = vmax.f32 %v473_v40, %v529_v52  ;;  %v354_v58 = vunpack.c.l.bf16 %v269_v43  ;;  %v435_v62 = vunpack.c.l.bf16 %v295_v50  ;;  %v300_v50 = vld [vmem:[%s862_s22 + $0x3c] sm:$0x1] }
  0x27   : > { %v330_v60 = vmax.f32 %v314_v54, %v776_v47  ;;  %v389_v61 = vrot.slane %v314_v54, 1  ;;  %v498_v63 = vunpack.c.l.bf16 %v294_v49  ;;  %v442_v1 = vmax.f32 %v410_v56, %v434_v30  ;;  %v272_v30 = vld [vmem:[%s867_s25 + $0x38] sm:$0xf] }
  0x28   : > { %v633_v0 = vmax.f32 %v602_v55, %v385_v19  ;;  %v578_v2 = vmax.f32 %v553_v57, %v313_v28  ;;  %v390_v3 = vrot.slane %v354_v58, 1  ;;  %v792_v21 = vunpack.c.h.bf16 %v940_v35  ;;  %v975_v19 = vld [vmem:[%s882_s6 + $0x18] sm:$0xff]  }
  0x29   : > { %v531_v48 = vrot.slane %v498_v63, 1  ;;  %v533_v6 = vrot.slane %v435_v62, 1  ;;  %v779_v8 = vunpack.c.l.bf16 %v964_v59  ;;  %v474_v13 = vmax.f32 %v442_v1, %v791_v46 }
  0x2a   : > { %v641_v12 = vpack.c.bf16 %v633_v0, %v633_v0  ;;  %v603_v15 = vmax.f32 %v578_v2, %v775_v22  ;;  %v391_v16 = vsel %vm373_vm0, %v389_v61, %v390_v3  ;;  %v315_v20 = vunpack.c.l.bf16 %v270_v4 }
  0x2b   : > { %v411_v17 = vmax.f32 %v330_v60, %v391_v16  ;;  %v532_v18 = vsel %vm373_vm0, %v530_v53, %v531_v48  ;;  %v355_v23 = vunpack.c.l.bf16 %v271_v5  ;;  %v436_v25 = vunpack.c.l.bf16 %v297_v11  ;;  %v275_v60 = vld [vmem:[%s867_s25 + $0x44] sm:$0x1] }
  0x2c   : > { %650 = vst.msk [vmem:[%s947_s9 + $0x8] sm:$0xf] %vm647_vm1, %v641_v12  ;;  %v634_v24 = vmax.f32 %v603_v15, %v388_v51  ;;  %v554_v10 = vmax.f32 %v474_v13, %v532_v18  ;;  %v499_v26 = vunpack.c.l.bf16 %v296_v9  ;;  %v331_v27 = vmax.f32 %v315_v20, %v779_v8  ;;  %v284_v12 = vld [vmem:[%s875_s29 + $0x20] sm:$0xf] }
  0x2d   : > { %v443_v22 = vmax.f32 %v411_v17, %v435_v62  ;;  %v392_v28 = vrot.slane %v315_v20, 1  ;;  %v393_v29 = vrot.slane %v355_v23, 1  ;;  %v795_v35 = vunpack.c.l.bf16 %v975_v19 }
  0x2e   : > { %v642_v32 = vpack.c.bf16 %v634_v24, %v634_v24  ;;  %v579_v33 = vmax.f32 %v554_v10, %v314_v54  ;;  %v534_v36 = vrot.slane %v499_v26, 1  ;;  %v536_v34 = vrot.slane %v436_v25, 1 }
  0x2f   : > { %v475_v37 = vmax.f32 %v443_v22, %v792_v21  ;;  %v394_v38 = vsel %vm373_vm0, %v392_v28, %v393_v29  ;;  %v780_v39 = vunpack.c.h.bf16 %v964_v59  ;;  %v316_v43 = vunpack.c.l.bf16 %v272_v30  ;;  %v274_v59 = vld [vmem:[%s867_s25 + $0x40] sm:$0xf] }
  0x30   : > { %651 = vst.msk [vmem:[%s947_s9 + $0xc] sm:$0xf] %vm647_vm1, %v642_v32  ;;  %v604_v40 = vmax.f32 %v579_v33, %v776_v47  ;;  %v412_v41 = vmax.f32 %v331_v27, %v394_v38  ;;  %v535_v42 = vsel %vm373_vm0, %v533_v6, %v534_v36  ;;  %v356_v45 = vunpack.c.l.bf16 %v273_v31 }
  0x31   : > { %v555_v44 = vmax.f32 %v475_v37, %v535_v42  ;;  %v437_v46 = vunpack.c.l.bf16 %v299_v14  ;;  %v500_v49 = vunpack.c.l.bf16 %v298_v7  ;;  %v332_v53 = vmax.f32 %v316_v43, %v780_v39 }
  0x32   : > { %v635_v51 = vmax.f32 %v604_v40, %v391_v16  ;;  %v444_v52 = vmax.f32 %v412_v41, %v436_v25  ;;  %v395_v54 = vrot.slane %v316_v43, 1  ;;  %v396_v56 = vrot.slane %v356_v45, 1 }
  0x33   : > { %v580_v55 = vmax.f32 %v555_v44, %v315_v20  ;;  %v537_v57 = vrot.slane %v500_v49, 1  ;;  %v501_v61 = vunpack.c.l.bf16 %v300_v50  ;;  %v539_v1 = vrot.slane %v437_v46, 1 }
  0x34   : > { %v643_v47 = vpack.c.bf16 %v635_v51, %v635_v51  ;;  %v476_v58 = vmax.f32 %v444_v52, %v795_v35  ;;  %v397_v63 = vsel %vm373_vm0, %v395_v54, %v396_v56  ;;  %v796_v2 = vunpack.c.h.bf16 %v975_v19 }
  0x35   : > { %v605_v62 = vmax.f32 %v580_v55, %v779_v8  ;;  %v538_v0 = vsel %vm373_vm0, %v536_v34, %v537_v57  ;;  %v413_v3 = vmax.f32 %v332_v53, %v397_v63  ;;  %v540_v5 = vrot.slane %v501_v61, 1 }
  0x36   : > { %652 = vst.msk [vmem:[%s947_s9 + $0x10] sm:$0xf] %vm647_vm1, %v643_v47  ;;  %v556_v4 = vmax.f32 %v476_v58, %v538_v0  ;;  %v574_v48 = vunpack.c.l.bf16 %v274_v59  ;;  %v624_v6 = vunpack.c.l.bf16 %v275_v60  ;;  %v599_v23 = vunpack.c.l.bf16 %v284_v12 }
  0x37   : > { %v636_v21 = vmax.f32 %v605_v62, %v394_v38  ;;  %v445_v9 = vmax.f32 %v413_v3, %v437_v46  ;;  %v541_v13 = vsel %vm373_vm0, %v539_v1, %v540_v5 }
  0x38   : > { %v581_v11 = vmax.f32 %v556_v4, %v316_v43  ;;  %v627_v17 = vrot.slane %v574_v48, 1  ;;  %v628_v18 = vrot.slane %v624_v6, 1 }
  0x39   : > { %v644_v8 = vpack.c.bf16 %v636_v21, %v636_v21  ;;  %v477_v15 = vmax.f32 %v445_v9, %v796_v2 }
  0x3a   : > { %v606_v16 = vmax.f32 %v581_v11, %v780_v39  ;;  %v629_v25 = vsel %vm373_vm0, %v627_v17, %v628_v18 }
  0x3b   : > { %653 = vst.msk [vmem:[%s947_s9 + $0x14] sm:$0xf] %vm647_vm1, %v644_v8  ;;  %v557_v20 = vmax.f32 %v477_v15, %v541_v13 }
  0x3c   : > { %v637_v19 = vmax.f32 %v606_v16, %v397_v63 }
  0x3d   : > { %v582_v10 = vmax.f32 %v557_v20, %v574_v48 }
  0x3e   : > { %v645_v24 = vpack.c.bf16 %v637_v19, %v637_v19 }
  0x3f   : > { %v607_v26 = vmax.f32 %v582_v10, %v599_v23 }
  0x40   : > { %654 = vst.msk [vmem:[%s947_s9 + $0x18] sm:$0xf] %vm647_vm1, %v645_v24 }
  0x41   : > { %v638_v22 = vmax.f32 %v607_v26, %v629_v25 }
  0x43   : > { %v646_v27 = vpack.c.bf16 %v638_v22, %v638_v22 }
  0x45   : > { %655 = vst.msk [vmem:[%s947_s9 + $0x1c] sm:$0xf] %vm647_vm1, %v646_v27 }
  0x46 PF: > { %s14_s15 = sadd.s32 1, %s819_s15  }
  0x47   : > { %p11_p4 = scmp.ge.s32.totalorder %s14_s15, 4  }
  0x49   :  { %13 = sbr.rel (!%p11_p4) target bundleno = 1 (0x1), region = 75 }

// kernel: alexnet_forward.11
= control target key start
LH: loop header
LB: loop body
LE: loop exit
PB: predicated region body
PF: predicated region fallthrough
CT: control target
= control target key end

     0   :  { %s1690_s12 = smov 0   ;;  %s1692_s13 = smov 0   ;;  %s2024_s0 = inlined_call_operand.vmem [shape: bf16[128,2048], index: 0, kind: input, shape index: {}]   ;;  %s2025_s1 = inlined_call_operand.vmem [shape: bf16[2048,64], index: 1, kind: input, shape index: {}]   ;;  %s2026_s2 = inlined_call_operand.vmem [shape: f32[1,64], index: 2, kind: input, shape index: {}]   ;;  %s2027_s3 = inlined_call_operand.vmem [shape: bf16[128,64], index: 3, kind: output, shape index: {}]  }
   0x1   :  { %s1694_s14 = smov 0   ;;  %s1696_s15 = smov 0  }
   0x2   :  { %s1698_s16 = smov 0  }
   0x3 LB: > { %s25_s17 = sadd.s32 1, %s1663_s15  ;;  %p48_p1 = scmp.ne.s32.totalorder %s1655_s13, %s1651_s12  ;;  %s1667_s16 = sphi %s1698_s16, %s13_s16   ;;  %s1663_s15 = sphi %s1696_s15, %s2031_s15   ;;  %s1659_s14 = sphi %s1694_s14, %s2030_s14   ;;  %s1655_s13 = sphi %s1692_s13, %s2029_s13   ;;  %s1651_s12 = sphi %s1690_s12, %s2028_s12  }
   0x4   : > { %p26_p0 = scmp.ge.s32.totalorder %s25_s17, 4  ;;  %p49_p2 = scmp.eq.s32.totalorder %s1667_s16, 0 }
   0x5   : > { %s41_s19 = sadd.s32 1, %s1655_s13  ;;  %p1252_p5 = scmp.ge.s32.totalorder %s1667_s16, 4 }
   0x6   : > { %s2033_s17 = smov (%p26_p0, %s25_s17), 0  ;;  %p50_p3 = por %p49_p2, %p48_p1 }
   0x7   : > { %s37_s18 = ssub.s32 %s1663_s15, %s2033_s17  ;;  %162 = sbr.rel (%p1252_p5) target bundleno = 48 (0x30), region = 20 }
   0x8   : > { %p39_p4 = scmp.eq.s32.totalorder %s37_s18, 0 }
   0xa   : > { %s1725_s20 = scalar_select %p39_p4, %s1655_s13, %s41_s19  }
   0xc   : > { %165 = sbr.rel (!%p50_p3) target bundleno = 48 (0x30), region = 24  ;;  %s167_s21 = sand.u32 (%p50_p3), 1, %s1655_s13  }
   0xd   : > { %s1522_s22 = sshll.u32 (%p50_p3), %s1663_s15, 4  ;;  %s1253_s23 = sshll.u32 (%p50_p3), %s167_s21, 8 }
   0xe   : > { %s1733_s26 = scalar_lea.vmem (%p50_p3), %s2024_s0, %s1522_s22  ;;  %s1738_s27 = scalar_lea.vmem (%p50_p3), [#allocation3], %s1253_s23 }
   0xf   : > { %v188_v0 = vld [vmem:[%s1733_s26] sm:$0xff] (%p50_p3)  ;;  %v190_v1 = vld [vmem:[%s1733_s26 + $0x8] sm:$0xff] (%p50_p3) }
  0x10   : > { %v192_v2 = vld [vmem:[%s1733_s26 + $0x40] sm:$0xff] (%p50_p3)  ;;  %189 = vst [vmem:[%s1738_s27] sm:$0xff] (%p50_p3), %v188_v0  ;;  %v194_v3 = vld [vmem:[%s1733_s26 + $0x48] sm:$0xff] (%p50_p3) }
  0x11   : > { %191 = vst [vmem:[%s1738_s27 + $0x8] sm:$0xff] %v190_v1  ;;  %v196_v4 = vld [vmem:[%s1733_s26 + $0x80] sm:$0xff]  ;;  %v198_v5 = vld [vmem:[%s1733_s26 + $0x88] sm:$0xff] }
  0x12   : > { %193 = vst [vmem:[%s1738_s27 + $0x10] sm:$0xff] %v192_v2  ;;  %v200_v6 = vld [vmem:[%s1733_s26 + $0xc0] sm:$0xff]  ;;  %v202_v7 = vld [vmem:[%s1733_s26 + $0xc8] sm:$0xff] }
  0x13   : > { %195 = vst [vmem:[%s1738_s27 + $0x18] sm:$0xff] %v194_v3  ;;  %v204_v8 = vld [vmem:[%s1733_s26 + $0x100] sm:$0xff]  ;;  %v206_v9 = vld [vmem:[%s1733_s26 + $0x108] sm:$0xff] }
  0x14   : > { %197 = vst [vmem:[%s1738_s27 + $0x20] sm:$0xff] %v196_v4  ;;  %v208_v10 = vld [vmem:[%s1733_s26 + $0x140] sm:$0xff]  ;;  %v210_v11 = vld [vmem:[%s1733_s26 + $0x148] sm:$0xff] }
  0x15   : > { %199 = vst [vmem:[%s1738_s27 + $0x28] sm:$0xff] %v198_v5  ;;  %v212_v12 = vld [vmem:[%s1733_s26 + $0x180] sm:$0xff]  ;;  %v214_v13 = vld [vmem:[%s1733_s26 + $0x188] sm:$0xff] }
  0x16   : > { %201 = vst [vmem:[%s1738_s27 + $0x30] sm:$0xff] %v200_v6  ;;  %v216_v14 = vld [vmem:[%s1733_s26 + $0x1c0] sm:$0xff]  ;;  %v218_v15 = vld [vmem:[%s1733_s26 + $0x1c8] sm:$0xff] }
  0x17   : > { %203 = vst [vmem:[%s1738_s27 + $0x38] sm:$0xff] %v202_v7  ;;  %v220_v16 = vld [vmem:[%s1733_s26 + $0x200] sm:$0xff]  ;;  %v222_v17 = vld [vmem:[%s1733_s26 + $0x208] sm:$0xff] }
  0x18   : > { %205 = vst [vmem:[%s1738_s27 + $0x40] sm:$0xff] %v204_v8  ;;  %v224_v18 = vld [vmem:[%s1733_s26 + $0x240] sm:$0xff]  ;;  %v226_v19 = vld [vmem:[%s1733_s26 + $0x248] sm:$0xff] }
  0x19   : > { %207 = vst [vmem:[%s1738_s27 + $0x48] sm:$0xff] %v206_v9  ;;  %v228_v20 = vld [vmem:[%s1733_s26 + $0x280] sm:$0xff]  ;;  %v230_v21 = vld [vmem:[%s1733_s26 + $0x288] sm:$0xff] }
  0x1a   : > { %209 = vst [vmem:[%s1738_s27 + $0x50] sm:$0xff] %v208_v10  ;;  %v232_v22 = vld [vmem:[%s1733_s26 + $0x2c0] sm:$0xff]  ;;  %v234_v23 = vld [vmem:[%s1733_s26 + $0x2c8] sm:$0xff] }
  0x1b   : > { %211 = vst [vmem:[%s1738_s27 + $0x58] sm:$0xff] %v210_v11  ;;  %v236_v24 = vld [vmem:[%s1733_s26 + $0x300] sm:$0xff]  ;;  %v238_v25 = vld [vmem:[%s1733_s26 + $0x308] sm:$0xff] }
  0x1c   : > { %213 = vst [vmem:[%s1738_s27 + $0x60] sm:$0xff] %v212_v12  ;;  %v240_v26 = vld [vmem:[%s1733_s26 + $0x340] sm:$0xff]  ;;  %v242_v27 = vld [vmem:[%s1733_s26 + $0x348] sm:$0xff] }
  0x1d   : > { %215 = vst [vmem:[%s1738_s27 + $0x68] sm:$0xff] %v214_v13  ;;  %v244_v28 = vld [vmem:[%s1733_s26 + $0x380] sm:$0xff]  ;;  %v246_v29 = vld [vmem:[%s1733_s26 + $0x388] sm:$0xff] }
  0x1e   : > { %217 = vst [vmem:[%s1738_s27 + $0x70] sm:$0xff] %v216_v14  ;;  %v248_v30 = vld [vmem:[%s1733_s26 + $0x3c0] sm:$0xff]  ;;  %v250_v31 = vld [vmem:[%s1733_s26 + $0x3c8] sm:$0xff] }
  0x1f   : > { %219 = vst [vmem:[%s1738_s27 + $0x78] sm:$0xff] %v218_v15 }
  0x20   : > { %221 = vst [vmem:[%s1738_s27 + $0x80] sm:$0xff] %v220_v16 }
  0x21   : > { %223 = vst [vmem:[%s1738_s27 + $0x88] sm:$0xff] %v222_v17 }
  0x22   : > { %225 = vst [vmem:[%s1738_s27 + $0x90] sm:$0xff] %v224_v18 }
  0x23   : > { %227 = vst [vmem:[%s1738_s27 + $0x98] sm:$0xff] %v226_v19 }
  0x24   : > { %229 = vst [vmem:[%s1738_s27 + $0xa0] sm:$0xff] %v228_v20 }
  0x25   : > { %231 = vst [vmem:[%s1738_s27 + $0xa8] sm:$0xff] %v230_v21 }
  0x26   : > { %233 = vst [vmem:[%s1738_s27 + $0xb0] sm:$0xff] %v232_v22 }
  0x27   : > { %235 = vst [vmem:[%s1738_s27 + $0xb8] sm:$0xff] %v234_v23 }
  0x28   : > { %237 = vst [vmem:[%s1738_s27 + $0xc0] sm:$0xff] %v236_v24 }
  0x29   : > { %239 = vst [vmem:[%s1738_s27 + $0xc8] sm:$0xff] %v238_v25 }
  0x2a   : > { %241 = vst [vmem:[%s1738_s27 + $0xd0] sm:$0xff] %v240_v26 }
  0x2b   : > { %243 = vst [vmem:[%s1738_s27 + $0xd8] sm:$0xff] %v242_v27 }
  0x2c   : > { %245 = vst [vmem:[%s1738_s27 + $0xe0] sm:$0xff] %v244_v28 }
  0x2d   : > { %247 = vst [vmem:[%s1738_s27 + $0xe8] sm:$0xff] %v246_v29 }
  0x2e   : > { %249 = vst [vmem:[%s1738_s27 + $0xf0] sm:$0xff] %v248_v30 }
  0x2f   : > { %251 = vst [vmem:[%s1738_s27 + $0xf8] sm:$0xff] %v250_v31 }
  0x30 PF: > { %p1256_p6 = scmp.ge.s32.totalorder %s1667_s16, 1  ;;  %p268_p7 = scmp.lt.s32.totalorder %s1667_s16, 5 }
  0x32   : > { %p269_p8 = pnand %p1256_p6, %p268_p7 }
  0x33   : > { %s275_s28 = sand.u32 (!%p269_p8), 1, %s1651_s12   ;;  %s1258_s29 = sshll.u32 (!%p269_p8), %s1659_s14, 6 }
  0x34   : > { %272 = sbr.rel (%p269_p8) target bundleno = 396 (0x18c), region = 51  ;;  %s1257_s30 = sshll.u32 (!%p269_p8), %s275_s28, 8 }
  0x35   : > { %p315_p9 = scmp.lt.s32.totalorder (!%p269_p8), %s1258_s29, 255  ;;  %s1810_s8 = scalar_lea.vmem (!%p269_p8), [#allocation3], %s1257_s30 }
  0x36   : > { %p1260_p10 = scmp.ne.s32.totalorder (!%p269_p8), %s1659_s14, 0 }
  0x39   : > { %s2035_s29 = smov (!%p315_p9, %s1258_s29), 255  ;;  %338 = sbr.rel (%p1260_p10) target bundleno = 79 (0x4f), region = 59 }
  0x3a   : > { %s1259_s4 = sshll.u32 %s2035_s29, 2 }
  0x3b   : > { %s1808_s7 = scalar_lea.vmem %s2025_s1, %s1259_s4 }
  0x3e   : > { %vm339_vm0 = vcmask 523264   ;;  %v1669_v32 = vmov 0.0  }
  0x3f   : > { %340 = vst.msk [vmem:[#allocation2] sm:$0xff] %vm339_vm0, %v1669_v32 }
  0x40   : > { %341 = vst.msk [vmem:[#allocation2 + $0x8] sm:$0xff] %vm339_vm0, %v1669_v32 }
  0x41   : > { %342 = vst.msk [vmem:[#allocation2 + $0x10] sm:$0xff] %vm339_vm0, %v1669_v32 }
  0x42   : > { %343 = vst.msk [vmem:[#allocation2 + $0x18] sm:$0xff] %vm339_vm0, %v1669_v32 }
  0x43   : > { %344 = vst.msk [vmem:[#allocation2 + $0x20] sm:$0xff] %vm339_vm0, %v1669_v32 }
  0x44   : > { %345 = vst.msk [vmem:[#allocation2 + $0x28] sm:$0xff] %vm339_vm0, %v1669_v32 }
  0x45   : > { %346 = vst.msk [vmem:[#allocation2 + $0x30] sm:$0xff] %vm339_vm0, %v1669_v32 }
  0x46   : > { %347 = vst.msk [vmem:[#allocation2 + $0x38] sm:$0xff] %vm339_vm0, %v1669_v32 }
  0x47   : > { %348 = vst.msk [vmem:[#allocation2 + $0x40] sm:$0xff] %vm339_vm0, %v1669_v32 }
  0x48   : > { %349 = vst.msk [vmem:[#allocation2 + $0x48] sm:$0xff] %vm339_vm0, %v1669_v32 }
  0x49   : > { %350 = vst.msk [vmem:[#allocation2 + $0x50] sm:$0xff] %vm339_vm0, %v1669_v32 }
  0x4a   : > { %351 = vst.msk [vmem:[#allocation2 + $0x58] sm:$0xff] %vm339_vm0, %v1669_v32 }
  0x4b   : > { %352 = vst.msk [vmem:[#allocation2 + $0x60] sm:$0xff] %vm339_vm0, %v1669_v32 }
  0x4c   : > { %353 = vst.msk [vmem:[#allocation2 + $0x68] sm:$0xff] %vm339_vm0, %v1669_v32 }
  0x4d   : > { %354 = vst.msk [vmem:[#allocation2 + $0x70] sm:$0xff] %vm339_vm0, %v1669_v32 }
  0x4e   : > { %355 = vst.msk [vmem:[#allocation2 + $0x78] sm:$0xff] %vm339_vm0, %v1669_v32 }
  0x4f PF: > { %v1562_v33 = vld [vmem:[%s1808_s7 + $0x38] sm:$0xff]  ;;  %v1561_v37 = vld [vmem:[%s1808_s7 + $0x30] sm:$0xff]  ;;  %v1560_v41 = vld [vmem:[%s1808_s7 + $0x28] sm:$0xff]  ;;  %vm1032_vm1 = vcmask 523264   ;;  %p1517_p11 = scmp.ne.s32.totalorder %s1659_s14, 3 }
  0x50   : > { %v1570_v34 = vld [vmem:[%s1808_s7 + $0x78] sm:$0xff]  ;;  %820 = vmatpush.bf16.msra.mxu0 %v1562_v33  ;;  %v1569_v38 = vld [vmem:[%s1808_s7 + $0x70] sm:$0xff]  ;;  %v1568_v42 = vld [vmem:[%s1808_s7 + $0x68] sm:$0xff] }
  0x51   : > { %v1578_v35 = vld [vmem:[%s1808_s7 + $0xb8] sm:$0xff]  ;;  %869 = vmatpush.bf16.msra.mxu1 %v1570_v34  ;;  %v1577_v39 = vld [vmem:[%s1808_s7 + $0xb0] sm:$0xff]  ;;  %v1576_v43 = vld [vmem:[%s1808_s7 + $0xa8] sm:$0xff] }
  0x52   : > { %v1586_v36 = vld [vmem:[%s1808_s7 + $0xf8] sm:$0xff]  ;;  %918 = vmatpush.bf16.msra.mxu2 %v1578_v35  ;;  %v1585_v40 = vld [vmem:[%s1808_s7 + $0xf0] sm:$0xff]  ;;  %v1584_v44 = vld [vmem:[%s1808_s7 + $0xe8] sm:$0xff] }
  0x53   : > { %967 = vmatpush.bf16.msra.mxu3 %v1586_v36  ;;  %v1559_v45 = vld [vmem:[%s1808_s7 + $0x20] sm:$0xff]  ;;  %v1558_v49 = vld [vmem:[%s1808_s7 + $0x18] sm:$0xff]  ;;  %v1557_v53 = vld [vmem:[%s1808_s7 + $0x10] sm:$0xff] }
  0x54   : > { %821 = vmatpush.bf16.msra.mxu0 %v1561_v37  ;;  %v1567_v46 = vld [vmem:[%s1808_s7 + $0x60] sm:$0xff]  ;;  %v1566_v50 = vld [vmem:[%s1808_s7 + $0x58] sm:$0xff]  ;;  %v1565_v54 = vld [vmem:[%s1808_s7 + $0x50] sm:$0xff] }
  0x55   : > { %870 = vmatpush.bf16.msra.mxu1 %v1569_v38  ;;  %v1575_v47 = vld [vmem:[%s1808_s7 + $0xa0] sm:$0xff]  ;;  %v1574_v51 = vld [vmem:[%s1808_s7 + $0x98] sm:$0xff]  ;;  %v1573_v55 = vld [vmem:[%s1808_s7 + $0x90] sm:$0xff] }
  0x56   : > { %919 = vmatpush.bf16.msra.mxu2 %v1577_v39  ;;  %v1583_v48 = vld [vmem:[%s1808_s7 + $0xe0] sm:$0xff]  ;;  %v1582_v52 = vld [vmem:[%s1808_s7 + $0xd8] sm:$0xff]  ;;  %v1581_v56 = vld [vmem:[%s1808_s7 + $0xd0] sm:$0xff] }
  0x57   : > { %968 = vmatpush.bf16.msra.mxu3 %v1585_v40  ;;  %v1556_v57 = vld [vmem:[%s1808_s7 + $0x8] sm:$0xff]  ;;  %v1555_v61 = vld [vmem:[%s1808_s7] sm:$0xff]  ;;  %v1525_v2 = vld [vmem:[%s1810_s8 + $0xc] sm:$0xf0] }
  0x58   : > { %822 = vmatpush.bf16.msra.mxu0 %v1560_v41  ;;  %v1564_v58 = vld [vmem:[%s1808_s7 + $0x48] sm:$0xff]  ;;  %v1563_v62 = vld [vmem:[%s1808_s7 + $0x40] sm:$0xff]  ;;  %v1265_v4 = vld [vmem:[%s1810_s8 + $0x10] sm:$0xf0] }
  0x59   : > { %871 = vmatpush.bf16.msra.mxu1 %v1568_v42  ;;  %v1572_v59 = vld [vmem:[%s1808_s7 + $0x88] sm:$0xff]  ;;  %v1571_v63 = vld [vmem:[%s1808_s7 + $0x80] sm:$0xff]  ;;  %v1526_v6 = vld [vmem:[%s1810_s8 + $0x14] sm:$0xf0] }
  0x5a   : > { %920 = vmatpush.bf16.msra.mxu2 %v1576_v43  ;;  %v1580_v60 = vld [vmem:[%s1808_s7 + $0xc8] sm:$0xff]  ;;  %v1579_v0 = vld [vmem:[%s1808_s7 + $0xc0] sm:$0xff]  ;;  %v1273_v8 = vld [vmem:[%s1810_s8 + $0x18] sm:$0xf0] }
  0x5b   : > { %969 = vmatpush.bf16.msra.mxu3 %v1584_v44  ;;  %v1263_v1 = vld [vmem:[%s1810_s8] sm:$0xf]  ;;  %v1523_v3 = vld [vmem:[%s1810_s8 + $0x4] sm:$0xf]  ;;  %v1271_v5 = vld [vmem:[%s1810_s8 + $0x8] sm:$0xf] }
  0x5c   : > { %823 = vmatpush.bf16.msra.mxu0 %v1559_v45  ;;  %v1524_v7 = vld [vmem:[%s1810_s8 + $0xc] sm:$0xf]  ;;  %v1264_v9 = vor.u32 %v1525_v2, %v1263_v1  ;;  %v1268_v10 = vor.u32 %v1523_v3, %v1265_v4  ;;  %v1272_v11 = vor.u32 %v1526_v6, %v1271_v5  ;;  %v1279_v13 = vld [vmem:[%s1810_s8 + $0x20] sm:$0xf]  ;;  %v1529_v14 = vld [vmem:[%s1810_s8 + $0x2c] sm:$0xf0] }
  0x5d   : > { %872 = vmatpush.bf16.msra.mxu1 %v1567_v46  ;;  %v1276_v12 = vor.u32 %v1524_v7, %v1273_v8  ;;  %v1527_v15 = vld [vmem:[%s1810_s8 + $0x24] sm:$0xf]  ;;  %v1281_v16 = vld [vmem:[%s1810_s8 + $0x30] sm:$0xf0]  ;;  %v1287_v17 = vld [vmem:[%s1810_s8 + $0x28] sm:$0xf]  ;;  %v1280_v21 = vor.u32 %v1529_v14, %v1279_v13 }
  0x5e   : > { %921 = vmatpush.bf16.msra.mxu2 %v1575_v47  ;;  %v1530_v18 = vld [vmem:[%s1810_s8 + $0x34] sm:$0xf0]  ;;  %v1528_v19 = vld [vmem:[%s1810_s8 + $0x2c] sm:$0xf]  ;;  %v1289_v20 = vld [vmem:[%s1810_s8 + $0x38] sm:$0xf0]  ;;  %v1284_v22 = vor.u32 %v1527_v15, %v1281_v16 }
  0x5f   : > { %970 = vmatpush.bf16.msra.mxu3 %v1583_v48  ;;  %v1288_v23 = vor.u32 %v1530_v18, %v1287_v17  ;;  %v1292_v24 = vor.u32 %v1528_v19, %v1289_v20  ;;  %v1295_v25 = vld [vmem:[%s1810_s8 + $0x40] sm:$0xf]  ;;  %v1533_v26 = vld [vmem:[%s1810_s8 + $0x4c] sm:$0xf0]  ;;  %v1531_v27 = vld [vmem:[%s1810_s8 + $0x44] sm:$0xf] }
  0x60   : > { %824 = vmatpush.bf16.msra.mxu0 %v1558_v49  ;;  %v1297_v28 = vld [vmem:[%s1810_s8 + $0x50] sm:$0xf0]  ;;  %v1303_v29 = vld [vmem:[%s1810_s8 + $0x48] sm:$0xf]  ;;  %v1534_v30 = vld [vmem:[%s1810_s8 + $0x54] sm:$0xf0]  ;;  %v1296_v33 = vor.u32 %v1533_v26, %v1295_v25 }
  0x61   : > { %873 = vmatpush.bf16.msra.mxu1 %v1566_v50  ;;  %v1532_v31 = vld [vmem:[%s1810_s8 + $0x4c] sm:$0xf]  ;;  %v1305_v32 = vld [vmem:[%s1810_s8 + $0x58] sm:$0xf0]  ;;  %v1300_v34 = vor.u32 %v1531_v27, %v1297_v28  ;;  %v1304_v35 = vor.u32 %v1534_v30, %v1303_v29  ;;  %v1311_v37 = vld [vmem:[%s1810_s8 + $0x60] sm:$0xf] }
  0x62   : > { %922 = vmatpush.bf16.msra.mxu2 %v1574_v51  ;;  %v1308_v36 = vor.u32 %v1532_v31, %v1305_v32  ;;  %v1537_v38 = vld [vmem:[%s1810_s8 + $0x6c] sm:$0xf0]  ;;  %v1535_v39 = vld [vmem:[%s1810_s8 + $0x64] sm:$0xf]  ;;  %v1313_v40 = vld [vmem:[%s1810_s8 + $0x70] sm:$0xf0] }
  0x63   : > { %971 = vmatpush.bf16.msra.mxu3 %v1582_v52  ;;  %v1319_v41 = vld [vmem:[%s1810_s8 + $0x68] sm:$0xf]  ;;  %v1538_v42 = vld [vmem:[%s1810_s8 + $0x74] sm:$0xf0]  ;;  %v1536_v43 = vld [vmem:[%s1810_s8 + $0x6c] sm:$0xf]  ;;  %v1312_v45 = vor.u32 %v1537_v38, %v1311_v37  ;;  %v1316_v46 = vor.u32 %v1535_v39, %v1313_v40 }
  0x64   : > { %825 = vmatpush.bf16.msra.mxu0 %v1557_v53  ;;  %v1321_v44 = vld [vmem:[%s1810_s8 + $0x78] sm:$0xf0]  ;;  %v1320_v47 = vor.u32 %v1538_v42, %v1319_v41  ;;  %v1327_v49 = vld [vmem:[%s1810_s8 + $0x80] sm:$0xf]  ;;  %v1541_v50 = vld [vmem:[%s1810_s8 + $0x8c] sm:$0xf0] }
  0x65   : > { %874 = vmatpush.bf16.msra.mxu1 %v1565_v54  ;;  %v1324_v48 = vor.u32 %v1536_v43, %v1321_v44  ;;  %v1539_v51 = vld [vmem:[%s1810_s8 + $0x84] sm:$0xf]  ;;  %v1329_v52 = vld [vmem:[%s1810_s8 + $0x90] sm:$0xf0]  ;;  %v1335_v53 = vld [vmem:[%s1810_s8 + $0x88] sm:$0xf] }
  0x66   : > { %923 = vmatpush.bf16.msra.mxu2 %v1573_v55  ;;  %v1542_v54 = vld [vmem:[%s1810_s8 + $0x94] sm:$0xf0]  ;;  %v1540_v55 = vld [vmem:[%s1810_s8 + $0x8c] sm:$0xf]  ;;  %v1351_v1 = vld [vmem:[%s1810_s8 + $0xa8] sm:$0xf] }
  0x67   : > { %972 = vmatpush.bf16.msra.mxu3 %v1581_v56  ;;  %v1337_v56 = vld [vmem:[%s1810_s8 + $0x98] sm:$0xf0]  ;;  %v1546_v2 = vld [vmem:[%s1810_s8 + $0xb4] sm:$0xf0]  ;;  %v1544_v3 = vld [vmem:[%s1810_s8 + $0xac] sm:$0xf] }
  0x68   : > { %826 = vmatpush.bf16.msra.mxu0 %v1556_v57  ;;  %v1328_v57 = vor.u32 %v1541_v50, %v1327_v49  ;;  %v1353_v4 = vld [vmem:[%s1810_s8 + $0xb8] sm:$0xf0]  ;;  %v1352_v7 = vor.u32 %v1546_v2, %v1351_v1  ;;  %v1367_v13 = vld [vmem:[%s1810_s8 + $0xc8] sm:$0xf]  ;;  %v1550_v14 = vld [vmem:[%s1810_s8 + $0xd4] sm:$0xf0] }
  0x69   : > { %875 = vmatpush.bf16.msra.mxu1 %v1564_v58  ;;  %v1332_v58 = vor.u32 %v1539_v51, %v1329_v52  ;;  %v1356_v8 = vor.u32 %v1544_v3, %v1353_v4  ;;  %v1548_v15 = vld [vmem:[%s1810_s8 + $0xcc] sm:$0xf]  ;;  %v1369_v16 = vld [vmem:[%s1810_s8 + $0xd8] sm:$0xf0]  ;;  %v1368_v19 = vor.u32 %v1550_v14, %v1367_v13  ;;  %v1383_v25 = vld [vmem:[%s1810_s8 + $0xe8] sm:$0xf] }
  0x6a   : > { %924 = vmatpush.bf16.msra.mxu2 %v1572_v59  ;;  %v1336_v59 = vor.u32 %v1542_v54, %v1335_v53  ;;  %v1372_v20 = vor.u32 %v1548_v15, %v1369_v16  ;;  %v1554_v26 = vld [vmem:[%s1810_s8 + $0xf4] sm:$0xf0]  ;;  %v1552_v27 = vld [vmem:[%s1810_s8 + $0xec] sm:$0xf]  ;;  %v1385_v28 = vld [vmem:[%s1810_s8 + $0xf8] sm:$0xf0] }
  0x6b   : > { %973 = vmatpush.bf16.msra.mxu3 %v1580_v60  ;;  %v1340_v60 = vor.u32 %v1540_v55, %v1337_v56  ;;  %v1384_v31 = vor.u32 %v1554_v26, %v1383_v25  ;;  %v1388_v32 = vor.u32 %v1552_v27, %v1385_v28  ;;  %v356_v41 = vld [vmem:[#allocation2] sm:$0xff]  ;;  %v357_v50 = vld [vmem:[#allocation2 + $0x8] sm:$0xff]  ;;  %v359_v4 = vld [vmem:[#allocation2 + $0x18] sm:$0xff] }
  0x6c   : > { %827 = vmatpush.bf16.msra.mxu0 %v1555_v61  ;;  %v1343_v61 = vld [vmem:[%s1810_s8 + $0xa0] sm:$0xf] }
  0x6d   : > { %876 = vmatpush.bf16.msra.mxu1 %v1563_v62  ;;  %v1545_v62 = vld [vmem:[%s1810_s8 + $0xac] sm:$0xf0]  ;;  %v360_v13 = vld [vmem:[#allocation2 + $0x20] sm:$0xff] }
  0x6e   : > { %925 = vmatpush.bf16.msra.mxu2 %v1571_v63  ;;  %v1543_v63 = vld [vmem:[%s1810_s8 + $0xa4] sm:$0xf]  ;;  %v1344_v5 = vor.u32 %v1545_v62, %v1343_v61 }
  0x6f   : > { %974 = vmatpush.bf16.msra.mxu3 %v1579_v0  ;;  %828 = vmatmul.bf16.vlgmr.msra.gmra.mxu0 %v1264_v9  ;;  %v1345_v0 = vld [vmem:[%s1810_s8 + $0xb0] sm:$0xf0]  ;;  %v1359_v9 = vld [vmem:[%s1810_s8 + $0xc0] sm:$0xf] }
  0x70   : > { %877 = vmatmul.bf16.vlgmr.msra.gmra.mxu1 %v1268_v10  ;;  %v1348_v6 = vor.u32 %v1543_v63, %v1345_v0  ;;  %v1549_v10 = vld [vmem:[%s1810_s8 + $0xcc] sm:$0xf0] }
  0x71   : > { %926 = vmatmul.bf16.vlgmr.msra.gmra.mxu2 %v1272_v11  ;;  %v1547_v11 = vld [vmem:[%s1810_s8 + $0xc4] sm:$0xf]  ;;  %v1360_v17 = vor.u32 %v1549_v10, %v1359_v9 }
  0x72   : > { %975 = vmatmul.bf16.vlgmr.msra.gmra.mxu3 %v1276_v12  ;;  %v1361_v12 = vld [vmem:[%s1810_s8 + $0xd0] sm:$0xf0] }
  0x73   : > { %v1364_v18 = vor.u32 %v1547_v11, %v1361_v12 }
  0x7f   : > { %833 = vmatmul.bf16.gmra.mxu0 %v1280_v21  ;;  %v1375_v21 = vld [vmem:[%s1810_s8 + $0xe0] sm:$0xf] }
  0x80   : > { %882 = vmatmul.bf16.gmra.mxu1 %v1284_v22  ;;  %v1553_v22 = vld [vmem:[%s1810_s8 + $0xec] sm:$0xf0] }
  0x81   : > { %931 = vmatmul.bf16.gmra.mxu2 %v1288_v23  ;;  %v1551_v23 = vld [vmem:[%s1810_s8 + $0xe4] sm:$0xf]  ;;  %v1376_v29 = vor.u32 %v1553_v22, %v1375_v21  ;;  %v361_v22 = vld [vmem:[#allocation2 + $0x28] sm:$0xff] }
  0x82   : > { %980 = vmatmul.bf16.gmra.mxu3 %v1292_v24  ;;  %v1377_v24 = vld [vmem:[%s1810_s8 + $0xf0] sm:$0xf0] }
  0x83   : > { %v1380_v30 = vor.u32 %v1551_v23, %v1377_v24 }
  0x8f   : > { %838 = vmatmul.bf16.gmra.mxu0 %v1296_v33 }
  0x90   : > { %887 = vmatmul.bf16.gmra.mxu1 %v1300_v34 }
  0x91   : > { %936 = vmatmul.bf16.gmra.mxu2 %v1304_v35 }
  0x92   : > { %985 = vmatmul.bf16.gmra.mxu3 %v1308_v36 }
  0x9f   : > { %843 = vmatmul.bf16.gmra.mxu0 %v1312_v45 }
  0xa0   : > { %892 = vmatmul.bf16.gmra.mxu1 %v1316_v46 }
  0xa1   : > { %941 = vmatmul.bf16.gmra.mxu2 %v1320_v47 }
  0xa2   : > { %990 = vmatmul.bf16.gmra.mxu3 %v1324_v48 }
  0xaf   : > { %848 = vmatmul.bf16.gmra.mxu0 %v1328_v57 }
  0xb0   : > { %897 = vmatmul.bf16.gmra.mxu1 %v1332_v58 }
  0xb1   : > { %946 = vmatmul.bf16.gmra.mxu2 %v1336_v59  ;;  %v358_v59 = vld [vmem:[#allocation2 + $0x10] sm:$0xff] }
  0xb2   : > { %995 = vmatmul.bf16.gmra.mxu3 %v1340_v60 }
  0xbf   : > { %853 = vmatmul.bf16.gmra.mxu0 %v1344_v5 }
  0xc0   : > { %902 = vmatmul.bf16.gmra.mxu1 %v1348_v6 }
  0xc1   : > { %951 = vmatmul.bf16.gmra.mxu2 %v1352_v7 }
  0xc2   : > { %1000 = vmatmul.bf16.gmra.mxu3 %v1356_v8 }
  0xcf   : > { %858 = vmatmul.bf16.gmra.mxu0 %v1360_v17 }
  0xd0   : > { %907 = vmatmul.bf16.gmra.mxu1 %v1364_v18 }
  0xd1   : > { %956 = vmatmul.bf16.gmra.mxu2 %v1368_v19 }
  0xd2   : > { %1005 = vmatmul.bf16.gmra.mxu3 %v1372_v20 }
  0xdf   : > { %863 = vmatmul.bf16.gmra.mxu0 %v1376_v29 }
  0xe0   : > { %912 = vmatmul.bf16.gmra.mxu1 %v1380_v30 }
  0xe1   : > { %961 = vmatmul.bf16.gmra.mxu2 %v1384_v31  ;;  %v362_v31 = vld [vmem:[#allocation2 + $0x30] sm:$0xff] }
  0xe2   : > { %1010 = vmatmul.bf16.gmra.mxu3 %v1388_v32 }
  0xec   : > { %v829_v33 = vpop.f32.mrf.mxu0 }
  0xed   : > { %v878_v34 = vpop.f32.mrf.mxu1 }
  0xee   : > { %v879_v35 = vadd.f32 %v878_v34, %v829_v33 }
  0xf4   : > { %v927_v36 = vpop.f32.mrf.mxu2  ;;  %v831_v39 = vpop.f32.mrf.mxu0 }
  0xf5   : > { %v976_v37 = vpop.f32.mrf.mxu3  ;;  %v928_v38 = vadd.f32 %v927_v36, %v879_v35  ;;  %v880_v40 = vpop.f32.mrf.mxu1 }
  0xf6   : > { %v881_v44 = vadd.f32 %v880_v40, %v831_v39  ;;  %v363_v40 = vld [vmem:[#allocation2 + $0x38] sm:$0xff] }
  0xf7   : > { %v977_v42 = vadd.f32 %v976_v37, %v928_v38 }
  0xf9   : > { %v1016_v43 = vadd.f32 %v977_v42, %v356_v41 }
  0xfb   : > { %1033 = vst.msk [vmem:[#allocation2] sm:$0xff] %vm1032_vm1, %v1016_v43 }
  0xfc   : > { %v929_v45 = vpop.f32.mrf.mxu2  ;;  %v834_v48 = vpop.f32.mrf.mxu0 }
  0xfd   : > { %v978_v46 = vpop.f32.mrf.mxu3  ;;  %v930_v47 = vadd.f32 %v929_v45, %v881_v44  ;;  %v883_v49 = vpop.f32.mrf.mxu1 }
  0xfe   : > { %v884_v53 = vadd.f32 %v883_v49, %v834_v48  ;;  %v364_v49 = vld [vmem:[#allocation2 + $0x40] sm:$0xff] }
  0xff   : > { %v979_v51 = vadd.f32 %v978_v46, %v930_v47 }
 0x101   : > { %v1017_v52 = vadd.f32 %v979_v51, %v357_v50 }
 0x103   : > { %1034 = vst.msk [vmem:[#allocation2 + $0x8] sm:$0xff] %vm1032_vm1, %v1017_v52 }
 0x104   : > { %v932_v54 = vpop.f32.mrf.mxu2  ;;  %v836_v57 = vpop.f32.mrf.mxu0 }
 0x105   : > { %v981_v55 = vpop.f32.mrf.mxu3  ;;  %v933_v56 = vadd.f32 %v932_v54, %v884_v53  ;;  %v885_v58 = vpop.f32.mrf.mxu1 }
 0x106   : > { %v886_v62 = vadd.f32 %v885_v58, %v836_v57  ;;  %v365_v58 = vld [vmem:[#allocation2 + $0x48] sm:$0xff] }
 0x107   : > { %v982_v60 = vadd.f32 %v981_v55, %v933_v56 }
 0x109   : > { %v1018_v61 = vadd.f32 %v982_v60, %v358_v59 }
 0x10b   : > { %1035 = vst.msk [vmem:[#allocation2 + $0x10] sm:$0xff] %vm1032_vm1, %v1018_v61 }
 0x10c   : > { %v934_v63 = vpop.f32.mrf.mxu2  ;;  %v839_v2 = vpop.f32.mrf.mxu0 }
 0x10d   : > { %v983_v0 = vpop.f32.mrf.mxu3  ;;  %v935_v1 = vadd.f32 %v934_v63, %v886_v62  ;;  %v888_v3 = vpop.f32.mrf.mxu1 }
 0x10e   : > { %v889_v7 = vadd.f32 %v888_v3, %v839_v2  ;;  %v366_v3 = vld [vmem:[#allocation2 + $0x50] sm:$0xff] }
 0x10f   : > { %v984_v5 = vadd.f32 %v983_v0, %v935_v1 }
 0x111   : > { %v1019_v6 = vadd.f32 %v984_v5, %v359_v4 }
 0x113   : > { %1036 = vst.msk [vmem:[#allocation2 + $0x18] sm:$0xff] %vm1032_vm1, %v1019_v6 }
 0x114   : > { %v937_v8 = vpop.f32.mrf.mxu2  ;;  %v841_v11 = vpop.f32.mrf.mxu0 }
 0x115   : > { %v986_v9 = vpop.f32.mrf.mxu3  ;;  %v938_v10 = vadd.f32 %v937_v8, %v889_v7  ;;  %v890_v12 = vpop.f32.mrf.mxu1 }
 0x116   : > { %v891_v16 = vadd.f32 %v890_v12, %v841_v11  ;;  %v367_v12 = vld [vmem:[#allocation2 + $0x58] sm:$0xff] }
 0x117   : > { %v987_v14 = vadd.f32 %v986_v9, %v938_v10 }
 0x119   : > { %v1020_v15 = vadd.f32 %v987_v14, %v360_v13 }
 0x11b   : > { %1037 = vst.msk [vmem:[#allocation2 + $0x20] sm:$0xff] %vm1032_vm1, %v1020_v15 }
 0x11c   : > { %v939_v17 = vpop.f32.mrf.mxu2  ;;  %v844_v20 = vpop.f32.mrf.mxu0 }
 0x11d   : > { %v988_v18 = vpop.f32.mrf.mxu3  ;;  %v940_v19 = vadd.f32 %v939_v17, %v891_v16  ;;  %v893_v21 = vpop.f32.mrf.mxu1 }
 0x11e   : > { %v894_v25 = vadd.f32 %v893_v21, %v844_v20  ;;  %v368_v21 = vld [vmem:[#allocation2 + $0x60] sm:$0xff] }
 0x11f   : > { %v989_v23 = vadd.f32 %v988_v18, %v940_v19 }
 0x121   : > { %v1021_v24 = vadd.f32 %v989_v23, %v361_v22 }
 0x123   : > { %1038 = vst.msk [vmem:[#allocation2 + $0x28] sm:$0xff] %vm1032_vm1, %v1021_v24 }
 0x124   : > { %v942_v26 = vpop.f32.mrf.mxu2  ;;  %v846_v29 = vpop.f32.mrf.mxu0 }
 0x125   : > { %v991_v27 = vpop.f32.mrf.mxu3  ;;  %v943_v28 = vadd.f32 %v942_v26, %v894_v25  ;;  %v895_v30 = vpop.f32.mrf.mxu1 }
 0x126   : > { %v896_v34 = vadd.f32 %v895_v30, %v846_v29 }
 0x127   : > { %v992_v32 = vadd.f32 %v991_v27, %v943_v28  ;;  %v369_v28 = vld [vmem:[#allocation2 + $0x68] sm:$0xff] }
 0x129   : > { %v1022_v33 = vadd.f32 %v992_v32, %v362_v31 }
 0x12b   : > { %1039 = vst.msk [vmem:[#allocation2 + $0x30] sm:$0xff] %vm1032_vm1, %v1022_v33 }
 0x12c   : > { %v944_v35 = vpop.f32.mrf.mxu2  ;;  %v849_v38 = vpop.f32.mrf.mxu0 }
 0x12d   : > { %v993_v36 = vpop.f32.mrf.mxu3  ;;  %v945_v37 = vadd.f32 %v944_v35, %v896_v34  ;;  %v898_v39 = vpop.f32.mrf.mxu1 }
 0x12e   : > { %v899_v43 = vadd.f32 %v898_v39, %v849_v38 }
 0x12f   : > { %v994_v41 = vadd.f32 %v993_v36, %v945_v37  ;;  %v370_v37 = vld [vmem:[#allocation2 + $0x70] sm:$0xff] }
 0x131   : > { %v1023_v42 = vadd.f32 %v994_v41, %v363_v40 }
 0x133   : > { %1040 = vst.msk [vmem:[#allocation2 + $0x38] sm:$0xff] %vm1032_vm1, %v1023_v42 }
 0x134   : > { %v947_v44 = vpop.f32.mrf.mxu2  ;;  %v851_v47 = vpop.f32.mrf.mxu0 }
 0x135   : > { %v996_v45 = vpop.f32.mrf.mxu3  ;;  %v948_v46 = vadd.f32 %v947_v44, %v899_v43  ;;  %v900_v48 = vpop.f32.mrf.mxu1 }
 0x136   : > { %v901_v52 = vadd.f32 %v900_v48, %v851_v47 }
 0x137   : > { %v997_v50 = vadd.f32 %v996_v45, %v948_v46  ;;  %v371_v45 = vld [vmem:[#allocation2 + $0x78] sm:$0xff] }
 0x139   : > { %v1024_v51 = vadd.f32 %v997_v50, %v364_v49 }
 0x13b   : > { %1041 = vst.msk [vmem:[#allocation2 + $0x40] sm:$0xff] %vm1032_vm1, %v1024_v51 }
 0x13c   : > { %v949_v53 = vpop.f32.mrf.mxu2  ;;  %v854_v56 = vpop.f32.mrf.mxu0 }
 0x13d   : > { %v998_v54 = vpop.f32.mrf.mxu3  ;;  %v950_v55 = vadd.f32 %v949_v53, %v901_v52  ;;  %v903_v57 = vpop.f32.mrf.mxu1 }
 0x13e   : > { %v904_v61 = vadd.f32 %v903_v57, %v854_v56 }
 0x13f   : > { %v999_v59 = vadd.f32 %v998_v54, %v950_v55 }
 0x141   : > { %v1025_v60 = vadd.f32 %v999_v59, %v365_v58 }
 0x143   : > { %1042 = vst.msk [vmem:[#allocation2 + $0x48] sm:$0xff] %vm1032_vm1, %v1025_v60 }
 0x144   : > { %v952_v62 = vpop.f32.mrf.mxu2  ;;  %v856_v1 = vpop.f32.mrf.mxu0 }
 0x145   : > { %v1001_v63 = vpop.f32.mrf.mxu3  ;;  %v953_v0 = vadd.f32 %v952_v62, %v904_v61  ;;  %v905_v2 = vpop.f32.mrf.mxu1 }
 0x146   : > { %v906_v6 = vadd.f32 %v905_v2, %v856_v1 }
 0x147   : > { %v1002_v4 = vadd.f32 %v1001_v63, %v953_v0 }
 0x149   : > { %v1026_v5 = vadd.f32 %v1002_v4, %v366_v3 }
 0x14b   : > { %1043 = vst.msk [vmem:[#allocation2 + $0x50] sm:$0xff] %vm1032_vm1, %v1026_v5 }
 0x14c   : > { %v954_v7 = vpop.f32.mrf.mxu2  ;;  %v859_v10 = vpop.f32.mrf.mxu0 }
 0x14d   : > { %v1003_v8 = vpop.f32.mrf.mxu3  ;;  %v955_v9 = vadd.f32 %v954_v7, %v906_v6  ;;  %v908_v11 = vpop.f32.mrf.mxu1 }
 0x14e   : > { %v909_v15 = vadd.f32 %v908_v11, %v859_v10 }
 0x14f   : > { %v1004_v13 = vadd.f32 %v1003_v8, %v955_v9 }
 0x151   : > { %v1027_v14 = vadd.f32 %v1004_v13, %v367_v12 }
 0x153   : > { %1044 = vst.msk [vmem:[#allocation2 + $0x58] sm:$0xff] %vm1032_vm1, %v1027_v14 }
 0x154   : > { %v957_v16 = vpop.f32.mrf.mxu2  ;;  %v861_v19 = vpop.f32.mrf.mxu0 }
 0x155   : > { %v1006_v17 = vpop.f32.mrf.mxu3  ;;  %v958_v18 = vadd.f32 %v957_v16, %v909_v15  ;;  %v910_v20 = vpop.f32.mrf.mxu1 }
 0x156   : > { %v911_v24 = vadd.f32 %v910_v20, %v861_v19 }
 0x157   : > { %v1007_v22 = vadd.f32 %v1006_v17, %v958_v18 }
 0x159   : > { %v1028_v23 = vadd.f32 %v1007_v22, %v368_v21 }
 0x15b   : > { %1045 = vst.msk [vmem:[#allocation2 + $0x60] sm:$0xff] %vm1032_vm1, %v1028_v23 }
 0x15c   : > { %v959_v25 = vpop.f32.mrf.mxu2  ;;  %v864_v29 = vpop.f32.mrf.mxu0 }
 0x15d   : > { %v1008_v26 = vpop.f32.mrf.mxu3  ;;  %v960_v27 = vadd.f32 %v959_v25, %v911_v24  ;;  %v913_v30 = vpop.f32.mrf.mxu1 }
 0x15e   : > { %v914_v33 = vadd.f32 %v913_v30, %v864_v29 }
 0x15f   : > { %v1009_v31 = vadd.f32 %v1008_v26, %v960_v27 }
 0x161   : > { %v1029_v32 = vadd.f32 %v1009_v31, %v369_v28 }
 0x163   : > { %1046 = vst.msk [vmem:[#allocation2 + $0x68] sm:$0xff] %vm1032_vm1, %v1029_v32 }
 0x164   : > { %v962_v34 = vpop.f32.mrf.mxu2  ;;  %v866_v39 = vpop.f32.mrf.mxu0 }
 0x165   : > { %v1011_v35 = vpop.f32.mrf.mxu3  ;;  %v963_v36 = vadd.f32 %v962_v34, %v914_v33  ;;  %v915_v40 = vpop.f32.mrf.mxu1 }
 0x166   : > { %v916_v42 = vadd.f32 %v915_v40, %v866_v39 }
 0x167   : > { %v1012_v38 = vadd.f32 %v1011_v35, %v963_v36 }
 0x169   : > { %v1030_v41 = vadd.f32 %v1012_v38, %v370_v37 }
 0x16b   : > { %1047 = vst.msk [vmem:[#allocation2 + $0x70] sm:$0xff] %vm1032_vm1, %v1030_v41 }
 0x16c   : > { %v964_v43 = vpop.f32.mrf.mxu2 }
 0x16d   : > { %v965_v44 = vadd.f32 %v964_v43, %v916_v42  ;;  %v1013_v46 = vpop.f32.mrf.mxu3 }
 0x16f   : > { %v1014_v47 = vadd.f32 %v1013_v46, %v965_v44  ;;  %1052 = sbr.rel (%p1517_p11) target bundleno = 396 (0x18c), region = 63 }
 0x171   : > { %v1031_v48 = vadd.f32 %v1014_v47, %v371_v45 }
 0x173   : > { %1048 = vst.msk [vmem:[#allocation2 + $0x78] sm:$0xff] %vm1032_vm1, %v1031_v48 }
 0x174   : > { %v1053_v49 = vld [vmem:[#allocation2] sm:$0xff]  ;;  %v1054_v51 = vld [vmem:[#allocation2 + $0x8] sm:$0xff]  ;;  %v1055_v52 = vld [vmem:[#allocation2 + $0x10] sm:$0xff]  ;;  %vm1121_vm2 = vcmask 519168  }
 0x175   : > { %v1628_v50 = vld [vmem:[%s2026_s2] ss:$0 sm:$0xff]  ;;  %v1056_v53 = vld [vmem:[#allocation2 + $0x18] sm:$0xff]  ;;  %v1058_v59 = vld [vmem:[#allocation2 + $0x28] sm:$0xff] }
 0x176   : > { %v1073_v54 = vadd.f32 %v1628_v50, %v1053_v49  ;;  %v1074_v55 = vadd.f32 %v1628_v50, %v1054_v51  ;;  %v1075_v56 = vadd.f32 %v1628_v50, %v1055_v52  ;;  %v1076_v57 = vadd.f32 %v1628_v50, %v1056_v53  ;;  %v1057_v58 = vld [vmem:[#allocation2 + $0x20] sm:$0xff]  ;;  %v1059_v60 = vld [vmem:[#allocation2 + $0x30] sm:$0xff]  ;;  %v1060_v0 = vld [vmem:[#allocation2 + $0x38] sm:$0xff] }
 0x177   : > { %v1077_v61 = vadd.f32 %v1628_v50, %v1057_v58  ;;  %v1078_v62 = vadd.f32 %v1628_v50, %v1058_v59  ;;  %v1079_v63 = vadd.f32 %v1628_v50, %v1059_v60  ;;  %v1061_v5 = vld [vmem:[#allocation2 + $0x40] sm:$0xff]  ;;  %v1080_v9 = vadd.f32 %v1628_v50, %v1060_v0  ;;  %v1062_v10 = vld [vmem:[#allocation2 + $0x48] sm:$0xff]  ;;  %v1063_v11 = vld [vmem:[#allocation2 + $0x50] sm:$0xff] }
 0x178   : > { %v1089_v1 = vmax.f32 %v1073_v54, 0.0  ;;  %v1090_v2 = vmax.f32 %v1074_v55, 0.0  ;;  %v1091_v3 = vmax.f32 %v1075_v56, 0.0  ;;  %v1092_v4 = vmax.f32 %v1076_v57, 0.0  ;;  %v1064_v12 = vld [vmem:[#allocation2 + $0x58] sm:$0xff]  ;;  %v1065_v16 = vld [vmem:[#allocation2 + $0x60] sm:$0xff] }
 0x179   : > { %v1093_v6 = vmax.f32 %v1077_v61, 0.0  ;;  %v1094_v7 = vmax.f32 %v1078_v62, 0.0  ;;  %v1095_v8 = vmax.f32 %v1079_v63, 0.0  ;;  %v1066_v17 = vld [vmem:[#allocation2 + $0x68] sm:$0xff]  ;;  %v1096_v20 = vmax.f32 %v1080_v9, 0.0  ;;  %v1067_v21 = vld [vmem:[#allocation2 + $0x70] sm:$0xff] }
 0x17a   : > { %v1105_v13 = vpack.c.bf16 %v1089_v1, %v1089_v1  ;;  %v1106_v14 = vpack.c.bf16 %v1090_v2, %v1090_v2  ;;  %v1107_v15 = vpack.c.bf16 %v1091_v3, %v1091_v3  ;;  %v1108_v18 = vpack.c.bf16 %v1092_v4, %v1092_v4  ;;  %v1068_v26 = vld [vmem:[#allocation2 + $0x78] sm:$0xff] }
 0x17b   : > { %v1109_v19 = vpack.c.bf16 %v1093_v6, %v1093_v6  ;;  %v1081_v22 = vadd.f32 %v1628_v50, %v1061_v5  ;;  %v1082_v23 = vadd.f32 %v1628_v50, %v1062_v10  ;;  %v1083_v24 = vadd.f32 %v1628_v50, %v1063_v11 }
 0x17c   : > { %1122 = vst.msk [vmem:[%s2027_s3] sm:$0xf] %vm1121_vm2, %v1105_v13  ;;  %v1084_v25 = vadd.f32 %v1628_v50, %v1064_v12  ;;  %v1110_v27 = vpack.c.bf16 %v1094_v7, %v1094_v7  ;;  %v1111_v28 = vpack.c.bf16 %v1095_v8, %v1095_v8  ;;  %v1085_v29 = vadd.f32 %v1628_v50, %v1065_v16 }
 0x17d   : > { %1123 = vst.msk [vmem:[%s2027_s3 + $0x4] sm:$0xf] %vm1121_vm2, %v1106_v14  ;;  %v1086_v30 = vadd.f32 %v1628_v50, %v1066_v17  ;;  %v1097_v31 = vmax.f32 %v1081_v22, 0.0  ;;  %v1098_v32 = vmax.f32 %v1082_v23, 0.0  ;;  %v1099_v33 = vmax.f32 %v1083_v24, 0.0 }
 0x17e   : > { %1124 = vst.msk [vmem:[%s2027_s3 + $0x8] sm:$0xf] %vm1121_vm2, %v1107_v15  ;;  %v1087_v34 = vadd.f32 %v1628_v50, %v1067_v21  ;;  %v1112_v35 = vpack.c.bf16 %v1096_v20, %v1096_v20  ;;  %v1100_v36 = vmax.f32 %v1084_v25, 0.0  ;;  %v1088_v37 = vadd.f32 %v1628_v50, %v1068_v26 }
 0x17f   : > { %1125 = vst.msk [vmem:[%s2027_s3 + $0xc] sm:$0xf] %vm1121_vm2, %v1108_v18  ;;  %v1113_v38 = vpack.c.bf16 %v1097_v31, %v1097_v31  ;;  %v1101_v39 = vmax.f32 %v1085_v29, 0.0  ;;  %v1114_v40 = vpack.c.bf16 %v1098_v32, %v1098_v32  ;;  %v1102_v41 = vmax.f32 %v1086_v30, 0.0 }
 0x180   : > { %1126 = vst.msk [vmem:[%s2027_s3 + $0x10] sm:$0xf] %vm1121_vm2, %v1109_v19  ;;  %v1115_v42 = vpack.c.bf16 %v1099_v33, %v1099_v33  ;;  %v1103_v43 = vmax.f32 %v1087_v34, 0.0  ;;  %v1116_v44 = vpack.c.bf16 %v1100_v36, %v1100_v36  ;;  %v1104_v45 = vmax.f32 %v1088_v37, 0.0 }
 0x181   : > { %1127 = vst.msk [vmem:[%s2027_s3 + $0x14] sm:$0xf] %vm1121_vm2, %v1110_v27  ;;  %v1117_v46 = vpack.c.bf16 %v1101_v39, %v1101_v39  ;;  %v1118_v47 = vpack.c.bf16 %v1102_v41, %v1102_v41 }
 0x182   : > { %1128 = vst.msk [vmem:[%s2027_s3 + $0x18] sm:$0xf] %vm1121_vm2, %v1111_v28  ;;  %v1119_v48 = vpack.c.bf16 %v1103_v43, %v1103_v43  ;;  %v1120_v49 = vpack.c.bf16 %v1104_v45, %v1104_v45 }
 0x183   : > { %1129 = vst.msk [vmem:[%s2027_s3 + $0x1c] sm:$0xf] %vm1121_vm2, %v1112_v35 }
 0x184   : > { %1130 = vst.msk [vmem:[%s2027_s3 + $0x20] sm:$0xf] %vm1121_vm2, %v1113_v38 }
 0x185   : > { %1131 = vst.msk [vmem:[%s2027_s3 + $0x24] sm:$0xf] %vm1121_vm2, %v1114_v40 }
 0x186   : > { %1132 = vst.msk [vmem:[%s2027_s3 + $0x28] sm:$0xf] %vm1121_vm2, %v1115_v42 }
 0x187   : > { %1133 = vst.msk [vmem:[%s2027_s3 + $0x2c] sm:$0xf] %vm1121_vm2, %v1116_v44 }
 0x188   : > { %1134 = vst.msk [vmem:[%s2027_s3 + $0x30] sm:$0xf] %vm1121_vm2, %v1117_v46 }
 0x189   : > { %1135 = vst.msk [vmem:[%s2027_s3 + $0x34] sm:$0xf] %vm1121_vm2, %v1118_v47 }
 0x18a   : > { %1136 = vst.msk [vmem:[%s2027_s3 + $0x38] sm:$0xf] %vm1121_vm2, %v1119_v48 }
 0x18b   : > { %1137 = vst.msk [vmem:[%s2027_s3 + $0x3c] sm:$0xf] %vm1121_vm2, %v1120_v49 }
 0x18c PF: > { %s13_s16 = sadd.s32 1, %s1667_s16   ;;  %s2028_s12 = smov %s1655_s13 }
 0x18d   : > { %p10_p12 = scmp.ge.s32.totalorder %s13_s16, 6   ;;  %s2029_s13 = smov %s1725_s20 }
 0x18e   : > { %s2030_s14 = smov %s1663_s15  ;;  %s2031_s15 = smov %s2033_s17 }
 0x18f   :  { %12 = sbr.rel (!%p10_p12) target bundleno = 3 (0x3), region = 104 }

// kernel: alexnet_forward.12
= control target key start
LH: loop header
LB: loop body
LE: loop exit
PB: predicated region body
PF: predicated region fallthrough
CT: control target
= control target key end

     0   :  { %s569_s15 = smov 0   ;;  %s629_s0 = inlined_call_operand.vmem [shape: bf16[2,4,4,64], index: 0, kind: input, shape index: {}]   ;;  %s630_s1 = inlined_call_operand.vmem [shape: bf16[2,4,4,64], index: 1, kind: input, shape index: {}]   ;;  %s631_s2 = inlined_call_operand.vmem [shape: bf16[2,4,4,64], index: 2, kind: input, shape index: {}]   ;;  %s632_s3 = inlined_call_operand.vmem [shape: bf16[2,4,4,64], index: 3, kind: input, shape index: {}]   ;;  %s633_s4 = inlined_call_operand.vmem [shape: bf16[2,3,3,64], index: 4, kind: output, shape index: {}]  }
   0x1 LB: > { %s507_s16 = sadd.s32 4294967295, %s542_s15   ;;  %p511_p0 = scmp.ge.s32.totalorder %s542_s15, 1  ;;  %s542_s15 = sphi %s569_s15, %s14_s15  }
   0x2   : > { %p192_p1 = scmp.lt.s32.totalorder %s542_s15, 3 }
   0x4   : > { %p193_p2 = pnand %p511_p0, %p192_p1 }
   0x5   : > { %p233_p3 = scmp.lt.s32.totalorder (!%p193_p2), %s507_s16, 1 }
   0x6   : > { %196 = sbr.rel (%p193_p2) target bundleno = 51 (0x33), region = 36 }
   0xb   : > { %s635_s16 = smov (!%p233_p3, %s507_s16), 1  ;;  %vm404_vm0 = vcmask 517120   ;;  %vm405_vm1 = vsmask.f32 1280 }
   0xc   : > { %s523_s17 = sshll.u32 %s635_s16, 3  ;;  %s527_s30 = smul.u32 6, %s635_s16  ;;  %vm406_vm2 = vmand %vm404_vm0, %vm405_vm1 }
   0xd   : > { %s583_s20 = scalar_lea.vmem %s629_s0, %s523_s17  ;;  %s588_s23 = scalar_lea.vmem %s630_s1, %s523_s17 }
   0xe   : > { %v258_v0 = vld [vmem:[%s583_s20] sm:$0x3]  ;;  %v259_v1 = vld [vmem:[%s583_s20 + $0x2] sm:$0x3]  ;;  %v260_v4 = vld [vmem:[%s583_s20 + $0x4] sm:$0x3]  ;;  %s247_s26 = scalar_lea.vmem %s631_s2, %s523_s17  ;;  %s252_s29 = scalar_lea.vmem %s632_s3, %s523_s17 }
   0xf   : > { %v272_v2 = vunpack.c.l.bf16 %v258_v0  ;;  %v592_v3 = vunpack.c.l.bf16 %v259_v1  ;;  %v262_v5 = vld [vmem:[%s588_s23] sm:$0x3]  ;;  %v599_v6 = vunpack.c.l.bf16 %v260_v4  ;;  %v602_v7 = vld [vmem:[%s588_s23 + $0x2] sm:$0x3]  ;;  %v606_v9 = vld [vmem:[%s588_s23 + $0x4] sm:$0x3]  ;;  %s257_s7 = scalar_lea.vmem %s633_s4, %s527_s30 }
  0x10   : > { %v266_v8 = vld [vmem:[%s247_s26] sm:$0x3]  ;;  %v275_v10 = vunpack.c.l.bf16 %v262_v5  ;;  %v267_v11 = vld [vmem:[%s247_s26 + $0x2] sm:$0x3]  ;;  %v276_v12 = vunpack.c.l.bf16 %v602_v7  ;;  %v268_v13 = vld [vmem:[%s247_s26 + $0x4] sm:$0x3]  ;;  %v277_v15 = vunpack.c.l.bf16 %v606_v9 }
  0x11   : > { %290 = vst [vmem:[#allocation1] ss:$2 sm:$0xff] %v272_v2  ;;  %v313_v14 = vunpack.c.l.bf16 %v266_v8  ;;  %v314_v16 = vunpack.c.l.bf16 %v267_v11  ;;  %v315_v18 = vunpack.c.l.bf16 %v268_v13  ;;  %v269_v19 = vld [vmem:[%s252_s29] sm:$0x3]  ;;  %v270_v28 = vld [vmem:[%s252_s29 + $0x2] sm:$0x3] }
  0x12   : > { %293 = vst [vmem:[#allocation1 + $0x10] ss:$2 sm:$0xff] %v592_v3  ;;  %v278_v17 = vmax.f32 %v272_v2, %v275_v10  ;;  %v279_v21 = vmax.f32 %v592_v3, %v276_v12  ;;  %v280_v24 = vmax.f32 %v599_v6, %v277_v15  ;;  %v271_v31 = vld [vmem:[%s252_s29 + $0x4] sm:$0x3]  ;;  %v261_v32 = vld [vmem:[%s583_s20 + $0x6] sm:$0x3]  ;;  %v325_v34 = vunpack.c.l.bf16 %v269_v19 }
  0x13   : > { %296 = vst [vmem:[#allocation1 + $0x20] ss:$2 sm:$0xff] %v599_v6  ;;  %v326_v37 = vunpack.c.l.bf16 %v270_v28  ;;  %v327_v39 = vunpack.c.l.bf16 %v271_v31  ;;  %v363_v40 = vunpack.c.l.bf16 %v261_v32  ;;  %v265_v52 = vld [vmem:[%s588_s23 + $0x6] sm:$0x3]  ;;  %v407_v4 = vld [vmem:[%s257_s7] sm:$0x3] }
  0x14   : > { %v373_v57 = vunpack.c.l.bf16 %v265_v52  ;;  %v410_v7 = vld [vmem:[%s257_s7 + $0x2] sm:$0x3]  ;;  %v413_v10 = vld [vmem:[%s257_s7 + $0x4] sm:$0x3] }
  0x18   : > { %v291_v20 = vld.sshfl [vmem:[#allocation1] sm:$0xff pattern:$0x75316420] }
  0x19   : > { %v298_v22 = vrot.slane %v291_v20, 1  ;;  %340 = vst [vmem:[#allocation1] ss:$2 sm:$0xff] %v313_v14  ;;  %v294_v23 = vld.sshfl [vmem:[#allocation1 + $0x10] sm:$0xff pattern:$0x75316420] }
  0x1a   : > { %v299_v25 = vrot.slane %v294_v23, 1  ;;  %343 = vst [vmem:[#allocation1 + $0x10] ss:$2 sm:$0xff] %v314_v16  ;;  %v297_v26 = vld.sshfl [vmem:[#allocation1 + $0x20] sm:$0xff pattern:$0x75316420] }
  0x1b   : > { %v304_v27 = vmax.f32 %v278_v17, %v298_v22  ;;  %v300_v29 = vrot.slane %v297_v26, 1  ;;  %346 = vst [vmem:[#allocation1 + $0x20] ss:$2 sm:$0xff] %v315_v18 }
  0x1c   : > { %v305_v30 = vmax.f32 %v279_v21, %v299_v25 }
  0x1d   : > { %v316_v33 = vmax.f32 %v304_v27, %v313_v14  ;;  %v306_v35 = vmax.f32 %v280_v24, %v300_v29 }
  0x1e   : > { %v317_v36 = vmax.f32 %v305_v30, %v314_v16 }
  0x1f   : > { %v318_v38 = vmax.f32 %v306_v35, %v315_v18  ;;  %v328_v42 = vmax.f32 %v316_v33, %v325_v34 }
  0x20   : > { %v341_v41 = vld.sshfl [vmem:[#allocation1] sm:$0xff pattern:$0x75316420]  ;;  %v329_v45 = vmax.f32 %v317_v36, %v326_v37 }
  0x21   : > { %v348_v43 = vrot.slane %v341_v41, 1  ;;  %384 = vst [vmem:[#allocation1] ss:$2 sm:$0xff] %v592_v3  ;;  %v344_v44 = vld.sshfl [vmem:[#allocation1 + $0x10] sm:$0xff pattern:$0x75316420]  ;;  %v330_v48 = vmax.f32 %v318_v38, %v327_v39 }
  0x22   : > { %v349_v46 = vrot.slane %v344_v44, 1  ;;  %387 = vst [vmem:[#allocation1 + $0x10] ss:$2 sm:$0xff] %v599_v6  ;;  %v347_v47 = vld.sshfl [vmem:[#allocation1 + $0x20] sm:$0xff pattern:$0x75316420] }
  0x23   : > { %v354_v49 = vmax.f32 %v328_v42, %v348_v43  ;;  %v350_v50 = vrot.slane %v347_v47, 1  ;;  %390 = vst [vmem:[#allocation1 + $0x20] ss:$2 sm:$0xff] %v363_v40 }
  0x24   : > { %v355_v51 = vmax.f32 %v329_v45, %v349_v46 }
  0x25   : > { %v364_v53 = vmax.f32 %v354_v49, %v592_v3  ;;  %v356_v54 = vmax.f32 %v330_v48, %v350_v50 }
  0x26   : > { %v365_v55 = vmax.f32 %v355_v51, %v599_v6 }
  0x27   : > { %v366_v56 = vmax.f32 %v356_v54, %v363_v40  ;;  %v374_v59 = vmax.f32 %v364_v53, %v276_v12 }
  0x28   : > { %v385_v58 = vld.sshfl [vmem:[#allocation1] sm:$0xff pattern:$0x75316420]  ;;  %v375_v62 = vmax.f32 %v365_v55, %v277_v15 }
  0x29   : > { %v392_v60 = vrot.slane %v385_v58, 1  ;;  %v388_v61 = vld.sshfl [vmem:[#allocation1 + $0x10] sm:$0xff pattern:$0x75316420]  ;;  %v376_v2 = vmax.f32 %v366_v56, %v373_v57 }
  0x2a   : > { %v393_v63 = vrot.slane %v388_v61, 1  ;;  %v391_v0 = vld.sshfl [vmem:[#allocation1 + $0x20] sm:$0xff pattern:$0x75316420] }
  0x2b   : > { %v398_v1 = vmax.f32 %v374_v59, %v392_v60  ;;  %v394_v3 = vrot.slane %v391_v0, 1 }
  0x2c   : > { %v399_v5 = vmax.f32 %v375_v62, %v393_v63 }
  0x2d   : > { %v401_v6 = vpack.c.bf16 %v398_v1, %v398_v1  ;;  %v400_v8 = vmax.f32 %v376_v2, %v394_v3 }
  0x2e   : > { %v402_v9 = vpack.c.bf16 %v399_v5, %v399_v5 }
  0x2f   : > { %v408_v11 = vsel %vm406_vm2, %v401_v6, %v407_v4  ;;  %v403_v13 = vpack.c.bf16 %v400_v8, %v400_v8 }
  0x30   : > { %409 = vst [vmem:[%s257_s7] sm:$0x3] %v408_v11  ;;  %v411_v12 = vsel %vm406_vm2, %v402_v9, %v410_v7 }
  0x31   : > { %412 = vst [vmem:[%s257_s7 + $0x2] sm:$0x3] %v411_v12  ;;  %v414_v14 = vsel %vm406_vm2, %v403_v13, %v413_v10 }
  0x32   : > { %415 = vst [vmem:[%s257_s7 + $0x4] sm:$0x3] %v414_v14 }
  0x33 PF: > { %s14_s15 = sadd.s32 1, %s542_s15  }
  0x34   : > { %p11_p4 = scmp.ge.s32.totalorder %s14_s15, 4  }
  0x36   :  { %13 = sbr.rel (!%p11_p4) target bundleno = 1 (0x1), region = 81 }

// kernel: alexnet_forward.13
= control target key start
LH: loop header
LB: loop body
LE: loop exit
PB: predicated region body
PF: predicated region fallthrough
CT: control target
= control target key end

     0   :  { %vm19_vm0 = vcmask 523264   ;;  %vm22_vm1 = vcmask 517120   ;;  %vm489_vm2 = vcmask 519168   ;;  %vm492_vm3 = vcmask 516096   ;;  %s899_s1 = inlined_call_operand.vmem [shape: bf16[576,64], index: 1, kind: input, shape index: {}]   ;;  %s900_s0 = inlined_call_operand.vmem [shape: bf16[18,576], index: 0, kind: input, shape index: {}]   ;;  %s901_s2 = inlined_call_operand.vmem [shape: f32[1,64], index: 2, kind: input, shape index: {}]   ;;  %s902_s3 = inlined_call_operand.vmem [shape: bf16[18,64], index: 3, kind: output, shape index: {}]  }
   0x1   :  { %v676_v0 = vld [vmem:[%s899_s1 + $0x38] sm:$0xff]  ;;  %v675_v4 = vld [vmem:[%s899_s1 + $0x30] sm:$0xff]  ;;  %v674_v8 = vld [vmem:[%s899_s1 + $0x28] sm:$0xff] }
   0x2   :  { %v684_v1 = vld [vmem:[%s899_s1 + $0x78] sm:$0xff]  ;;  %373 = vmatpush.bf16.msra.mxu0 %v676_v0  ;;  %v683_v5 = vld [vmem:[%s899_s1 + $0x70] sm:$0xff]  ;;  %v682_v9 = vld [vmem:[%s899_s1 + $0x68] sm:$0xff]  ;;  %v711_v0 = vmov 0.0  }
   0x3   :  { %v692_v2 = vld [vmem:[%s899_s1 + $0xb8] sm:$0xff]  ;;  %391 = vmatpush.bf16.msra.mxu1 %v684_v1  ;;  %v691_v6 = vld [vmem:[%s899_s1 + $0xb0] sm:$0xff]  ;;  %v690_v10 = vld [vmem:[%s899_s1 + $0xa8] sm:$0xff]  ;;  %20 = vst.msk [vmem:[#allocation2] sm:$0xff] %vm19_vm0, %v711_v0 }
   0x4   :  { %v700_v3 = vld [vmem:[%s899_s1 + $0xf8] sm:$0xff]  ;;  %409 = vmatpush.bf16.msra.mxu2 %v692_v2  ;;  %v699_v7 = vld [vmem:[%s899_s1 + $0xf0] sm:$0xff]  ;;  %v698_v11 = vld [vmem:[%s899_s1 + $0xe8] sm:$0xff]  ;;  %21 = vst.msk [vmem:[#allocation2 + $0x8] sm:$0xff] %vm19_vm0, %v711_v0 }
   0x5   :  { %427 = vmatpush.bf16.msra.mxu3 %v700_v3  ;;  %v673_v12 = vld [vmem:[%s899_s1 + $0x20] sm:$0xff]  ;;  %v672_v16 = vld [vmem:[%s899_s1 + $0x18] sm:$0xff]  ;;  %v671_v20 = vld [vmem:[%s899_s1 + $0x10] sm:$0xff]  ;;  %23 = vst.msk [vmem:[#allocation2 + $0x10] sm:$0x3] %vm22_vm1, %v711_v0 }
   0x6   :  { %374 = vmatpush.bf16.msra.mxu0 %v675_v4  ;;  %v681_v13 = vld [vmem:[%s899_s1 + $0x60] sm:$0xff]  ;;  %v680_v17 = vld [vmem:[%s899_s1 + $0x58] sm:$0xff]  ;;  %v679_v21 = vld [vmem:[%s899_s1 + $0x50] sm:$0xff] }
   0x7   :  { %392 = vmatpush.bf16.msra.mxu1 %v683_v5  ;;  %v689_v14 = vld [vmem:[%s899_s1 + $0xa0] sm:$0xff]  ;;  %v688_v18 = vld [vmem:[%s899_s1 + $0x98] sm:$0xff]  ;;  %v687_v22 = vld [vmem:[%s899_s1 + $0x90] sm:$0xff] }
   0x8   :  { %410 = vmatpush.bf16.msra.mxu2 %v691_v6  ;;  %v697_v15 = vld [vmem:[%s899_s1 + $0xe0] sm:$0xff]  ;;  %v696_v19 = vld [vmem:[%s899_s1 + $0xd8] sm:$0xff]  ;;  %v695_v23 = vld [vmem:[%s899_s1 + $0xd0] sm:$0xff] }
   0x9   :  { %428 = vmatpush.bf16.msra.mxu3 %v699_v7  ;;  %v670_v24 = vld [vmem:[%s899_s1 + $0x8] sm:$0xff]  ;;  %v669_v28 = vld [vmem:[%s899_s1] sm:$0xff]  ;;  %v666_v33 = vld [vmem:[%s900_s0 + $0x10] sm:$0xf0] }
   0xa   :  { %375 = vmatpush.bf16.msra.mxu0 %v674_v8  ;;  %v678_v25 = vld [vmem:[%s899_s1 + $0x48] sm:$0xff]  ;;  %v677_v29 = vld [vmem:[%s899_s1 + $0x40] sm:$0xff]  ;;  %v502_v35 = vld [vmem:[%s900_s0 + $0x14] sm:$0xf0] }
   0xb   :  { %393 = vmatpush.bf16.msra.mxu1 %v682_v9  ;;  %v686_v26 = vld [vmem:[%s899_s1 + $0x88] sm:$0xff]  ;;  %v685_v30 = vld [vmem:[%s899_s1 + $0x80] sm:$0xff]  ;;  %v667_v37 = vld [vmem:[%s900_s0 + $0x18] sm:$0xf0] }
   0xc   :  { %411 = vmatpush.bf16.msra.mxu2 %v690_v10  ;;  %v694_v27 = vld [vmem:[%s899_s1 + $0xc8] sm:$0xff]  ;;  %v693_v31 = vld [vmem:[%s899_s1 + $0xc0] sm:$0xff]  ;;  %v704_v40 = vld [vmem:[%s899_s1 + $0x118] sm:$0xff] }
   0xd   :  { %429 = vmatpush.bf16.msra.mxu3 %v698_v11  ;;  %v500_v32 = vld [vmem:[%s900_s0] sm:$0xf]  ;;  %v664_v34 = vld [vmem:[%s900_s0 + $0x4] sm:$0xf]  ;;  %v508_v36 = vld [vmem:[%s900_s0 + $0x8] sm:$0xf] }
   0xe   :  { %376 = vmatpush.bf16.msra.mxu0 %v673_v12  ;;  %v665_v38 = vld [vmem:[%s900_s0 + $0xc] sm:$0xf]  ;;  %v510_v39 = vld [vmem:[%s900_s0 + $0x1c] sm:$0xf0]  ;;  %v501_v41 = vor.u32 %v666_v33, %v500_v32  ;;  %v505_v42 = vor.u32 %v664_v34, %v502_v35  ;;  %v509_v43 = vor.u32 %v667_v37, %v508_v36  ;;  %v703_v45 = vld [vmem:[%s899_s1 + $0x110] sm:$0xff] }
   0xf   :  { %394 = vmatpush.bf16.msra.mxu1 %v681_v13  ;;  %v513_v44 = vor.u32 %v665_v38, %v510_v39  ;;  %v702_v46 = vld [vmem:[%s899_s1 + $0x108] sm:$0xff]  ;;  %v34_v48 = vld [vmem:[%s900_s0 + $0x30] sm:$0x11]  ;;  %v701_v49 = vld [vmem:[%s899_s1 + $0x100] sm:$0xff] }
  0x10   :  { %412 = vmatpush.bf16.msra.mxu2 %v689_v14  ;;  %v33_v47 = vld [vmem:[%s900_s0 + $0x28] sm:$0x11]  ;;  %v129_v52 = vunpack.c.l.b16 %v34_v48  ;;  %v130_v53 = vunpack.c.h.b16 %v34_v48  ;;  %v35_v58 = vld [vmem:[%s900_s0 + $0x38] sm:$0x1]  ;;  %v516_v60 = vld [vmem:[%s900_s0 + $0x10] sm:$0xf] }
  0x11   :  { %430 = vmatpush.bf16.msra.mxu3 %v697_v15  ;;  %v127_v50 = vunpack.c.l.b16 %v33_v47  ;;  %v128_v51 = vunpack.c.h.b16 %v33_v47  ;;  %v131_v59 = vunpack.c.l.b16 %v35_v58  ;;  %v668_v61 = vld [vmem:[%s900_s0 + $0x20] sm:$0xf0]  ;;  %v25_v34 = vld [vmem:[#allocation2 + $0x8] sm:$0xff]  ;;  %v710_v37 = vld [vmem:[%s901_s2] ss:$0 sm:$0xff] }
  0x12   :  { %377 = vmatpush.bf16.msra.mxu0 %v672_v16  ;;  %v139_v56 = vpack.c.b16 %v129_v52, %v129_v52  ;;  %v140_v57 = vpack.c.b16 %v130_v53, %v130_v53  ;;  %v517_v62 = vor.u32 %v668_v61, %v516_v60 }
  0x13   :  { %395 = vmatpush.bf16.msra.mxu1 %v680_v17  ;;  %v137_v54 = vpack.c.b16 %v127_v50, %v127_v50  ;;  %v138_v55 = vpack.c.b16 %v128_v51, %v128_v51  ;;  %v141_v63 = vpack.c.b16 %v131_v59, %v131_v59 }
  0x14   :  { %413 = vmatpush.bf16.msra.mxu2 %v688_v18 }
  0x15   :  { %431 = vmatpush.bf16.msra.mxu3 %v696_v19 }
  0x16   :  { %378 = vmatpush.bf16.msra.mxu0 %v671_v20 }
  0x17   :  { %396 = vmatpush.bf16.msra.mxu1 %v679_v21 }
  0x18   :  { %414 = vmatpush.bf16.msra.mxu2 %v687_v22 }
  0x19   :  { %432 = vmatpush.bf16.msra.mxu3 %v695_v23  ;;  %v24_v23 = vld [vmem:[#allocation2] sm:$0xff] }
  0x1a   :  { %379 = vmatpush.bf16.msra.mxu0 %v670_v24 }
  0x1b   :  { %397 = vmatpush.bf16.msra.mxu1 %v678_v25  ;;  %v26_v25 = vld [vmem:[#allocation2 + $0x10] sm:$0x3] }
  0x1c   :  { %415 = vmatpush.bf16.msra.mxu2 %v686_v26 }
  0x1d   :  { %433 = vmatpush.bf16.msra.mxu3 %v694_v27 }
  0x1e   :  { %380 = vmatpush.bf16.msra.mxu0 %v669_v28 }
  0x1f   :  { %398 = vmatpush.bf16.msra.mxu1 %v677_v29 }
  0x20   :  { %416 = vmatpush.bf16.msra.mxu2 %v685_v30 }
  0x21   :  { %434 = vmatpush.bf16.msra.mxu3 %v693_v31  ;;  %381 = vmatmul.bf16.vlgmr.msra.gmra.mxu0 %v501_v41 }
  0x22   :  { %449 = vmatpush.bf16.msrb.mxu0 %v704_v40  ;;  %399 = vmatmul.bf16.vlgmr.msra.gmra.mxu1 %v505_v42 }
  0x23   :  { %705 = vmatpush.bf16.msrb.mxu1 %v704_v40  ;;  %417 = vmatmul.bf16.vlgmr.msra.gmra.mxu2 %v509_v43 }
  0x24   :  { %435 = vmatmul.bf16.vlgmr.msra.gmra.mxu3 %v513_v44 }
  0x26   :  { %450 = vmatpush.bf16.msrb.mxu0 %v703_v45 }
  0x27   :  { %706 = vmatpush.bf16.msrb.mxu1 %v703_v45 }
  0x2a   :  { %451 = vmatpush.bf16.msrb.mxu0 %v702_v46 }
  0x2b   :  { %707 = vmatpush.bf16.msrb.mxu1 %v702_v46 }
  0x2e   :  { %452 = vmatpush.bf16.msrb.mxu0 %v701_v49 }
  0x2f   :  { %708 = vmatpush.bf16.msrb.mxu1 %v701_v49 }
  0x31   :  { %386 = vmatmul.bf16.gmra.mxu0 %v137_v54 }
  0x32   :  { %404 = vmatmul.bf16.gmra.mxu1 %v138_v55 }
  0x33   :  { %422 = vmatmul.bf16.gmra.mxu2 %v139_v56 }
  0x34   :  { %440 = vmatmul.bf16.gmra.mxu3 %v140_v57 }
  0x41   :  { %662 = vmatmul.msk.bf16.vlgmr.msrb.gmra.mxu0 %vm19_vm0, %v517_v62 }
  0x42   :  { %663 = vmatmul.msk.bf16.vlgmr.msrb.gmra.mxu1 %vm19_vm0, %v141_v63 }
  0x9e   :  { %v382_v1 = vpop.f32.mrf.mxu0 }
  0x9f   :  { %v400_v2 = vpop.f32.mrf.mxu1 }
  0xa0   :  { %v401_v15 = vadd.f32 %v400_v2, %v382_v1 }
  0xa6   :  { %v418_v3 = vpop.f32.mrf.mxu2  ;;  %v384_v5 = vpop.f32.mrf.mxu0 }
  0xa7   :  { %v436_v4 = vpop.f32.mrf.mxu3  ;;  %v402_v6 = vpop.f32.mrf.mxu1  ;;  %v419_v17 = vadd.f32 %v418_v3, %v401_v15 }
  0xa8   :  { %v403_v27 = vadd.f32 %v402_v6, %v384_v5 }
  0xa9   :  { %v437_v19 = vadd.f32 %v436_v4, %v419_v17 }
  0xae   :  { %v420_v7 = vpop.f32.mrf.mxu2  ;;  %v387_v9 = vpop.f32.mrf.mxu0 }
  0xaf   :  { %v438_v8 = vpop.f32.mrf.mxu3  ;;  %v405_v10 = vpop.f32.mrf.mxu1  ;;  %v421_v30 = vadd.f32 %v420_v7, %v403_v27 }
  0xb0   :  { %v406_v16 = vadd.f32 %v405_v10, %v387_v9 }
  0xb1   :  { %v439_v33 = vadd.f32 %v438_v8, %v421_v30 }
  0xb6   :  { %v423_v11 = vpop.f32.mrf.mxu2  ;;  %v389_v13 = vpop.f32.mrf.mxu0 }
  0xb7   :  { %v441_v12 = vpop.f32.mrf.mxu3  ;;  %v407_v14 = vpop.f32.mrf.mxu1  ;;  %v424_v18 = vadd.f32 %v423_v11, %v406_v16 }
  0xb9   :  { %v442_v20 = vadd.f32 %v441_v12, %v424_v18 }
  0xbe   :  { %v425_v21 = vpop.f32.mrf.mxu2  ;;  %v454_v24 = vpop.f32.mrf.mxu0 }
  0xbf   :  { %v443_v22 = vpop.f32.mrf.mxu3  ;;  %v459_v26 = vpop.f32.mrf.mxu1  ;;  %v455_v28 = vadd.f32 %v454_v24, %v437_v19 }
  0xc0   :  { %v460_v29 = vadd.f32 %v459_v26, %v442_v20 }
  0xc1   :  { %v463_v31 = vadd.f32 %v455_v28, %v24_v23 }
  0xc2   :  { %v465_v32 = vadd.f32 %v460_v29, %v26_v25 }
  0xc3   :  { %466 = vst.msk [vmem:[#allocation2] sm:$0xff] %vm19_vm0, %v463_v31 }
  0xc4   :  { %469 = vst.msk [vmem:[#allocation2 + $0x10] sm:$0x3] %vm22_vm1, %v465_v32 }
  0xc6   :  { %v456_v35 = vpop.f32.mrf.mxu0 }
  0xc7   :  { %v461_v36 = vpop.f32.mrf.mxu1  ;;  %v457_v38 = vadd.f32 %v456_v35, %v439_v33 }
  0xc9   :  { %v464_v39 = vadd.f32 %v457_v38, %v25_v34 }
  0xca   :  { %v473_v40 = vld [vmem:[#allocation2] sm:$0xff] }
  0xcb   :  { %v480_v41 = vadd.f32 %v710_v37, %v473_v40  ;;  %v475_v42 = vld [vmem:[#allocation2 + $0x10] sm:$0x3]  ;;  %467 = vst.msk [vmem:[#allocation2 + $0x8] sm:$0xff] %vm19_vm0, %v464_v39 }
  0xcc   :  { %v482_v43 = vadd.f32 %v710_v37, %v475_v42 }
  0xcd   :  { %v483_v44 = vmax.f32 %v480_v41, 0.0 }
  0xce   :  { %v485_v45 = vmax.f32 %v482_v43, 0.0 }
  0xcf   :  { %v486_v46 = vpack.c.bf16 %v483_v44, %v483_v44 }
  0xd0   :  { %v488_v47 = vpack.c.bf16 %v485_v45, %v485_v45 }
  0xd1   :  { %490 = vst.msk [vmem:[%s902_s3] sm:$0xf] %vm489_vm2, %v486_v46 }
  0xd2   :  { %493 = vst.msk [vmem:[%s902_s3 + $0x8] sm:$0x1] %vm492_vm3, %v488_v47  ;;  %v474_v48 = vld [vmem:[#allocation2 + $0x8] sm:$0xff] }
  0xd3   :  { %v481_v49 = vadd.f32 %v710_v37, %v474_v48 }
  0xd5   :  { %v484_v50 = vmax.f32 %v481_v49, 0.0 }
  0xd7   :  { %v487_v51 = vpack.c.bf16 %v484_v50, %v484_v50 }
  0xd9   :  { %491 = vst.msk [vmem:[%s902_s3 + $0x4] sm:$0xf] %vm489_vm2, %v487_v51 }

// kernel: alexnet_forward.16
= control target key start
LH: loop header
LB: loop body
LE: loop exit
PB: predicated region body
PF: predicated region fallthrough
CT: control target
= control target key end

     0   :  { %s413_s15 = smov 0   ;;  %s439_s0 = inlined_call_operand.vmem [shape: bf16[2,2,2,64], index: 0, kind: input, shape index: {}]   ;;  %s440_s1 = inlined_call_operand.vmem [shape: bf16[2,2,1,64], index: 1, kind: input, shape index: {}]   ;;  %s441_s2 = inlined_call_operand.vmem [shape: bf16[2,1,2,64], index: 2, kind: input, shape index: {}]   ;;  %s442_s3 = inlined_call_operand.vmem [shape: bf16[2,1,1,64], index: 3, kind: input, shape index: {}]   ;;  %s443_s4 = inlined_call_operand.vmem [shape: bf16[2,1,1,64], index: 4, kind: output, shape index: {}]  }
   0x1 LB: > { %s363_s16 = sadd.s32 4294967295, %s386_s15   ;;  %p367_p0 = scmp.ge.s32.totalorder %s386_s15, 1  ;;  %s386_s15 = sphi %s413_s15, %s14_s15  }
   0x2   : > { %p186_p1 = scmp.lt.s32.totalorder %s386_s15, 3 }
   0x4   : > { %p187_p2 = pnand %p367_p0, %p186_p1 }
   0x5   : > { %p219_p3 = scmp.lt.s32.totalorder (!%p187_p2), %s363_s16, 1 }
   0x6   : > { %190 = sbr.rel (%p187_p2) target bundleno = 38 (0x26), region = 36 }
   0xb   : > { %s445_s16 = smov (!%p219_p3, %s363_s16), 1  ;;  %vm280_vm0 = vcmask 516096   ;;  %vm281_vm1 = vsmask.f32 256 }
   0xc   : > { %s368_s17 = sshll.u32 %s445_s16, 1  ;;  %s229_s20 = scalar_lea.vmem %s441_s2, %s445_s16  ;;  %vm282_vm2 = vmand %vm280_vm0, %vm281_vm1 }
   0xd   : > { %s222_s23 = scalar_lea.vmem %s439_s0, %s368_s17  ;;  %s226_s26 = scalar_lea.vmem %s440_s1, %s368_s17  ;;  %v240_v2 = vld [vmem:[%s229_s20] sm:$0x1] }
   0xe   : > { %s232_s29 = scalar_lea.vmem %s442_s3, %s445_s16  ;;  %v236_v0 = vld [vmem:[%s222_s23] sm:$0x1]  ;;  %v253_v8 = vunpack.c.l.bf16 %v240_v2  ;;  %v237_v11 = vld [vmem:[%s222_s23 + $0x1] sm:$0x1]  ;;  %s235_s6 = scalar_lea.vmem %s443_s4, %s445_s16 }
   0xf   : > { %v238_v1 = vld [vmem:[%s226_s26] sm:$0x1]  ;;  %v242_v3 = vunpack.c.l.bf16 %v236_v0  ;;  %v239_v14 = vld [vmem:[%s226_s26 + $0x1] sm:$0x1]  ;;  %v267_v16 = vunpack.c.l.bf16 %v237_v11 }
  0x10   : > { %v243_v4 = vunpack.c.l.bf16 %v238_v1  ;;  %v241_v5 = vld [vmem:[%s232_s29] sm:$0x1]  ;;  %v262_v13 = vperm.slane %v253_v8, 1  ;;  %v271_v18 = vunpack.c.l.bf16 %v239_v14 }
  0x11   : > { %v248_v7 = vperm.slane %v242_v3, 1  ;;  %v257_v10 = vunpack.c.l.bf16 %v241_v5  ;;  %v276_v20 = vperm.slane %v267_v16, 1  ;;  %v283_v23 = vld [vmem:[%s235_s6] sm:$0x1] }
  0x12   : > { %v244_v6 = vmax.f32 %v242_v3, %v243_v4 }
  0x14   : > { %v250_v9 = vmax.f32 %v244_v6, %v248_v7 }
  0x16   : > { %v254_v12 = vmax.f32 %v250_v9, %v253_v8 }
  0x18   : > { %v258_v15 = vmax.f32 %v254_v12, %v257_v10 }
  0x1a   : > { %v264_v17 = vmax.f32 %v258_v15, %v262_v13 }
  0x1c   : > { %v268_v19 = vmax.f32 %v264_v17, %v267_v16 }
  0x1e   : > { %v272_v21 = vmax.f32 %v268_v19, %v271_v18 }
  0x20   : > { %v278_v22 = vmax.f32 %v272_v21, %v276_v20 }
  0x22   : > { %v279_v24 = vpack.c.bf16 %v278_v22, %v278_v22 }
  0x24   : > { %v284_v25 = vsel %vm282_vm2, %v279_v24, %v283_v23 }
  0x25   : > { %285 = vst [vmem:[%s235_s6] sm:$0x1] %v284_v25 }
  0x26 PF: > { %s14_s15 = sadd.s32 1, %s386_s15  }
  0x27   : > { %p11_p4 = scmp.ge.s32.totalorder %s14_s15, 4  }
  0x29   :  { %13 = sbr.rel (!%p11_p4) target bundleno = 1 (0x1), region = 75 }

// kernel: alexnet_forward.17
= control target key start
LH: loop header
LB: loop body
LE: loop exit
PB: predicated region body
PF: predicated region fallthrough
CT: control target
= control target key end

     0   :  { %vm135_vm0 = vcmask 523264   ;;  %s7036_s0 = inlined_call_operand.vmem [shape: bf16[2,64], index: 0, kind: input, shape index: {}]   ;;  %s7037_s1 = inlined_call_operand.vmem [shape: bf16[64,448], index: 1, kind: input, shape index: {}]   ;;  %s7038_s2 = inlined_call_operand.vmem [shape: f32[1,448], index: 2, kind: input, shape index: {}]   ;;  %s7039_s3 = inlined_call_operand.vmem [shape: bf16[448,448], index: 3, kind: input, shape index: {}]   ;;  %s7040_s4 = inlined_call_operand.vmem [shape: f32[1,448], index: 4, kind: input, shape index: {}]   ;;  %s7041_s5 = inlined_call_operand.vmem [shape: bf16[448,1024], index: 5, kind: input, shape index: {}]   ;;  %s7042_s6 = inlined_call_operand.vmem [shape: f32[1,1024], index: 6, kind: input, shape index: {}]   ;;  %s7043_s7 = inlined_call_operand.hbm [shape: f32[2,1024], index: 7, kind: output, shape index: {}]  }
   0x1   :  { %v2974_v0 = vld [vmem:[%s7037_s1 + $0x60] sm:$0xf]  ;;  %v4362_v1 = vld [vmem:[%s7037_s1 + $0x6c] sm:$0xf0]  ;;  %v4360_v2 = vld [vmem:[%s7037_s1 + $0x64] sm:$0xf] }
   0x2   :  { %v2975_v3 = vor.u32 %v4362_v1, %v2974_v0  ;;  %v2976_v4 = vld [vmem:[%s7037_s1 + $0x70] sm:$0xf0]  ;;  %v2982_v5 = vld [vmem:[%s7037_s1 + $0x68] sm:$0xf]  ;;  %v4363_v6 = vld [vmem:[%s7037_s1 + $0x74] sm:$0xf0] }
   0x3   :  { %v2979_v7 = vor.u32 %v4360_v2, %v2976_v4  ;;  %v2983_v8 = vor.u32 %v4363_v6, %v2982_v5  ;;  %v4361_v9 = vld [vmem:[%s7037_s1 + $0x6c] sm:$0xf]  ;;  %v2984_v10 = vld [vmem:[%s7037_s1 + $0x78] sm:$0xf0]  ;;  %v2958_v11 = vld [vmem:[%s7037_s1 + $0x40] sm:$0xf] }
   0x4   :  { %143 = vmatpush.bf16.msra.mxu0 %v2975_v3  ;;  %v2987_v12 = vor.u32 %v4361_v9, %v2984_v10  ;;  %v4358_v13 = vld [vmem:[%s7037_s1 + $0x4c] sm:$0xf0]  ;;  %v4356_v14 = vld [vmem:[%s7037_s1 + $0x44] sm:$0xf]  ;;  %v2960_v15 = vld [vmem:[%s7037_s1 + $0x50] sm:$0xf0] }
   0x5   :  { %156 = vmatpush.bf16.msra.mxu1 %v2979_v7  ;;  %169 = vmatpush.bf16.msra.mxu2 %v2983_v8  ;;  %v2959_v16 = vor.u32 %v4358_v13, %v2958_v11  ;;  %v2963_v17 = vor.u32 %v4356_v14, %v2960_v15  ;;  %v2966_v18 = vld [vmem:[%s7037_s1 + $0x48] sm:$0xf]  ;;  %v4359_v19 = vld [vmem:[%s7037_s1 + $0x54] sm:$0xf0]  ;;  %v4357_v20 = vld [vmem:[%s7037_s1 + $0x4c] sm:$0xf] }
   0x6   :  { %182 = vmatpush.bf16.msra.mxu3 %v2987_v12  ;;  %v2967_v21 = vor.u32 %v4359_v19, %v2966_v18  ;;  %v2968_v22 = vld [vmem:[%s7037_s1 + $0x58] sm:$0xf0]  ;;  %v2942_v23 = vld [vmem:[%s7037_s1 + $0x20] sm:$0xf]  ;;  %v4354_v24 = vld [vmem:[%s7037_s1 + $0x2c] sm:$0xf0] }
   0x7   :  { %v2971_v25 = vor.u32 %v4357_v20, %v2968_v22  ;;  %v4352_v26 = vld [vmem:[%s7037_s1 + $0x24] sm:$0xf]  ;;  %v2944_v27 = vld [vmem:[%s7037_s1 + $0x30] sm:$0xf0]  ;;  %v2950_v28 = vld [vmem:[%s7037_s1 + $0x28] sm:$0xf]  ;;  %v2943_v29 = vor.u32 %v4354_v24, %v2942_v23 }
   0x8   :  { %144 = vmatpush.bf16.msra.mxu0 %v2959_v16  ;;  %v4355_v30 = vld [vmem:[%s7037_s1 + $0x34] sm:$0xf0]  ;;  %v4353_v31 = vld [vmem:[%s7037_s1 + $0x2c] sm:$0xf]  ;;  %v2952_v32 = vld [vmem:[%s7037_s1 + $0x38] sm:$0xf0]  ;;  %v2947_v33 = vor.u32 %v4352_v26, %v2944_v27 }
   0x9   :  { %157 = vmatpush.bf16.msra.mxu1 %v2963_v17  ;;  %170 = vmatpush.bf16.msra.mxu2 %v2967_v21  ;;  %v2951_v34 = vor.u32 %v4355_v30, %v2950_v28  ;;  %v2926_v35 = vld [vmem:[%s7037_s1] sm:$0xf]  ;;  %v4350_v36 = vld [vmem:[%s7037_s1 + $0xc] sm:$0xf0]  ;;  %v4348_v37 = vld [vmem:[%s7037_s1 + $0x4] sm:$0xf]  ;;  %v2955_v38 = vor.u32 %v4353_v31, %v2952_v32 }
   0xa   :  { %183 = vmatpush.bf16.msra.mxu3 %v2971_v25  ;;  %v2928_v39 = vld [vmem:[%s7037_s1 + $0x10] sm:$0xf0]  ;;  %v2934_v40 = vld [vmem:[%s7037_s1 + $0x8] sm:$0xf]  ;;  %v4351_v41 = vld [vmem:[%s7037_s1 + $0x14] sm:$0xf0]  ;;  %v2927_v44 = vor.u32 %v4350_v36, %v2926_v35 }
   0xb   :  { %v4349_v42 = vld [vmem:[%s7037_s1 + $0xc] sm:$0xf]  ;;  %v2936_v43 = vld [vmem:[%s7037_s1 + $0x18] sm:$0xf0]  ;;  %v3106_v45 = vld [vmem:[%s7039_s3 + $0xe0] sm:$0xf]  ;;  %v2931_v47 = vor.u32 %v4348_v37, %v2928_v39  ;;  %v2935_v48 = vor.u32 %v4351_v41, %v2934_v40 }
   0xc   :  { %145 = vmatpush.bf16.msra.mxu0 %v2943_v29  ;;  %v4394_v46 = vld [vmem:[%s7039_s3 + $0xec] sm:$0xf0]  ;;  %v3234_v49 = vld [vmem:[%s7039_s3 + $0x1e0] sm:$0xf]  ;;  %v2939_v51 = vor.u32 %v4349_v42, %v2936_v43  ;;  %v4392_v36 = vld [vmem:[%s7039_s3 + $0xe4] sm:$0xf] }
   0xd   :  { %158 = vmatpush.bf16.msra.mxu1 %v2947_v33  ;;  %171 = vmatpush.bf16.msra.mxu2 %v2951_v34  ;;  %v4426_v50 = vld [vmem:[%s7039_s3 + $0x1ec] sm:$0xf0]  ;;  %v3107_v52 = vor.u32 %v4394_v46, %v3106_v45  ;;  %v28_v53 = vld [vmem:[%s7036_s0] sm:$0x1]  ;;  %v3108_v37 = vld [vmem:[%s7039_s3 + $0xf0] sm:$0xf0] }
   0xe   :  { %184 = vmatpush.bf16.msra.mxu3 %v2955_v38  ;;  %v3235_v54 = vor.u32 %v4426_v50, %v3234_v49  ;;  %v3090_v55 = vld [vmem:[%s7039_s3 + $0xc0] sm:$0xf]  ;;  %v4390_v56 = vld [vmem:[%s7039_s3 + $0xcc] sm:$0xf0]  ;;  %v4388_v49 = vld [vmem:[%s7039_s3 + $0xc4] sm:$0xf] }
   0xf   :  { %v3218_v57 = vld [vmem:[%s7039_s3 + $0x1c0] sm:$0xf]  ;;  %v4422_v58 = vld [vmem:[%s7039_s3 + $0x1cc] sm:$0xf0]  ;;  %v3091_v59 = vor.u32 %v4390_v56, %v3090_v55  ;;  %v3092_v50 = vld [vmem:[%s7039_s3 + $0xd0] sm:$0xf0] }
  0x10   :  { %146 = vmatpush.bf16.msra.mxu0 %v2927_v44  ;;  %v3074_v60 = vld [vmem:[%s7039_s3 + $0xa0] sm:$0xf]  ;;  %v4386_v61 = vld [vmem:[%s7039_s3 + $0xac] sm:$0xf0]  ;;  %v3219_v62 = vor.u32 %v4422_v58, %v3218_v57 }
  0x11   :  { %159 = vmatpush.bf16.msra.mxu1 %v2931_v47  ;;  %172 = vmatpush.bf16.msra.mxu2 %v2935_v48  ;;  %v3202_v63 = vld [vmem:[%s7039_s3 + $0x1a0] sm:$0xf]  ;;  %v4418_v0 = vld [vmem:[%s7039_s3 + $0x1ac] sm:$0xf0]  ;;  %v3075_v7 = vor.u32 %v4386_v61, %v3074_v60  ;;  %v3111_v47 = vor.u32 %v4392_v36, %v3108_v37  ;;  %v3095_v60 = vor.u32 %v4388_v49, %v3092_v50 }
  0x12   :  { %185 = vmatpush.bf16.msra.mxu3 %v2939_v51  ;;  %v3362_v1 = vld [vmem:[%s7039_s3 + $0x2e0] sm:$0xf]  ;;  %v4458_v2 = vld [vmem:[%s7039_s3 + $0x2ec] sm:$0xf0]  ;;  %v3203_v11 = vor.u32 %v4418_v0, %v3202_v63  ;;  %v4384_v63 = vld [vmem:[%s7039_s3 + $0xa4] sm:$0xf] }
  0x13   :  { %2988 = vmatmul.msk.bf16.vlgmr.msra.gmra.mxu0 %vm135_vm0, %v28_v53  ;;  %v3426_v3 = vld [vmem:[%s7039_s3 + $0x360] sm:$0xf]  ;;  %v4474_v4 = vld [vmem:[%s7039_s3 + $0x36c] sm:$0xf0]  ;;  %v3363_v5 = vor.u32 %v4458_v2, %v3362_v1  ;;  %v3076_v0 = vld [vmem:[%s7039_s3 + $0xb0] sm:$0xf0] }
  0x14   :  { %884 = vmatpush.bf16.msrb.mxu0 %v3107_v52  ;;  %2989 = vmatmul.msk.bf16.vlgmr.msra.gmra.mxu1 %vm135_vm0, %v28_v53  ;;  %v3427_v6 = vor.u32 %v4474_v4, %v3426_v3  ;;  %v3058_v8 = vld [vmem:[%s7039_s3 + $0x80] sm:$0xf]  ;;  %v4454_v10 = vld [vmem:[%s7039_s3 + $0x2cc] sm:$0xf0]  ;;  %v4424_v2 = vld [vmem:[%s7039_s3 + $0x1e4] sm:$0xf] }
  0x15   :  { %897 = vmatpush.bf16.msrb.mxu1 %v3235_v54  ;;  %2990 = vmatmul.msk.bf16.vlgmr.msra.gmra.mxu2 %vm135_vm0, %v28_v53  ;;  %v3346_v9 = vld [vmem:[%s7039_s3 + $0x2c0] sm:$0xf]  ;;  %v4382_v12 = vld [vmem:[%s7039_s3 + $0x8c] sm:$0xf0]  ;;  %v3236_v3 = vld [vmem:[%s7039_s3 + $0x1f0] sm:$0xf0] }
  0x16   :  { %2991 = vmatmul.msk.bf16.vlgmr.msra.gmra.mxu3 %vm135_vm0, %v28_v53  ;;  %910 = vmatpush.bf16.msrb.mxu2 %v3363_v5  ;;  %v3347_v13 = vor.u32 %v4454_v10, %v3346_v9  ;;  %v3410_v14 = vld [vmem:[%s7039_s3 + $0x340] sm:$0xf]  ;;  %v4470_v15 = vld [vmem:[%s7039_s3 + $0x34c] sm:$0xf0]  ;;  %v3059_v22 = vor.u32 %v4382_v12, %v3058_v8  ;;  %v3364_v8 = vld [vmem:[%s7039_s3 + $0x2f0] sm:$0xf0]  ;;  %v3079_v9 = vor.u32 %v4384_v63, %v3076_v0 }
  0x17   :  { %v3186_v16 = vld [vmem:[%s7039_s3 + $0x180] sm:$0xf]  ;;  %v4414_v17 = vld [vmem:[%s7039_s3 + $0x18c] sm:$0xf0]  ;;  %927 = vmatpush.bf16.msrb.mxu3 %v3427_v6  ;;  %v3411_v18 = vor.u32 %v4470_v15, %v3410_v14 }
  0x18   :  { %885 = vmatpush.bf16.msrb.mxu0 %v3091_v59  ;;  %v3330_v19 = vld [vmem:[%s7039_s3 + $0x2a0] sm:$0xf]  ;;  %v4450_v20 = vld [vmem:[%s7039_s3 + $0x2ac] sm:$0xf0]  ;;  %v3187_v24 = vor.u32 %v4414_v17, %v3186_v16 }
  0x19   :  { %898 = vmatpush.bf16.msrb.mxu1 %v3219_v62  ;;  %v3394_v21 = vld [vmem:[%s7039_s3 + $0x320] sm:$0xf]  ;;  %v4466_v23 = vld [vmem:[%s7039_s3 + $0x32c] sm:$0xf0]  ;;  %v3331_v28 = vor.u32 %v4450_v20, %v3330_v19 }
  0x1a   :  { %v3042_v25 = vld [vmem:[%s7039_s3 + $0x60] sm:$0xf]  ;;  %v4378_v26 = vld [vmem:[%s7039_s3 + $0x6c] sm:$0xf0]  ;;  %911 = vmatpush.bf16.msrb.mxu2 %v3347_v13  ;;  %v3395_v30 = vor.u32 %v4466_v23, %v3394_v21 }
  0x1b   :  { %v3170_v27 = vld [vmem:[%s7039_s3 + $0x160] sm:$0xf]  ;;  %v4410_v29 = vld [vmem:[%s7039_s3 + $0x16c] sm:$0xf0]  ;;  %928 = vmatpush.bf16.msrb.mxu3 %v3411_v18  ;;  %v3043_v35 = vor.u32 %v4378_v26, %v3042_v25 }
  0x1c   :  { %886 = vmatpush.bf16.msrb.mxu0 %v3075_v7  ;;  %v3314_v31 = vld [vmem:[%s7039_s3 + $0x280] sm:$0xf]  ;;  %v4446_v32 = vld [vmem:[%s7039_s3 + $0x28c] sm:$0xf0]  ;;  %v3171_v38 = vor.u32 %v4410_v29, %v3170_v27  ;;  %v4456_v7 = vld [vmem:[%s7039_s3 + $0x2e4] sm:$0xf] }
  0x1d   :  { %899 = vmatpush.bf16.msrb.mxu1 %v3203_v11  ;;  %v3378_v33 = vld [vmem:[%s7039_s3 + $0x300] sm:$0xf]  ;;  %v4462_v34 = vld [vmem:[%s7039_s3 + $0x30c] sm:$0xf0]  ;;  %v3315_v42 = vor.u32 %v4446_v32, %v3314_v31 }
  0x1e   :  { %v3026_v39 = vld [vmem:[%s7039_s3 + $0x40] sm:$0xf]  ;;  %v4374_v40 = vld [vmem:[%s7039_s3 + $0x4c] sm:$0xf0]  ;;  %912 = vmatpush.bf16.msrb.mxu2 %v3331_v28  ;;  %v3379_v44 = vor.u32 %v4462_v34, %v3378_v33 }
  0x1f   :  { %v3154_v41 = vld [vmem:[%s7039_s3 + $0x140] sm:$0xf]  ;;  %v4406_v43 = vld [vmem:[%s7039_s3 + $0x14c] sm:$0xf0]  ;;  %929 = vmatpush.bf16.msrb.mxu3 %v3395_v30  ;;  %v3027_v48 = vor.u32 %v4374_v40, %v3026_v39 }
  0x20   :  { %887 = vmatpush.bf16.msrb.mxu0 %v3059_v22  ;;  %v3298_v45 = vld [vmem:[%s7039_s3 + $0x260] sm:$0xf]  ;;  %v4442_v46 = vld [vmem:[%s7039_s3 + $0x26c] sm:$0xf0]  ;;  %v3155_v51 = vor.u32 %v4406_v43, %v3154_v41 }
  0x21   :  { %900 = vmatpush.bf16.msrb.mxu1 %v3187_v24  ;;  %v3010_v52 = vld [vmem:[%s7039_s3 + $0x20] sm:$0xf]  ;;  %v4370_v53 = vld [vmem:[%s7039_s3 + $0x2c] sm:$0xf0]  ;;  %v3299_v55 = vor.u32 %v4442_v46, %v3298_v45 }
  0x22   :  { %v3138_v54 = vld [vmem:[%s7039_s3 + $0x120] sm:$0xf]  ;;  %913 = vmatpush.bf16.msrb.mxu2 %v3315_v42  ;;  %v4402_v56 = vld [vmem:[%s7039_s3 + $0x12c] sm:$0xf0]  ;;  %v3011_v61 = vor.u32 %v4370_v53, %v3010_v52 }
  0x23   :  { %930 = vmatpush.bf16.msrb.mxu3 %v3379_v44  ;;  %v3282_v57 = vld [vmem:[%s7039_s3 + $0x240] sm:$0xf]  ;;  %v4438_v58 = vld [vmem:[%s7039_s3 + $0x24c] sm:$0xf0]  ;;  %v3139_v1 = vor.u32 %v4402_v56, %v3138_v54 }
  0x24   :  { %888 = vmatpush.bf16.msrb.mxu0 %v3043_v35  ;;  %v2994_v59 = vld [vmem:[%s7039_s3] sm:$0xf]  ;;  %v4366_v62 = vld [vmem:[%s7039_s3 + $0xc] sm:$0xf0]  ;;  %v3283_v5 = vor.u32 %v4438_v58, %v3282_v57 }
  0x25   :  { %901 = vmatpush.bf16.msrb.mxu1 %v3171_v38  ;;  %v3122_v4 = vld [vmem:[%s7039_s3 + $0x100] sm:$0xf]  ;;  %v4398_v6 = vld [vmem:[%s7039_s3 + $0x10c] sm:$0xf0] }
  0x26   :  { %914 = vmatpush.bf16.msrb.mxu2 %v3299_v55  ;;  %v3266_v10 = vld [vmem:[%s7039_s3 + $0x220] sm:$0xf]  ;;  %v4434_v11 = vld [vmem:[%s7039_s3 + $0x22c] sm:$0xf0] }
  0x27   :  { %936 = vmatpush.bf16.msra.mxu3 %v3111_v47 }
  0x28   :  { %889 = vmatpush.bf16.msrb.mxu0 %v3027_v48 }
  0x29   :  { %902 = vmatpush.bf16.msrb.mxu1 %v3155_v51 }
  0x2b   :  { %937 = vmatpush.bf16.msra.mxu3 %v3095_v60 }
  0x2c   :  { %12 = vsyncpa [#allocation3], 0  ;;  %890 = vmatpush.bf16.msrb.mxu0 %v3011_v61  ;;  %v2995_v12 = vor.u32 %v4366_v62, %v2994_v59  ;;  %v4380_v13 = vld [vmem:[%s7039_s3 + $0x84] sm:$0xf]  ;;  %v3060_v14 = vld [vmem:[%s7039_s3 + $0x90] sm:$0xf0]  ;;  %v3239_v15 = vor.u32 %v4424_v2, %v3236_v3  ;;  %v3123_v16 = vor.u32 %v4398_v6, %v3122_v4  ;;  %915 = vmatpush.bf16.msrb.mxu2 %v3283_v5 }
  0x2d   :  { %903 = vmatpush.bf16.msrb.mxu1 %v3139_v1  ;;  %v3367_v17 = vor.u32 %v4456_v7, %v3364_v8  ;;  %v4420_v18 = vld [vmem:[%s7039_s3 + $0x1c4] sm:$0xf]  ;;  %v3220_v19 = vld [vmem:[%s7039_s3 + $0x1d0] sm:$0xf0]  ;;  %v3267_v21 = vor.u32 %v4434_v11, %v3266_v10  ;;  %v3063_v23 = vor.u32 %v4380_v13, %v3060_v14  ;;  %v3250_v24 = vld [vmem:[%s7039_s3 + $0x200] sm:$0xf] }
  0x2e   :  { %v4452_v20 = vld [vmem:[%s7039_s3 + $0x2c4] sm:$0xf]  ;;  %v3348_v22 = vld [vmem:[%s7039_s3 + $0x2d0] sm:$0xf0]  ;;  %v4430_v25 = vld [vmem:[%s7039_s3 + $0x20c] sm:$0xf0]  ;;  %v3223_v26 = vor.u32 %v4420_v18, %v3220_v19 }
  0x2f   :  { %938 = vmatpush.bf16.msra.mxu3 %v3079_v9  ;;  %v3351_v27 = vor.u32 %v4452_v20, %v3348_v22  ;;  %v4416_v28 = vld [vmem:[%s7039_s3 + $0x1a4] sm:$0xf]  ;;  %v3204_v29 = vld [vmem:[%s7039_s3 + $0x1b0] sm:$0xf0]  ;;  %v3251_v30 = vor.u32 %v4430_v25, %v3250_v24  ;;  %v45_v25 = vld [vmem:[%s7038_s2] sm:$0xf] }
  0x30   :  { %891 = vmatpush.bf16.msrb.mxu0 %v2995_v12  ;;  %916 = vmatpush.bf16.msrb.mxu2 %v3267_v21  ;;  %v4448_v31 = vld [vmem:[%s7039_s3 + $0x2a4] sm:$0xf]  ;;  %v3332_v32 = vld [vmem:[%s7039_s3 + $0x2b0] sm:$0xf0]  ;;  %v3207_v33 = vor.u32 %v4416_v28, %v3204_v29  ;;  %vm2895_vm1 = vcmask 1041408   ;;  %vm2897_vm2 = vcmask 1045508  }
  0x31   :  { %904 = vmatpush.bf16.msrb.mxu1 %v3123_v16  ;;  %v3335_v34 = vor.u32 %v4448_v31, %v3332_v32  ;;  %v4412_v35 = vld [vmem:[%s7039_s3 + $0x184] sm:$0xf]  ;;  %v3188_v36 = vld [vmem:[%s7039_s3 + $0x190] sm:$0xf0]  ;;  %v3370_v31 = vld [vmem:[%s7039_s3 + $0x2e8] sm:$0xf] }
  0x32   :  { %v4444_v37 = vld [vmem:[%s7039_s3 + $0x284] sm:$0xf]  ;;  %v3316_v38 = vld [vmem:[%s7039_s3 + $0x290] sm:$0xf0]  ;;  %v3191_v39 = vor.u32 %v4412_v35, %v3188_v36  ;;  %v4459_v32 = vld [vmem:[%s7039_s3 + $0x2f4] sm:$0xf0] }
  0x33   :  { %939 = vmatpush.bf16.msra.mxu3 %v3063_v23  ;;  %v3319_v40 = vor.u32 %v4444_v37, %v3316_v38  ;;  %v4408_v41 = vld [vmem:[%s7039_s3 + $0x164] sm:$0xf]  ;;  %v3172_v42 = vld [vmem:[%s7039_s3 + $0x170] sm:$0xf0]  ;;  %v4475_v35 = vld [vmem:[%s7039_s3 + $0x374] sm:$0xf0] }
  0x34   :  { %949 = vmatpush.bf16.msra.mxu0 %v3239_v15  ;;  %917 = vmatpush.bf16.msrb.mxu2 %v3251_v30  ;;  %v4440_v43 = vld [vmem:[%s7039_s3 + $0x264] sm:$0xf]  ;;  %v3300_v44 = vld [vmem:[%s7039_s3 + $0x270] sm:$0xf0]  ;;  %v3175_v45 = vor.u32 %v4408_v41, %v3172_v42  ;;  %v49_v38 = vperm.slane %v45_v25, 2  ;;  %v50_v41 = vperm.slane %v45_v25, 3 }
  0x35   :  { %962 = vmatpush.bf16.msra.mxu1 %v3367_v17  ;;  %v3303_v46 = vor.u32 %v4440_v43, %v3300_v44  ;;  %v4404_v47 = vld [vmem:[%s7039_s3 + $0x144] sm:$0xf]  ;;  %v3156_v48 = vld [vmem:[%s7039_s3 + $0x150] sm:$0xf0]  ;;  %v3354_v43 = vld [vmem:[%s7039_s3 + $0x2c8] sm:$0xf] }
  0x36   :  { %v3159_v49 = vor.u32 %v4404_v47, %v3156_v48  ;;  %v4376_v50 = vld [vmem:[%s7039_s3 + $0x64] sm:$0xf]  ;;  %v3044_v51 = vld [vmem:[%s7039_s3 + $0x70] sm:$0xf0]  ;;  %v4455_v44 = vld [vmem:[%s7039_s3 + $0x2d4] sm:$0xf0] }
  0x37   :  { %v4472_v52 = vld [vmem:[%s7039_s3 + $0x364] sm:$0xf]  ;;  %v3047_v53 = vor.u32 %v4376_v50, %v3044_v51  ;;  %v3428_v54 = vld [vmem:[%s7039_s3 + $0x370] sm:$0xf0]  ;;  %v4471_v47 = vld [vmem:[%s7039_s3 + $0x354] sm:$0xf0]  ;;  %v3355_v51 = vor.u32 %v4455_v44, %v3354_v43 }
  0x38   :  { %950 = vmatpush.bf16.msra.mxu0 %v3223_v26  ;;  %v3431_v55 = vor.u32 %v4472_v52, %v3428_v54  ;;  %v4436_v56 = vld [vmem:[%s7039_s3 + $0x244] sm:$0xf]  ;;  %v3284_v57 = vld [vmem:[%s7039_s3 + $0x250] sm:$0xf0]  ;;  %v47_v26 = vperm.slane %v45_v25, 0  ;;  %vm2899_vm3 = vcmask 1043456  }
  0x39   :  { %963 = vmatpush.bf16.msra.mxu1 %v3351_v27  ;;  %940 = vmatpush.bf16.msra.mxu3 %v3047_v53  ;;  %v3287_v58 = vor.u32 %v4436_v56, %v3284_v57  ;;  %v4400_v59 = vld [vmem:[%s7039_s3 + $0x124] sm:$0xf]  ;;  %v3140_v60 = vld [vmem:[%s7039_s3 + $0x130] sm:$0xf0]  ;;  %v48_v27 = vperm.slane %v45_v25, 1  ;;  %s2915_s18 = sshll.u32 %s7043_s7, 4  ;;  %s2916_s18 = int_to_ptr.hbm [resolvable:$true] %s2915_s18 }
  0x3a   :  { %979 = vmatpush.bf16.msra.mxu2 %v3431_v55  ;;  %v3143_v61 = vor.u32 %v4400_v59, %v3140_v60  ;;  %v4372_v62 = vld [vmem:[%s7039_s3 + $0x44] sm:$0xf]  ;;  %v3028_v63 = vld [vmem:[%s7039_s3 + $0x50] sm:$0xf0]  ;;  %v3114_v52 = vld [vmem:[%s7039_s3 + $0xe8] sm:$0xf] }
  0x3b   :  { %v4468_v0 = vld [vmem:[%s7039_s3 + $0x344] sm:$0xf]  ;;  %v3031_v1 = vor.u32 %v4372_v62, %v3028_v63  ;;  %v3412_v2 = vld [vmem:[%s7039_s3 + $0x350] sm:$0xf0]  ;;  %v4395_v53 = vld [vmem:[%s7039_s3 + $0xf4] sm:$0xf0] }
  0x3c   :  { %951 = vmatpush.bf16.msra.mxu0 %v3207_v33  ;;  %v3415_v3 = vor.u32 %v4468_v0, %v3412_v2  ;;  %v4432_v4 = vld [vmem:[%s7039_s3 + $0x224] sm:$0xf]  ;;  %v3268_v5 = vld [vmem:[%s7039_s3 + $0x230] sm:$0xf0]  ;;  %v3242_v54 = vld [vmem:[%s7039_s3 + $0x1e8] sm:$0xf]  ;;  %v3115_v2 = vor.u32 %v4395_v53, %v3114_v52 }
  0x3d   :  { %964 = vmatpush.bf16.msra.mxu1 %v3335_v34  ;;  %941 = vmatpush.bf16.msra.mxu3 %v3031_v1  ;;  %v3271_v6 = vor.u32 %v4432_v4, %v3268_v5  ;;  %v4396_v7 = vld [vmem:[%s7039_s3 + $0x104] sm:$0xf]  ;;  %v3124_v8 = vld [vmem:[%s7039_s3 + $0x110] sm:$0xf0]  ;;  %v3434_v34 = vld [vmem:[%s7039_s3 + $0x368] sm:$0xf] }
  0x3e   :  { %980 = vmatpush.bf16.msra.mxu2 %v3415_v3  ;;  %v3127_v9 = vor.u32 %v4396_v7, %v3124_v8  ;;  %v4368_v10 = vld [vmem:[%s7039_s3 + $0x24] sm:$0xf]  ;;  %v3012_v11 = vld [vmem:[%s7039_s3 + $0x30] sm:$0xf0]  ;;  %v3435_v42 = vor.u32 %v4475_v35, %v3434_v34  ;;  %v4427_v57 = vld [vmem:[%s7039_s3 + $0x1f4] sm:$0xf0] }
  0x3f   :  { %v3015_v12 = vor.u32 %v4368_v10, %v3012_v11  ;;  %v4464_v13 = vld [vmem:[%s7039_s3 + $0x324] sm:$0xf]  ;;  %v3396_v14 = vld [vmem:[%s7039_s3 + $0x330] sm:$0xf0]  ;;  %v3338_v59 = vld [vmem:[%s7039_s3 + $0x2a8] sm:$0xf]  ;;  %v3243_v4 = vor.u32 %v4427_v57, %v3242_v54 }
  0x40   :  { %952 = vmatpush.bf16.msra.mxu0 %v3191_v39  ;;  %v3399_v15 = vor.u32 %v4464_v13, %v3396_v14  ;;  %v4428_v16 = vld [vmem:[%s7039_s3 + $0x204] sm:$0xf]  ;;  %v3252_v17 = vld [vmem:[%s7039_s3 + $0x210] sm:$0xf0]  ;;  %v3371_v39 = vor.u32 %v4459_v32, %v3370_v31  ;;  %v4451_v60 = vld [vmem:[%s7039_s3 + $0x2b4] sm:$0xf0] }
  0x41   :  { %965 = vmatpush.bf16.msra.mxu1 %v3319_v40  ;;  %942 = vmatpush.bf16.msra.mxu3 %v3015_v12  ;;  %v3255_v18 = vor.u32 %v4428_v16, %v3252_v17  ;;  %v4364_v19 = vld [vmem:[%s7039_s3 + $0x4] sm:$0xf]  ;;  %v2996_v20 = vld [vmem:[%s7039_s3 + $0x10] sm:$0xf0]  ;;  %v3402_v63 = vld [vmem:[%s7039_s3 + $0x328] sm:$0xf]  ;;  %v3339_v5 = vor.u32 %v4451_v60, %v3338_v59 }
  0x42   :  { %981 = vmatpush.bf16.msra.mxu2 %v3399_v15  ;;  %v4460_v21 = vld [vmem:[%s7039_s3 + $0x304] sm:$0xf]  ;;  %v2999_v22 = vor.u32 %v4364_v19, %v2996_v20  ;;  %v3380_v23 = vld [vmem:[%s7039_s3 + $0x310] sm:$0xf0]  ;;  %v4467_v0 = vld [vmem:[%s7039_s3 + $0x334] sm:$0xf0] }
  0x43   :  { %v3383_v24 = vor.u32 %v4460_v21, %v3380_v23  ;;  %v4391_v7 = vld [vmem:[%s7039_s3 + $0xd4] sm:$0xf0]  ;;  %v3226_v8 = vld [vmem:[%s7039_s3 + $0x1c8] sm:$0xf]  ;;  %v3403_v11 = vor.u32 %v4467_v0, %v3402_v63  ;;  %v4385_v54 = vld [vmem:[%s7039_s3 + $0xac] sm:$0xf] }
  0x44   :  { %953 = vmatpush.bf16.msra.mxu0 %v3175_v45  ;;  %v4423_v10 = vld [vmem:[%s7039_s3 + $0x1d4] sm:$0xf0]  ;;  %v3322_v12 = vld [vmem:[%s7039_s3 + $0x288] sm:$0xf] }
  0x45   :  { %966 = vmatpush.bf16.msra.mxu1 %v3303_v46  ;;  %943 = vmatpush.bf16.msra.mxu3 %v2999_v22  ;;  %v3418_v46 = vld [vmem:[%s7039_s3 + $0x348] sm:$0xf]  ;;  %v4447_v13 = vld [vmem:[%s7039_s3 + $0x294] sm:$0xf0]  ;;  %v3227_v19 = vor.u32 %v4423_v10, %v3226_v8 }
  0x46   :  { %982 = vmatpush.bf16.msra.mxu2 %v3383_v24  ;;  %v3386_v14 = vld [vmem:[%s7039_s3 + $0x308] sm:$0xf]  ;;  %v4463_v15 = vld [vmem:[%s7039_s3 + $0x314] sm:$0xf0]  ;;  %v3323_v20 = vor.u32 %v4447_v13, %v3322_v12 }
  0x47   :  { %v3082_v21 = vld [vmem:[%s7039_s3 + $0xa8] sm:$0xf]  ;;  %v4387_v22 = vld [vmem:[%s7039_s3 + $0xb4] sm:$0xf0]  ;;  %v3387_v25 = vor.u32 %v4463_v15, %v3386_v14 }
  0x48   :  { %954 = vmatpush.bf16.msra.mxu0 %v3159_v49  ;;  %v3210_v23 = vld [vmem:[%s7039_s3 + $0x1a8] sm:$0xf]  ;;  %v4419_v24 = vld [vmem:[%s7039_s3 + $0x1b4] sm:$0xf0] }
  0x49   :  { %967 = vmatpush.bf16.msra.mxu1 %v3287_v58  ;;  %v3419_v58 = vor.u32 %v4471_v47, %v3418_v46  ;;  %v3211_v31 = vor.u32 %v4419_v24, %v3210_v23  ;;  %v3066_v32 = vld [vmem:[%s7039_s3 + $0x88] sm:$0xf]  ;;  %v4379_v47 = vld [vmem:[%s7039_s3 + $0x74] sm:$0xf0] }
  0x4a   :  { %v3050_v46 = vld [vmem:[%s7039_s3 + $0x68] sm:$0xf]  ;;  %v4435_v53 = vld [vmem:[%s7039_s3 + $0x234] sm:$0xf0] }
  0x4b   :  { %v3274_v52 = vld [vmem:[%s7039_s3 + $0x228] sm:$0xf]  ;;  %v4375_v59 = vld [vmem:[%s7039_s3 + $0x54] sm:$0xf0] }
  0x4c   :  { %955 = vmatpush.bf16.msra.mxu0 %v3143_v61  ;;  %v3275_v60 = vor.u32 %v4435_v53, %v3274_v52  ;;  %v4407_v63 = vld [vmem:[%s7039_s3 + $0x154] sm:$0xf0]  ;;  %v3258_v0 = vld [vmem:[%s7039_s3 + $0x208] sm:$0xf]  ;;  %v4417_v52 = vld [vmem:[%s7039_s3 + $0x1ac] sm:$0xf] }
  0x4d   :  { %968 = vmatpush.bf16.msra.mxu1 %v3271_v6  ;;  %v3098_v6 = vld [vmem:[%s7039_s3 + $0xc8] sm:$0xf]  ;;  %v4403_v15 = vld [vmem:[%s7039_s3 + $0x134] sm:$0xf0]  ;;  %v4461_v53 = vld [vmem:[%s7039_s3 + $0x30c] sm:$0xf] }
  0x4e   :  { %v3099_v17 = vor.u32 %v4391_v7, %v3098_v6  ;;  %v4473_v6 = vld [vmem:[%s7039_s3 + $0x36c] sm:$0xf]  ;;  %v3436_v7 = vld [vmem:[%s7039_s3 + $0x378] sm:$0xf0]  ;;  %v3018_v10 = vld [vmem:[%s7039_s3 + $0x28] sm:$0xf] }
  0x4f   :  { %v3146_v14 = vld [vmem:[%s7039_s3 + $0x128] sm:$0xf]  ;;  %v4367_v24 = vld [vmem:[%s7039_s3 + $0x14] sm:$0xf0] }
  0x50   :  { %956 = vmatpush.bf16.msra.mxu0 %v3127_v9  ;;  %v3002_v23 = vld [vmem:[%s7039_s3 + $0x8] sm:$0xf] }
  0x51   :  { %969 = vmatpush.bf16.msra.mxu1 %v3255_v18 }
  0x90   :  { %v148_v28 = vpop.f32.mrf.mxu0 }
  0x91   :  { %v149_v29 = vadd.f32 %v148_v28, %v47_v26  ;;  %v161_v30 = vpop.f32.mrf.mxu1  ;;  %v3306_v26 = vld [vmem:[%s7039_s3 + $0x268] sm:$0xf]  ;;  %v4393_v28 = vld [vmem:[%s7039_s3 + $0xec] sm:$0xf] }
  0x92   :  { %v162_v33 = vadd.f32 %v161_v30, %v48_v27  ;;  %v4443_v27 = vld [vmem:[%s7039_s3 + $0x274] sm:$0xf0]  ;;  %v3083_v30 = vor.u32 %v4387_v22, %v3082_v21  ;;  %v3420_v21 = vld [vmem:[%s7039_s3 + $0x358] sm:$0xf0]  ;;  %v3147_v22 = vor.u32 %v4403_v15, %v3146_v14  ;;  %v4528_v14 = vld [vmem:[%s7041_s5 + $0x19c] sm:$0xf0] }
  0x93   :  { %v191_v36 = vmax.f32 %v149_v29, 0.0  ;;  %v3116_v29 = vld [vmem:[%s7039_s3 + $0xf8] sm:$0xf0]  ;;  %v3307_v34 = vor.u32 %v4443_v27, %v3306_v26  ;;  %v4399_v26 = vld [vmem:[%s7039_s3 + $0x114] sm:$0xf0] }
  0x94   :  { %v192_v37 = vmax.f32 %v162_v33, 0.0  ;;  %v4383_v33 = vld [vmem:[%s7039_s3 + $0x94] sm:$0xf0]  ;;  %v3119_v35 = vor.u32 %v4393_v28, %v3116_v29  ;;  %v4425_v27 = vld [vmem:[%s7039_s3 + $0x1ec] sm:$0xf] }
  0x95   :  { %v5222_v40 = vpack.c.bf16 %v191_v36, %v191_v36  ;;  %v3194_v36 = vld [vmem:[%s7039_s3 + $0x188] sm:$0xf]  ;;  %v3067_v43 = vor.u32 %v4383_v33, %v3066_v32  ;;  %v3244_v28 = vld [vmem:[%s7039_s3 + $0x1f8] sm:$0xf0]  ;;  %v3003_v33 = vor.u32 %v4367_v24, %v3002_v23 }
  0x96   :  { %v5230_v45 = vpack.c.bf16 %v192_v37, %v192_v37  ;;  %v4415_v37 = vld [vmem:[%s7039_s3 + $0x194] sm:$0xf0]  ;;  %v3308_v23 = vld [vmem:[%s7039_s3 + $0x278] sm:$0xf0] }
  0x97   :  { %892 = vmatmul.bf16.vlgmr.msrb.gmra.mxu0 %v5222_v40  ;;  %v3195_v44 = vor.u32 %v4415_v37, %v3194_v36  ;;  %v3247_v37 = vor.u32 %v4425_v27, %v3244_v28 }
  0x98   :  { %v174_v48 = vpop.f32.mrf.mxu2  ;;  %905 = vmatmul.bf16.vlgmr.msrb.gmra.mxu1 %v5230_v45  ;;  %1014 = vmatpush.bf16.msrb.mxu0 %v3371_v39  ;;  %v150_v55 = vpop.f32.mrf.mxu0  ;;  %v4439_v39 = vld [vmem:[%s7039_s3 + $0x254] sm:$0xf0] }
  0x99   :  { %v175_v49 = vadd.f32 %v174_v48, %v49_v38  ;;  %v187_v50 = vpop.f32.mrf.mxu3  ;;  %1031 = vmatpush.bf16.msrb.mxu1 %v3435_v42  ;;  %v163_v61 = vpop.f32.mrf.mxu1  ;;  %v3290_v38 = vld [vmem:[%s7039_s3 + $0x248] sm:$0xf]  ;;  %v3100_v42 = vld [vmem:[%s7039_s3 + $0xd8] sm:$0xf0] }
  0x9a   :  { %v188_v56 = vadd.f32 %v187_v50, %v50_v41  ;;  %v4389_v41 = vld [vmem:[%s7039_s3 + $0xcc] sm:$0xf]  ;;  %v3291_v48 = vor.u32 %v4439_v39, %v3290_v38  ;;  %v3178_v50 = vld [vmem:[%s7039_s3 + $0x168] sm:$0xf]  ;;  %v3084_v55 = vld [vmem:[%s7039_s3 + $0xb8] sm:$0xf0] }
  0x9b   :  { %v193_v62 = vmax.f32 %v175_v49, 0.0  ;;  %v3103_v49 = vor.u32 %v4389_v41, %v3100_v42  ;;  %v3087_v61 = vor.u32 %v4385_v54, %v3084_v55  ;;  %v4465_v38 = vld [vmem:[%s7039_s3 + $0x32c] sm:$0xf]  ;;  %v3404_v39 = vld [vmem:[%s7039_s3 + $0x338] sm:$0xf0] }
  0x9c   :  { %v194_v1 = vmax.f32 %v188_v56, 0.0  ;;  %1015 = vmatpush.bf16.msrb.mxu0 %v3355_v51  ;;  %v4411_v51 = vld [vmem:[%s7039_s3 + $0x174] sm:$0xf0]  ;;  %v3051_v56 = vor.u32 %v4379_v47, %v3050_v46  ;;  %v4421_v42 = vld [vmem:[%s7039_s3 + $0x1cc] sm:$0xf] }
  0x9d   :  { %v5264_v3 = vpack.c.bf16 %v193_v62, %v193_v62  ;;  %1032 = vmatpush.bf16.msrb.mxu1 %v3419_v58  ;;  %v3179_v57 = vor.u32 %v4411_v51, %v3178_v50  ;;  %v3034_v58 = vld [vmem:[%s7039_s3 + $0x48] sm:$0xf]  ;;  %v4453_v46 = vld [vmem:[%s7039_s3 + $0x2cc] sm:$0xf]  ;;  %v3356_v47 = vld [vmem:[%s7039_s3 + $0x2d8] sm:$0xf0]  ;;  %v3407_v50 = vor.u32 %v4465_v38, %v3404_v39 }
  0x9e   :  { %v5275_v9 = vpack.c.bf16 %v194_v1, %v194_v1  ;;  %v3162_v62 = vld [vmem:[%s7039_s3 + $0x148] sm:$0xf]  ;;  %v4431_v1 = vld [vmem:[%s7039_s3 + $0x214] sm:$0xf0]  ;;  %v3388_v54 = vld [vmem:[%s7039_s3 + $0x318] sm:$0xf0]  ;;  %v3359_v55 = vor.u32 %v4453_v46, %v3356_v47 }
  0x9f   :  { %918 = vmatmul.bf16.vlgmr.msrb.gmra.mxu2 %v5264_v3  ;;  %v3163_v8 = vor.u32 %v4407_v63, %v3162_v62  ;;  %v3259_v12 = vor.u32 %v4431_v1, %v3258_v0  ;;  %v4365_v62 = vld [vmem:[%s7039_s3 + $0xc] sm:$0xf]  ;;  %v3004_v63 = vld [vmem:[%s7039_s3 + $0x18] sm:$0xf0]  ;;  %v3391_v0 = vor.u32 %v4461_v53, %v3388_v54  ;;  %v3830_v39 = vld [vmem:[%s7041_s5 + $0x300] sm:$0xf] }
  0xa0   :  { %3440 = vmatmul.msk.bf16.vlgmr.msrb.gmra.mxu3 %vm135_vm0, %v5275_v9  ;;  %988 = vmatpush.bf16.msrb.mxu2 %v3115_v2  ;;  %v176_v16 = vpop.f32.mrf.mxu2  ;;  %v4381_v2 = vld [vmem:[%s7039_s3 + $0x8c] sm:$0xf]  ;;  %v3276_v47 = vld [vmem:[%s7039_s3 + $0x238] sm:$0xf0] }
  0xa1   :  { %1001 = vmatpush.bf16.msrb.mxu3 %v3243_v4  ;;  %v189_v18 = vpop.f32.mrf.mxu3  ;;  %1016 = vmatpush.bf16.msrb.mxu0 %v3339_v5  ;;  %v3068_v4 = vld [vmem:[%s7039_s3 + $0x98] sm:$0xf0]  ;;  %v3035_v5 = vor.u32 %v4375_v59, %v3034_v58  ;;  %v4377_v16 = vld [vmem:[%s7039_s3 + $0x6c] sm:$0xf]  ;;  %v4536_v58 = vld [vmem:[%s7041_s5 + $0x1dc] sm:$0xf0] }
  0xa2   :  { %1033 = vmatpush.bf16.msrb.mxu1 %v3403_v11  ;;  %v4371_v11 = vld [vmem:[%s7039_s3 + $0x34] sm:$0xf0]  ;;  %v3071_v13 = vor.u32 %v4381_v2, %v3068_v4  ;;  %v3926_v4 = vld [vmem:[%s7041_s5 + $0x3c0] sm:$0xf]  ;;  %v4433_v46 = vld [vmem:[%s7039_s3 + $0x22c] sm:$0xf] }
  0xa3   :  { %v3019_v18 = vor.u32 %v4371_v11, %v3018_v10  ;;  %v3007_v10 = vor.u32 %v4365_v62, %v3004_v63  ;;  %v4445_v11 = vld [vmem:[%s7039_s3 + $0x28c] sm:$0xf]  ;;  %v3279_v53 = vor.u32 %v4433_v46, %v3276_v47  ;;  %v4656_v46 = vld [vmem:[%s7041_s5 + $0x59c] sm:$0xf0]  ;;  %v4652_v47 = vld [vmem:[%s7041_s5 + $0x584] sm:$0xf] }
  0xa4   :  { %989 = vmatpush.bf16.msrb.mxu2 %v3099_v17  ;;  %v3439_v17 = vor.u32 %v4473_v6, %v3436_v7  ;;  %v4413_v7 = vld [vmem:[%s7039_s3 + $0x18c] sm:$0xf] }
  0xa5   :  { %1002 = vmatpush.bf16.msrb.mxu3 %v3227_v19  ;;  %1017 = vmatpush.bf16.msrb.mxu0 %v3323_v20  ;;  %v3052_v19 = vld [vmem:[%s7039_s3 + $0x78] sm:$0xf0]  ;;  %v4469_v20 = vld [vmem:[%s7039_s3 + $0x34c] sm:$0xf] }
  0xa6   :  { %1034 = vmatpush.bf16.msrb.mxu1 %v3387_v25  ;;  %v3130_v25 = vld [vmem:[%s7039_s3 + $0x108] sm:$0xf]  ;;  %v3055_v29 = vor.u32 %v4377_v16, %v3052_v19  ;;  %v3423_v32 = vor.u32 %v4469_v20, %v3420_v21  ;;  %v4409_v20 = vld [vmem:[%s7039_s3 + $0x16c] sm:$0xf]  ;;  %v3180_v21 = vld [vmem:[%s7039_s3 + $0x178] sm:$0xf0] }
  0xa7   :  { %957 = vmatmul.bf16.vlgmr.msra.gmra.mxu0 %v5230_v45  ;;  %v3131_v36 = vor.u32 %v4399_v26, %v3130_v25  ;;  %v3606_v25 = vld [vmem:[%s7041_s5 + $0x140] sm:$0xf]  ;;  %v3183_v28 = vor.u32 %v4409_v20, %v3180_v21  ;;  %v4397_v54 = vld [vmem:[%s7039_s3 + $0x10c] sm:$0xf] }
  0xa8   :  { %990 = vmatpush.bf16.msrb.mxu2 %v3083_v30  ;;  %970 = vmatmul.bf16.vlgmr.msra.gmra.mxu1 %v5264_v3  ;;  %v4457_v30 = vld [vmem:[%s7039_s3 + $0x2ec] sm:$0xf]  ;;  %v4520_v26 = vld [vmem:[%s7041_s5 + $0x15c] sm:$0xf0] }
  0xa9   :  { %1003 = vmatpush.bf16.msrb.mxu3 %v3211_v31  ;;  %1018 = vmatpush.bf16.msrb.mxu0 %v3307_v34  ;;  %v3372_v31 = vld [vmem:[%s7039_s3 + $0x2f8] sm:$0xf0]  ;;  %v4373_v34 = vld [vmem:[%s7039_s3 + $0x4c] sm:$0xf]  ;;  %v3766_v20 = vld [vmem:[%s7041_s5 + $0x280] sm:$0xf] }
  0xaa   :  { %1040 = vmatpush.bf16.msra.mxu1 %v3119_v35  ;;  %v3036_v35 = vld [vmem:[%s7039_s3 + $0x58] sm:$0xf0]  ;;  %v3375_v41 = vor.u32 %v4457_v30, %v3372_v31  ;;  %v4584_v30 = vld [vmem:[%s7041_s5 + $0x35c] sm:$0xf0] }
  0xac   :  { %991 = vmatpush.bf16.msrb.mxu2 %v3067_v43  ;;  %v3228_v43 = vld [vmem:[%s7039_s3 + $0x1d8] sm:$0xf0] }
  0xad   :  { %1004 = vmatpush.bf16.msrb.mxu3 %v3195_v44  ;;  %1019 = vmatpush.bf16.msrb.mxu0 %v3291_v48  ;;  %v3039_v44 = vor.u32 %v4373_v34, %v3036_v35  ;;  %v4369_v48 = vld [vmem:[%s7039_s3 + $0x2c] sm:$0xf]  ;;  %v3231_v51 = vor.u32 %v4421_v42, %v3228_v43  ;;  %v3292_v34 = vld [vmem:[%s7039_s3 + $0x258] sm:$0xf0]  ;;  %v3607_v35 = vor.u32 %v4520_v26, %v3606_v25  ;;  %v3800_v25 = vld [vmem:[%s7041_s5 + $0x2e0] sm:$0xf0] }
  0xae   :  { %1041 = vmatpush.bf16.msra.mxu1 %v3103_v49  ;;  %v3020_v49 = vld [vmem:[%s7039_s3 + $0x38] sm:$0xf0]  ;;  %v4401_v43 = vld [vmem:[%s7039_s3 + $0x12c] sm:$0xf] }
  0xaf   :  { %3441 = vmatmul.msk.bf16.vlgmr.msra.gmra.mxu2 %vm135_vm0, %v5275_v9  ;;  %v3023_v59 = vor.u32 %v4369_v48, %v3020_v49  ;;  %v3542_v49 = vld [vmem:[%s7041_s5 + $0xc0] sm:$0xf] }
  0xb0   :  { %944 = vmatmul.bf16.vlgmr.msra.gmra.mxu3 %v5222_v40  ;;  %992 = vmatpush.bf16.msrb.mxu2 %v3051_v56  ;;  %v3212_v56 = vld [vmem:[%s7039_s3 + $0x1b8] sm:$0xf0] }
  0xb1   :  { %1005 = vmatpush.bf16.msrb.mxu3 %v3179_v57  ;;  %1020 = vmatpush.bf16.msrb.mxu0 %v3275_v60  ;;  %v3670_v57 = vld [vmem:[%s7041_s5 + $0x1c0] sm:$0xf]  ;;  %v4449_v60 = vld [vmem:[%s7039_s3 + $0x2ac] sm:$0xf]  ;;  %v3215_v1 = vor.u32 %v4417_v52, %v3212_v56 }
  0xb2   :  { %1042 = vmatpush.bf16.msra.mxu1 %v3087_v61  ;;  %v3340_v61 = vld [vmem:[%s7039_s3 + $0x2b8] sm:$0xf0]  ;;  %v3671_v2 = vor.u32 %v4536_v58, %v3670_v57  ;;  %v4429_v56 = vld [vmem:[%s7039_s3 + $0x20c] sm:$0xf] }
  0xb3   :  { %v3343_v6 = vor.u32 %v4449_v60, %v3340_v61  ;;  %v3260_v57 = vld [vmem:[%s7039_s3 + $0x218] sm:$0xf0]  ;;  %v4496_v60 = vld [vmem:[%s7041_s5 + $0x9c] sm:$0xf0] }
  0xb4   :  { %993 = vmatpush.bf16.msrb.mxu2 %v3035_v5  ;;  %v4600_v5 = vld [vmem:[%s7041_s5 + $0x3dc] sm:$0xf0]  ;;  %v3263_v62 = vor.u32 %v4429_v56, %v3260_v57  ;;  %v4644_v56 = vld [vmem:[%s7041_s5 + $0x544] sm:$0xf] }
  0xb5   :  { %1006 = vmatpush.bf16.msrb.mxu3 %v3163_v8  ;;  %1021 = vmatpush.bf16.msrb.mxu0 %v3259_v12  ;;  %v3196_v8 = vld [vmem:[%s7039_s3 + $0x198] sm:$0xf0]  ;;  %v3927_v15 = vor.u32 %v4600_v5, %v3926_v4  ;;  %v3446_v4 = vld [vmem:[%s7041_s5] sm:$0xf] }
  0xb6   :  { %1043 = vmatpush.bf16.msra.mxu1 %v3071_v13  ;;  %v3324_v12 = vld [vmem:[%s7039_s3 + $0x298] sm:$0xf0]  ;;  %v3638_v13 = vld [vmem:[%s7041_s5 + $0x180] sm:$0xf]  ;;  %v3199_v16 = vor.u32 %v4413_v7, %v3196_v8  ;;  %v3928_v7 = vld [vmem:[%s7041_s5 + $0x3e0] sm:$0xf0] }
  0xb7   :  { %v3327_v19 = vor.u32 %v4445_v11, %v3324_v12  ;;  %v3639_v24 = vor.u32 %v4528_v14, %v3638_v13  ;;  %v4480_v5 = vld [vmem:[%s7041_s5 + $0x1c] sm:$0xf0]  ;;  %v3896_v11 = vld [vmem:[%s7041_s5 + $0x3a0] sm:$0xf0] }
  0xb8   :  { %994 = vmatpush.bf16.msrb.mxu2 %v3019_v18  ;;  %1022 = vmatmul.bf16.vlgmr.msrb.gmra.mxu0 %v5264_v3  ;;  %v4592_v18 = vld [vmem:[%s7041_s5 + $0x39c] sm:$0xf0]  ;;  %v4580_v12 = vld [vmem:[%s7041_s5 + $0x344] sm:$0xf] }
  0xb9   :  { %1083 = vmatpush.bf16.msra.mxu0 %v3439_v17  ;;  %1007 = vmatpush.bf16.msrb.mxu3 %v3147_v22  ;;  %v3894_v17 = vld [vmem:[%s7041_s5 + $0x380] sm:$0xf]  ;;  %v4441_v22 = vld [vmem:[%s7039_s3 + $0x26c] sm:$0xf]  ;;  %v3864_v13 = vld [vmem:[%s7041_s5 + $0x360] sm:$0xf0] }
  0xba   :  { %3442 = vmatmul.msk.bf16.vlgmr.msrb.gmra.mxu1 %vm135_vm0, %v5275_v9  ;;  %v3895_v27 = vor.u32 %v4592_v18, %v3894_v17  ;;  %v3311_v31 = vor.u32 %v4441_v22, %v3308_v23  ;;  %v3867_v14 = vor.u32 %v4580_v12, %v3864_v13  ;;  %v4572_v18 = vld [vmem:[%s7041_s5 + $0x304] sm:$0xf]  ;;  %v4560_v22 = vld [vmem:[%s7041_s5 + $0x29c] sm:$0xf0] }
  0xbb   :  { %1044 = vmatpush.bf16.msra.mxu1 %v3055_v29  ;;  %v3862_v29 = vld [vmem:[%s7041_s5 + $0x340] sm:$0xf]  ;;  %v3767_v23 = vor.u32 %v4560_v22, %v3766_v20 }
  0xbc   :  { %995 = vmatpush.bf16.msrb.mxu2 %v3003_v33  ;;  %v4437_v33 = vld [vmem:[%s7039_s3 + $0x24c] sm:$0xf]  ;;  %v4022_v12 = vld [vmem:[%s7041_s5 + $0x480] sm:$0xf] }
  0xbd   :  { %1084 = vmatpush.bf16.msra.mxu0 %v3423_v32  ;;  %1008 = vmatpush.bf16.msrb.mxu3 %v3131_v36  ;;  %v4405_v32 = vld [vmem:[%s7039_s3 + $0x14c] sm:$0xf]  ;;  %v4512_v36 = vld [vmem:[%s7041_s5 + $0x11c] sm:$0xf0]  ;;  %v3295_v42 = vor.u32 %v4437_v33, %v3292_v34 }
  0xbe   :  { %v4544_v33 = vld [vmem:[%s7041_s5 + $0x21c] sm:$0xf0] }
  0xbf   :  { %1045 = vmatpush.bf16.msra.mxu1 %v3039_v44  ;;  %996 = vmatmul.bf16.vlgmr.msrb.gmra.mxu2 %v5222_v40  ;;  %v3148_v44 = vld [vmem:[%s7039_s3 + $0x138] sm:$0xf0]  ;;  %v4624_v13 = vld [vmem:[%s7041_s5 + $0x49c] sm:$0xf0] }
  0xc0   :  { %1053 = vmatpush.bf16.msra.mxu2 %v3247_v37  ;;  %1009 = vmatmul.bf16.vlgmr.msrb.gmra.mxu3 %v5230_v45  ;;  %v3863_v37 = vor.u32 %v4584_v30, %v3862_v29  ;;  %v3151_v52 = vor.u32 %v4401_v43, %v3148_v44  ;;  %v4556_v30 = vld [vmem:[%s7041_s5 + $0x284] sm:$0xf]  ;;  %v4150_v44 = vld [vmem:[%s7041_s5 + $0x580] sm:$0xf] }
  0xc1   :  { %1066 = vmatpush.bf16.msra.mxu3 %v3375_v41  ;;  %1085 = vmatpush.bf16.msra.mxu0 %v3407_v50  ;;  %v4576_v41 = vld [vmem:[%s7041_s5 + $0x31c] sm:$0xf0] }
  0xc2   :  { %v4504_v50 = vld [vmem:[%s7041_s5 + $0xdc] sm:$0xf0] }
  0xc3   :  { %1046 = vmatpush.bf16.msra.mxu1 %v3023_v59  ;;  %v3543_v58 = vor.u32 %v4504_v50, %v3542_v49  ;;  %v3510_v59 = vld [vmem:[%s7041_s5 + $0x80] sm:$0xf]  ;;  %v4152_v49 = vld [vmem:[%s7041_s5 + $0x5a0] sm:$0xf0] }
  0xc4   :  { %1054 = vmatpush.bf16.msra.mxu2 %v3231_v51  ;;  %v3831_v51 = vor.u32 %v4576_v41, %v3830_v39  ;;  %v3511_v63 = vor.u32 %v4496_v60, %v3510_v59  ;;  %v4548_v39 = vld [vmem:[%s7041_s5 + $0x244] sm:$0xf]  ;;  %v4086_v60 = vld [vmem:[%s7041_s5 + $0x500] sm:$0xf] }
  0xc5   :  { %1067 = vmatpush.bf16.msra.mxu3 %v3359_v55  ;;  %1086 = vmatpush.bf16.msra.mxu0 %v3391_v0  ;;  %v3132_v55 = vld [vmem:[%s7039_s3 + $0x118] sm:$0xf0]  ;;  %v3478_v0 = vld [vmem:[%s7041_s5 + $0x40] sm:$0xf]  ;;  %v3736_v41 = vld [vmem:[%s7041_s5 + $0x260] sm:$0xf0] }
  0xc6   :  { %v3135_v61 = vor.u32 %v4397_v54, %v3132_v55  ;;  %v3739_v43 = vor.u32 %v4548_v39, %v3736_v41  ;;  %v4540_v50 = vld [vmem:[%s7041_s5 + $0x204] sm:$0xf]  ;;  %v4118_v54 = vld [vmem:[%s7041_s5 + $0x540] sm:$0xf] }
  0xc7   :  { %1047 = vmatpush.bf16.msra.mxu1 %v3007_v10  ;;  %v4588_v10 = vld [vmem:[%s7041_s5 + $0x384] sm:$0xf]  ;;  %v4648_v55 = vld [vmem:[%s7041_s5 + $0x55c] sm:$0xf0] }
  0xc8   :  { %1055 = vmatpush.bf16.msra.mxu2 %v3215_v1  ;;  %3443 = vmatmul.msk.bf16.vlgmr.msra.gmra.mxu0 %vm135_vm0, %v5275_v9  ;;  %v3164_v9 = vld [vmem:[%s7039_s3 + $0x158] sm:$0xf0]  ;;  %v4488_v1 = vld [vmem:[%s7041_s5 + $0x5c] sm:$0xf0]  ;;  %v4119_v57 = vor.u32 %v4648_v55, %v4118_v54 }
  0xc9   :  { %2465 = vmatpush.bf16.msrb.mxu0 %v3671_v2  ;;  %1068 = vmatpush.bf16.msra.mxu3 %v3343_v6  ;;  %v3167_v38 = vor.u32 %v4405_v32, %v3164_v9  ;;  %v3479_v2 = vor.u32 %v4488_v1, %v3478_v0  ;;  %v4596_v6 = vld [vmem:[%s7041_s5 + $0x3c4] sm:$0xf]  ;;  %v3702_v9 = vld [vmem:[%s7041_s5 + $0x200] sm:$0xf] }
  0xca   :  { %1048 = vmatmul.bf16.vlgmr.msra.gmra.mxu1 %v5222_v40  ;;  %v3574_v40 = vld [vmem:[%s7041_s5 + $0x100] sm:$0xf]  ;;  %v3931_v8 = vor.u32 %v4596_v6, %v3928_v7  ;;  %v3703_v34 = vor.u32 %v4544_v33, %v3702_v9  ;;  %v4088_v0 = vld [vmem:[%s7041_s5 + $0x520] sm:$0xf0] }
  0xcb   :  { %2478 = vmatpush.bf16.msrb.mxu1 %v3927_v15  ;;  %v3575_v48 = vor.u32 %v4512_v36, %v3574_v40  ;;  %v3798_v15 = vld [vmem:[%s7041_s5 + $0x2c0] sm:$0xf]  ;;  %v4660_v36 = vld [vmem:[%s7041_s5 + $0x5c4] sm:$0xf] }
  0xcc   :  { %1056 = vmatpush.bf16.msra.mxu2 %v3199_v16  ;;  %v4568_v16 = vld [vmem:[%s7041_s5 + $0x2dc] sm:$0xf0]  ;;  %v4628_v6 = vld [vmem:[%s7041_s5 + $0x4c4] sm:$0xf] }
  0xcd   :  { %1069 = vmatpush.bf16.msra.mxu3 %v3327_v19  ;;  %2466 = vmatpush.bf16.msrb.mxu0 %v3639_v24  ;;  %v3799_v17 = vor.u32 %v4568_v16, %v3798_v15  ;;  %v3832_v19 = vld [vmem:[%s7041_s5 + $0x320] sm:$0xf0]  ;;  %v4664_v40 = vld [vmem:[%s7041_s5 + $0x5dc] sm:$0xf0]  ;;  %v4023_v15 = vor.u32 %v4624_v13, %v4022_v12  ;;  %v4649_v13 = vld [vmem:[%s7041_s5 + $0x564] sm:$0xf0] }
  0xce   :  { %v3835_v21 = vor.u32 %v4572_v18, %v3832_v19  ;;  %v4564_v24 = vld [vmem:[%s7041_s5 + $0x2c4] sm:$0xf]  ;;  %v3990_v19 = vld [vmem:[%s7041_s5 + $0x440] sm:$0xf] }
  0xcf   :  { %2479 = vmatpush.bf16.msrb.mxu1 %v3895_v27  ;;  %v3803_v26 = vor.u32 %v4564_v24, %v3800_v25  ;;  %v3734_v27 = vld [vmem:[%s7041_s5 + $0x240] sm:$0xf]  ;;  %v4024_v16 = vld [vmem:[%s7041_s5 + $0x4a0] sm:$0xf0] }
  0xd0   :  { %1057 = vmatpush.bf16.msra.mxu2 %v3183_v28  ;;  %v4552_v28 = vld [vmem:[%s7041_s5 + $0x25c] sm:$0xf0]  ;;  %v3992_v24 = vld [vmem:[%s7041_s5 + $0x460] sm:$0xf0] }
  0xd1   :  { %1070 = vmatpush.bf16.msra.mxu3 %v3311_v31  ;;  %2467 = vmatpush.bf16.msrb.mxu0 %v3607_v35  ;;  %v3735_v29 = vor.u32 %v4552_v28, %v3734_v27  ;;  %v3768_v31 = vld [vmem:[%s7041_s5 + $0x2a0] sm:$0xf0]  ;;  %v4182_v35 = vld [vmem:[%s7041_s5 + $0x5c0] sm:$0xf] }
  0xd2   :  { %v3771_v32 = vor.u32 %v4556_v30, %v3768_v31  ;;  %v4616_v20 = vld [vmem:[%s7041_s5 + $0x45c] sm:$0xf0]  ;;  %v4604_v9 = vld [vmem:[%s7041_s5 + $0x404] sm:$0xf] }
  0xd3   :  { %2480 = vmatpush.bf16.msrb.mxu1 %v3863_v37  ;;  %v4183_v37 = vor.u32 %v4664_v40, %v4182_v35  ;;  %v4310_v27 = vld [vmem:[%s7041_s5 + $0x6c0] sm:$0xf]  ;;  %v4692_v35 = vld [vmem:[%s7041_s5 + $0x6c4] sm:$0xf] }
  0xd4   :  { %1058 = vmatpush.bf16.msra.mxu2 %v3167_v38  ;;  %v4184_v38 = vld [vmem:[%s7041_s5 + $0x5e0] sm:$0xf0]  ;;  %v4696_v28 = vld [vmem:[%s7041_s5 + $0x6dc] sm:$0xf0] }
  0xd5   :  { %1071 = vmatpush.bf16.msra.mxu3 %v3295_v42  ;;  %2468 = vmatpush.bf16.msrb.mxu0 %v3575_v48  ;;  %v4187_v42 = vor.u32 %v4660_v36, %v4184_v38  ;;  %v4151_v48 = vor.u32 %v4656_v46, %v4150_v44  ;;  %v4311_v30 = vor.u32 %v4696_v28, %v4310_v27  ;;  %v3958_v31 = vld [vmem:[%s7041_s5 + $0x400] sm:$0xf]  ;;  %v4190_v44 = vld [vmem:[%s7041_s5 + $0x5c8] sm:$0xf]  ;;  %v4516_v27 = vld [vmem:[%s7041_s5 + $0x144] sm:$0xf] }
  0xd6   :  { %v4246_v54 = vld [vmem:[%s7041_s5 + $0x640] sm:$0xf]  ;;  %v3608_v28 = vld [vmem:[%s7041_s5 + $0x160] sm:$0xf0] }
  0xd7   :  { %2481 = vmatpush.bf16.msrb.mxu1 %v3831_v51  ;;  %v3704_v51 = vld [vmem:[%s7041_s5 + $0x220] sm:$0xf0]  ;;  %v4680_v55 = vld [vmem:[%s7041_s5 + $0x65c] sm:$0xf0] }
  0xd8   :  { %1059 = vmatpush.bf16.msra.mxu2 %v3151_v52  ;;  %v4155_v52 = vor.u32 %v4652_v47, %v4152_v49  ;;  %v4665_v49 = vld [vmem:[%s7041_s5 + $0x5e4] sm:$0xf0] }
  0xd9   :  { %1072 = vmatpush.bf16.msra.mxu3 %v3279_v53  ;;  %2469 = vmatpush.bf16.msrb.mxu0 %v3543_v58  ;;  %v3707_v53 = vor.u32 %v4540_v50, %v3704_v51  ;;  %v4120_v58 = vld [vmem:[%s7041_s5 + $0x560] sm:$0xf0] }
  0xda   :  { %v4123_v59 = vor.u32 %v4644_v56, %v4120_v58  ;;  %v4684_v50 = vld [vmem:[%s7041_s5 + $0x684] sm:$0xf]  ;;  %v4191_v58 = vor.u32 %v4665_v49, %v4190_v44  ;;  %v4625_v44 = vld [vmem:[%s7041_s5 + $0x4a4] sm:$0xf0] }
  0xdb   :  { %2482 = vmatpush.bf16.msrb.mxu1 %v3799_v17  ;;  %v4280_v51 = vld [vmem:[%s7041_s5 + $0x6a0] sm:$0xf0] }
  0xdc   :  { %1060 = vmatpush.bf16.msra.mxu2 %v3135_v61  ;;  %v4640_v61 = vld [vmem:[%s7041_s5 + $0x51c] sm:$0xf0]  ;;  %v4500_v49 = vld [vmem:[%s7041_s5 + $0xc4] sm:$0xf] }
  0xdd   :  { %1073 = vmatpush.bf16.msra.mxu3 %v3263_v62  ;;  %2470 = vmatpush.bf16.msrb.mxu0 %v3511_v63  ;;  %v4636_v62 = vld [vmem:[%s7041_s5 + $0x504] sm:$0xf]  ;;  %v4087_v63 = vor.u32 %v4640_v61, %v4086_v60  ;;  %v4657_v61 = vld [vmem:[%s7041_s5 + $0x5a4] sm:$0xf0] }
  0xde   :  { %v4091_v1 = vor.u32 %v4636_v62, %v4088_v0  ;;  %v4676_v62 = vld [vmem:[%s7041_s5 + $0x644] sm:$0xf] }
  0xdf   :  { %1061 = vmatmul.bf16.vlgmr.msra.gmra.mxu2 %v5230_v45  ;;  %v3447_v45 = vor.u32 %v4480_v5, %v3446_v4  ;;  %2483 = vmatpush.bf16.msrb.mxu1 %v3767_v23  ;;  %v4054_v4 = vld [vmem:[%s7041_s5 + $0x4c0] sm:$0xf]  ;;  %v3991_v23 = vor.u32 %v4616_v20, %v3990_v19 }
  0xe0   :  { %1074 = vmatmul.bf16.vlgmr.msra.gmra.mxu3 %v5264_v3  ;;  %v3899_v3 = vor.u32 %v4588_v10, %v3896_v11  ;;  %2491 = vmatpush.bf16.msrb.mxu2 %v4183_v37  ;;  %v4632_v5 = vld [vmem:[%s7041_s5 + $0x4dc] sm:$0xf0]  ;;  %v4312_v37 = vld [vmem:[%s7041_s5 + $0x6e0] sm:$0xf0] }
  0xe1   :  { %2471 = vmatpush.bf16.msrb.mxu0 %v3479_v2  ;;  %v5769_v2 = vld [vmem:[%s7040_s4] sm:$0xf]  ;;  %2508 = vmatpush.bf16.msrb.mxu3 %v4311_v30  ;;  %v4315_v41 = vor.u32 %v4692_v35, %v4312_v37 }
  0xe2   :  { %v314_v19 = vperm.slane %v5769_v2, 1 }
  0xe3   :  { %2484 = vmatpush.bf16.msrb.mxu1 %v3735_v29 }
  0xe4   :  { %2492 = vmatpush.bf16.msrb.mxu2 %v4151_v48 }
  0xe5   :  { %2472 = vmatpush.bf16.msrb.mxu0 %v3447_v45  ;;  %v4055_v45 = vor.u32 %v4632_v5, %v4054_v4  ;;  %v4214_v4 = vld [vmem:[%s7041_s5 + $0x600] sm:$0xf] }
  0xe6   :  { %v4672_v5 = vld [vmem:[%s7041_s5 + $0x61c] sm:$0xf0] }
  0xe7   :  { %2485 = vmatpush.bf16.msrb.mxu1 %v3703_v34  ;;  %v3960_v34 = vld [vmem:[%s7041_s5 + $0x420] sm:$0xf0] }
  0xe8   :  { %2493 = vmatpush.bf16.msrb.mxu2 %v4119_v57  ;;  %v3963_v36 = vor.u32 %v4604_v9, %v3960_v34  ;;  %v4247_v57 = vor.u32 %v4680_v55, %v4246_v54  ;;  %v4633_v9 = vld [vmem:[%s7041_s5 + $0x4e4] sm:$0xf0] }
  0xe9   :  { %2530 = vmatpush.bf16.msra.mxu0 %v3931_v8  ;;  %v4056_v8 = vld [vmem:[%s7041_s5 + $0x4e0] sm:$0xf0]  ;;  %v3998_v55 = vld [vmem:[%s7041_s5 + $0x448] sm:$0xf] }
  0xea   :  { %v4059_v11 = vor.u32 %v4628_v6, %v4056_v8  ;;  %v3672_v8 = vld [vmem:[%s7041_s5 + $0x1e0] sm:$0xf0] }
  0xeb   :  { %2543 = vmatpush.bf16.msra.mxu1 %v4187_v42  ;;  %v4278_v42 = vld [vmem:[%s7041_s5 + $0x680] sm:$0xf] }
  0xec   :  { %2494 = vmatpush.bf16.msrb.mxu2 %v4087_v63  ;;  %v4248_v63 = vld [vmem:[%s7041_s5 + $0x660] sm:$0xf0] }
  0xed   :  { %2531 = vmatpush.bf16.msra.mxu0 %v3899_v3  ;;  %v313_v3 = vperm.slane %v5769_v2, 0 }
  0xef   :  { %2544 = vmatpush.bf16.msra.mxu1 %v4155_v52 }
  0xf0   :  { %2495 = vmatpush.bf16.msrb.mxu2 %v4055_v45  ;;  %v4532_v45 = vld [vmem:[%s7041_s5 + $0x1c4] sm:$0xf] }
  0xf1   :  { %2532 = vmatpush.bf16.msra.mxu0 %v3867_v14  ;;  %v4620_v14 = vld [vmem:[%s7041_s5 + $0x484] sm:$0xf] }
  0xf2   :  { %v4027_v17 = vor.u32 %v4620_v14, %v4024_v16  ;;  %v4668_v14 = vld [vmem:[%s7041_s5 + $0x604] sm:$0xf] }
  0xf3   :  { %2545 = vmatpush.bf16.msra.mxu1 %v4123_v59  ;;  %v4158_v59 = vld [vmem:[%s7041_s5 + $0x588] sm:$0xf] }
  0xf4   :  { %2496 = vmatpush.bf16.msrb.mxu2 %v4023_v15  ;;  %v4216_v15 = vld [vmem:[%s7041_s5 + $0x620] sm:$0xf0] }
  0xf5   :  { %2533 = vmatpush.bf16.msra.mxu0 %v3835_v21  ;;  %v4612_v21 = vld [vmem:[%s7041_s5 + $0x444] sm:$0xf] }
  0xf7   :  { %2546 = vmatpush.bf16.msra.mxu1 %v4091_v1  ;;  %v4251_v1 = vor.u32 %v4676_v62, %v4248_v63  ;;  %v315_v63 = vperm.slane %v5769_v2, 2 }
  0xf8   :  { %2497 = vmatpush.bf16.msrb.mxu2 %v3991_v23  ;;  %v4641_v23 = vld [vmem:[%s7041_s5 + $0x524] sm:$0xf0] }
  0xf9   :  { %2534 = vmatpush.bf16.msra.mxu0 %v3803_v26  ;;  %v3995_v26 = vor.u32 %v4612_v21, %v3992_v24  ;;  %v3640_v21 = vld [vmem:[%s7041_s5 + $0x1a0] sm:$0xf0] }
  0xfb   :  { %2547 = vmatpush.bf16.msra.mxu1 %v4059_v11  ;;  %v4126_v11 = vld [vmem:[%s7041_s5 + $0x548] sm:$0xf] }
  0xfc   :  { %v4127_v20 = vor.u32 %v4649_v13, %v4126_v11  ;;  %v4254_v11 = vld [vmem:[%s7041_s5 + $0x648] sm:$0xf] }
  0xfd   :  { %2535 = vmatpush.bf16.msra.mxu0 %v3771_v32  ;;  %v4608_v32 = vld [vmem:[%s7041_s5 + $0x41c] sm:$0xf0] }
  0xfe   :  { %v3959_v33 = vor.u32 %v4608_v32, %v3958_v31  ;;  %v3611_v31 = vor.u32 %v4516_v27, %v3608_v28  ;;  %v4062_v32 = vld [vmem:[%s7041_s5 + $0x4c8] sm:$0xf]  ;;  %v4288_v28 = vld [vmem:[%s7041_s5 + $0x6a8] sm:$0xf0] }
  0xff   :  { %2548 = vmatpush.bf16.msra.mxu1 %v4027_v17  ;;  %v4219_v17 = vor.u32 %v4668_v14, %v4216_v15  ;;  %v4320_v14 = vld [vmem:[%s7041_s5 + $0x6e8] sm:$0xf0]  ;;  %v4484_v15 = vld [vmem:[%s7041_s5 + $0x44] sm:$0xf] }
 0x100   :  { %2498 = vmatpush.bf16.msrb.mxu2 %v3959_v33 }
 0x101   :  { %2536 = vmatpush.bf16.msra.mxu0 %v3739_v43  ;;  %v4688_v43 = vld [vmem:[%s7041_s5 + $0x69c] sm:$0xf0] }
 0x102   :  { %v4279_v46 = vor.u32 %v4688_v43, %v4278_v42 }
 0x103   :  { %2549 = vmatpush.bf16.msra.mxu1 %v3995_v26 }
 0x104   :  { %2560 = vmatpush.bf16.msra.mxu2 %v4315_v41  ;;  %2509 = vmatpush.bf16.msrb.mxu3 %v4279_v46  ;;  %v4030_v41 = vld [vmem:[%s7041_s5 + $0x488] sm:$0xf] }
 0x105   :  { %2537 = vmatpush.bf16.msra.mxu0 %v3707_v53  ;;  %v4283_v53 = vor.u32 %v4684_v50, %v4280_v51  ;;  %v4318_v46 = vld [vmem:[%s7041_s5 + $0x6c8] sm:$0xf]  ;;  %v3544_v50 = vld [vmem:[%s7041_s5 + $0xe0] sm:$0xf0] }
 0x107   :  { %2550 = vmatpush.bf16.msra.mxu1 %v3963_v36  ;;  %v3576_v36 = vld [vmem:[%s7041_s5 + $0x120] sm:$0xf0] }
 0x108   :  { %2561 = vmatpush.bf16.msra.mxu2 %v4283_v53  ;;  %2510 = vmatpush.bf16.msrb.mxu3 %v4247_v57  ;;  %v4031_v53 = vor.u32 %v4625_v44, %v4030_v41  ;;  %v4677_v41 = vld [vmem:[%s7041_s5 + $0x64c] sm:$0xf] }
 0x10c   :  { %2562 = vmatpush.bf16.msra.mxu2 %v4251_v1  ;;  %v3512_v1 = vld [vmem:[%s7041_s5 + $0xa0] sm:$0xf0] }
 0x110   :  { %2563 = vmatpush.bf16.msra.mxu2 %v4219_v17 }
 0x114   :  { %v893_v7 = vpop.f32.mrf.mxu0 }
 0x115   :  { %v906_v10 = vpop.f32.mrf.mxu1  ;;  %v894_v18 = vadd.f32 %v893_v7, %v313_v3  ;;  %v4215_v7 = vor.u32 %v4672_v5, %v4214_v4  ;;  %v3675_v3 = vor.u32 %v4532_v45, %v3672_v8  ;;  %v4609_v45 = vld [vmem:[%s7041_s5 + $0x424] sm:$0xf0] }
 0x117   :  { %v907_v29 = vadd.f32 %v906_v10, %v894_v18  ;;  %v4159_v10 = vor.u32 %v4657_v61, %v4158_v59  ;;  %2511 = vmatpush.bf16.msrb.mxu3 %v4215_v7  ;;  %v4524_v18 = vld [vmem:[%s7041_s5 + $0x184] sm:$0xf]  ;;  %v4286_v59 = vld [vmem:[%s7041_s5 + $0x688] sm:$0xf] }
 0x118   :  { %v3643_v24 = vor.u32 %v4524_v18, %v3640_v21  ;;  %v4689_v61 = vld [vmem:[%s7041_s5 + $0x6a4] sm:$0xf0] }
 0x119   :  { %v3966_v7 = vld [vmem:[%s7041_s5 + $0x408] sm:$0xf] }
 0x11b   :  { %2517 = vmatpush.bf16.msra.mxu3 %v3675_v3  ;;  %v4681_v3 = vld [vmem:[%s7041_s5 + $0x664] sm:$0xf0] }
 0x11c   :  { %v895_v22 = vpop.f32.mrf.mxu0 }
 0x11d   :  { %v908_v25 = vpop.f32.mrf.mxu1  ;;  %v4094_v22 = vld [vmem:[%s7041_s5 + $0x508] sm:$0xf] }
 0x11e   :  { %v4095_v30 = vor.u32 %v4641_v23, %v4094_v22  ;;  %v4685_v23 = vld [vmem:[%s7041_s5 + $0x68c] sm:$0xf] }
 0x11f   :  { %2518 = vmatpush.bf16.msra.mxu3 %v3643_v24  ;;  %v4222_v24 = vld [vmem:[%s7041_s5 + $0x608] sm:$0xf] }
 0x122   :  { %v919_v40 = vpop.f32.mrf.mxu2 }
 0x123   :  { %v920_v38 = vadd.f32 %v919_v40, %v907_v29  ;;  %v932_v39 = vpop.f32.mrf.mxu3  ;;  %2519 = vmatpush.bf16.msra.mxu3 %v3611_v31  ;;  %v4508_v40 = vld [vmem:[%s7041_s5 + $0x104] sm:$0xf] }
 0x124   :  { %v958_v48 = vpop.f32.mrf.mxu0 }
 0x125   :  { %v933_v47 = vadd.f32 %v932_v39, %v920_v38  ;;  %v5850_v52 = vpop.f32.mrf.mxu1  ;;  %v4063_v38 = vor.u32 %v4633_v9, %v4062_v32  ;;  %v3579_v39 = vor.u32 %v4508_v40, %v3576_v36  ;;  %v4291_v36 = vor.u32 %v4685_v23, %v4288_v28  ;;  %v3552_v23 = vld [vmem:[%s7041_s5 + $0xe8] sm:$0xf0] }
 0x127   :  { %v1092_v56 = vmax.f32 %v933_v47, 0.0  ;;  %v4697_v47 = vld [vmem:[%s7041_s5 + $0x6e4] sm:$0xf0]  ;;  %2520 = vmatpush.bf16.msra.mxu3 %v3579_v39 }
 0x128   :  { %v4319_v54 = vor.u32 %v4697_v47, %v4318_v46  ;;  %v3646_v47 = vld [vmem:[%s7041_s5 + $0x188] sm:$0xf] }
 0x129   :  { %v5861_v60 = vpack.c.bf16 %v1092_v56, %v1092_v56 }
 0x12a   :  { %v921_v0 = vpop.f32.mrf.mxu2 }
 0x12b   :  { %v934_v6 = vpop.f32.mrf.mxu3  ;;  %2473 = vmatmul.bf16.vlgmr.msrb.gmra.mxu0 %v5861_v60  ;;  %v4492_v0 = vld [vmem:[%s7041_s5 + $0x84] sm:$0xf] }
 0x12c   :  { %2595 = vmatpush.bf16.msrb.mxu0 %v4191_v58  ;;  %v960_v12 = vpop.f32.mrf.mxu0  ;;  %v4617_v58 = vld [vmem:[%s7041_s5 + $0x464] sm:$0xf0]  ;;  %v3515_v4 = vor.u32 %v4492_v0, %v3512_v1  ;;  %v4287_v6 = vor.u32 %v4689_v61, %v4286_v59  ;;  %v4538_v59 = vld [vmem:[%s7041_s5 + $0x1ec] sm:$0xf0]  ;;  %v4517_v1 = vld [vmem:[%s7041_s5 + $0x14c] sm:$0xf] }
 0x12d   :  { %v973_v16 = vpop.f32.mrf.mxu1  ;;  %v3999_v5 = vor.u32 %v4617_v58, %v3998_v55  ;;  %v4224_v55 = vld [vmem:[%s7041_s5 + $0x628] sm:$0xf0]  ;;  %v3686_v58 = vld [vmem:[%s7041_s5 + $0x1d0] sm:$0xf] }
 0x12e   :  { %v3480_v16 = vld [vmem:[%s7041_s5 + $0x60] sm:$0xf0] }
 0x12f   :  { %v3483_v17 = vor.u32 %v4484_v15, %v3480_v16  ;;  %v3622_v15 = vld [vmem:[%s7041_s5 + $0x150] sm:$0xf] }
 0x130   :  { %2596 = vmatpush.bf16.msrb.mxu0 %v4159_v10  ;;  %v4693_v10 = vld [vmem:[%s7041_s5 + $0x6cc] sm:$0xf]  ;;  %v4522_v16 = vld [vmem:[%s7041_s5 + $0x16c] sm:$0xf0] }
 0x131   :  { %v4323_v22 = vor.u32 %v4693_v10, %v4320_v14  ;;  %v3582_v10 = vld [vmem:[%s7041_s5 + $0x108] sm:$0xf] }
 0x132   :  { %v984_v25 = vpop.f32.mrf.mxu2 }
 0x133   :  { %v945_v26 = vpop.f32.mrf.mxu3 }
 0x134   :  { %v946_v29 = vadd.f32 %v945_v26, %v314_v19  ;;  %2597 = vmatpush.bf16.msrb.mxu0 %v4127_v20  ;;  %v3967_v19 = vor.u32 %v4609_v45, %v3966_v7  ;;  %v4255_v20 = vor.u32 %v4681_v3, %v4254_v11  ;;  %v3654_v7 = vld [vmem:[%s7041_s5 + $0x190] sm:$0xf]  ;;  %v4513_v11 = vld [vmem:[%s7041_s5 + $0x124] sm:$0xf0]  ;;  %v4509_v3 = vld [vmem:[%s7041_s5 + $0x10c] sm:$0xf] }
 0x135   :  { %v5922_v34 = vpop.f32.mrf.mxu0  ;;  %v4530_v45 = vld [vmem:[%s7041_s5 + $0x1ac] sm:$0xf0]  ;;  %v3583_v14 = vor.u32 %v4513_v11, %v3582_v10 }
 0x136   :  { %v959_v33 = vadd.f32 %v958_v48, %v946_v29  ;;  %v4476_v29 = vld [vmem:[%s7041_s5 + $0x4] sm:$0xf] }
 0x137   :  { %v5924_v35 = vpop.f32.mrf.mxu1 }
 0x138   :  { %v972_v37 = vadd.f32 %v5850_v52, %v959_v33  ;;  %2598 = vmatpush.bf16.msrb.mxu0 %v4095_v30  ;;  %v3547_v52 = vor.u32 %v4500_v49, %v3544_v50  ;;  %v3448_v30 = vld [vmem:[%s7041_s5 + $0x20] sm:$0xf0]  ;;  %v3678_v33 = vld [vmem:[%s7041_s5 + $0x1c8] sm:$0xf] }
 0x139   :  { %v3451_v31 = vor.u32 %v4476_v29, %v3448_v30  ;;  %v3518_v29 = vld [vmem:[%s7041_s5 + $0x88] sm:$0xf] }
 0x13a   :  { %v985_v42 = vadd.f32 %v984_v25, %v972_v37  ;;  %v986_v43 = vpop.f32.mrf.mxu2  ;;  %2521 = vmatpush.bf16.msra.mxu3 %v3547_v52  ;;  %v4673_v25 = vld [vmem:[%s7041_s5 + $0x624] sm:$0xf0]  ;;  %v4533_v37 = vld [vmem:[%s7041_s5 + $0x1cc] sm:$0xf] }
 0x13b   :  { %v947_v48 = vpop.f32.mrf.mxu3  ;;  %v4223_v9 = vor.u32 %v4673_v25, %v4222_v24  ;;  %v3648_v52 = vld [vmem:[%s7041_s5 + $0x1a8] sm:$0xf0]  ;;  %v3623_v24 = vor.u32 %v4522_v16, %v3622_v15  ;;  %v4497_v30 = vld [vmem:[%s7041_s5 + $0xa4] sm:$0xf0] }
 0x13c   :  { %v1093_v51 = vmax.f32 %v985_v42, 0.0  ;;  %2599 = vmatpush.bf16.msrb.mxu0 %v4063_v38  ;;  %v4256_v42 = vld [vmem:[%s7041_s5 + $0x668] sm:$0xf0]  ;;  %v4529_v48 = vld [vmem:[%s7041_s5 + $0x1a4] sm:$0xf0] }
 0x13d   :  { %v1025_v57 = vpop.f32.mrf.mxu0  ;;  %v4259_v50 = vor.u32 %v4677_v41, %v4256_v42  ;;  %v4489_v41 = vld [vmem:[%s7041_s5 + $0x64] sm:$0xf0]  ;;  %v4589_v15 = vld [vmem:[%s7041_s5 + $0x38c] sm:$0xf] }
 0x13e   :  { %v5954_v56 = vpack.c.bf16 %v1093_v51, %v1093_v51  ;;  %2522 = vmatpush.bf16.msra.mxu3 %v3515_v4  ;;  %v4525_v51 = vld [vmem:[%s7041_s5 + $0x18c] sm:$0xf]  ;;  %v3647_v57 = vor.u32 %v4529_v48, %v3646_v47  ;;  %v3934_v48 = vld [vmem:[%s7041_s5 + $0x3c8] sm:$0xf] }
 0x13f   :  { %v1038_v62 = vpop.f32.mrf.mxu1  ;;  %v3651_v61 = vor.u32 %v4525_v51, %v3648_v52  ;;  %v3616_v4 = vld [vmem:[%s7041_s5 + $0x168] sm:$0xf0]  ;;  %v4601_v51 = vld [vmem:[%s7041_s5 + $0x3e4] sm:$0xf0]  ;;  %v3526_v52 = vld [vmem:[%s7041_s5 + $0x90] sm:$0xf] }
 0x140   :  { %2486 = vmatmul.bf16.vlgmr.msrb.gmra.mxu1 %v5954_v56  ;;  %2538 = vmatmul.bf16.vlgmr.msra.gmra.mxu0 %v5954_v56  ;;  %v3614_v62 = vld [vmem:[%s7041_s5 + $0x148] sm:$0xf] }
 0x141   :  { %2600 = vmatpush.bf16.msrb.mxu0 %v4031_v53  ;;  %2612 = vmatpush.bf16.msrb.mxu1 %v4319_v54  ;;  %v4669_v54 = vld [vmem:[%s7041_s5 + $0x60c] sm:$0xf] }
 0x142   :  { %v997_v8 = vpop.f32.mrf.mxu2  ;;  %2523 = vmatpush.bf16.msra.mxu3 %v3483_v17  ;;  %v4227_v0 = vor.u32 %v4669_v54, %v4224_v55  ;;  %v4481_v55 = vld [vmem:[%s7041_s5 + $0x24] sm:$0xf0] }
 0x143   :  { %v998_v12 = vadd.f32 %v997_v8, %v315_v63  ;;  %v1010_v13 = vpop.f32.mrf.mxu3  ;;  %v4521_v63 = vld [vmem:[%s7041_s5 + $0x164] sm:$0xf0]  ;;  %v3619_v8 = vor.u32 %v4517_v1, %v3616_v4  ;;  %v3942_v1 = vld [vmem:[%s7041_s5 + $0x3d0] sm:$0xf] }
 0x144   :  { %v4602_v4 = vld [vmem:[%s7041_s5 + $0x3ec] sm:$0xf0] }
 0x145   :  { %v1011_v18 = vadd.f32 %v1010_v13, %v998_v12  ;;  %2601 = vmatpush.bf16.msrb.mxu0 %v3999_v5  ;;  %2613 = vmatpush.bf16.msrb.mxu1 %v4287_v6  ;;  %v5998_v21 = vpop.f32.mrf.mxu0  ;;  %v3687_v5 = vor.u32 %v4538_v59, %v3686_v58  ;;  %v3615_v6 = vor.u32 %v4521_v63, %v3614_v62  ;;  %v3584_v12 = vld [vmem:[%s7041_s5 + $0x128] sm:$0xf0] }
 0x146   :  { %2524 = vmatpush.bf16.msra.mxu3 %v3451_v31  ;;  %v3655_v13 = vor.u32 %v4530_v45, %v3654_v7  ;;  %v3587_v17 = vor.u32 %v4509_v3, %v3584_v12  ;;  %v3456_v59 = vld [vmem:[%s7041_s5 + $0x28] sm:$0xf0]  ;;  %v3935_v63 = vor.u32 %v4601_v51, %v3934_v48  ;;  %v3902_v45 = vld [vmem:[%s7041_s5 + $0x388] sm:$0xf]  ;;  %v3943_v12 = vor.u32 %v4602_v4, %v3942_v1  ;;  %v4574_v1 = vld [vmem:[%s7041_s5 + $0x314] sm:$0xf] }
 0x147   :  { %v1024_v26 = vadd.f32 %v5922_v34, %v1011_v18  ;;  %v6010_v27 = vpop.f32.mrf.mxu1  ;;  %v4537_v34 = vld [vmem:[%s7041_s5 + $0x1e4] sm:$0xf0] }
 0x148   :  { %v3679_v43 = vor.u32 %v4537_v34, %v3678_v33  ;;  %v3550_v18 = vld [vmem:[%s7041_s5 + $0xc8] sm:$0xf] }
 0x149   :  { %v1037_v32 = vadd.f32 %v5924_v35, %v1024_v26  ;;  %2602 = vmatpush.bf16.msrb.mxu0 %v3967_v19  ;;  %2614 = vmatpush.bf16.msrb.mxu1 %v4255_v20  ;;  %v3680_v35 = vld [vmem:[%s7041_s5 + $0x1e8] sm:$0xf0]  ;;  %v4505_v19 = vld [vmem:[%s7041_s5 + $0xe4] sm:$0xf0]  ;;  %v316_v20 = vperm.slane %v5769_v2, 3 }
 0x14a   :  { %v999_v40 = vpop.f32.mrf.mxu2  ;;  %v3683_v46 = vor.u32 %v4533_v37, %v3680_v35  ;;  %v3551_v25 = vor.u32 %v4505_v19, %v3550_v18  ;;  %v3590_v26 = vld [vmem:[%s7041_s5 + $0x110] sm:$0xf]  ;;  %v3519_v37 = vor.u32 %v4497_v30, %v3518_v29  ;;  %v3944_v29 = vld [vmem:[%s7041_s5 + $0x3f0] sm:$0xf0]  ;;  %v3806_v48 = vld [vmem:[%s7041_s5 + $0x2c8] sm:$0xf] }
 0x14b   :  { %v1094_v38 = vmax.f32 %v1037_v32, 0.0  ;;  %v1012_v39 = vpop.f32.mrf.mxu3  ;;  %v4514_v2 = vld [vmem:[%s7041_s5 + $0x12c] sm:$0xf0]  ;;  %v1050_v31 = vadd.f32 %v6010_v27, %v316_v20  ;;  %v4493_v32 = vld [vmem:[%s7041_s5 + $0x8c] sm:$0xf] }
 0x14c   :  { %v3591_v34 = vor.u32 %v4514_v2, %v3590_v26  ;;  %v3558_v35 = vld [vmem:[%s7041_s5 + $0xd0] sm:$0xf]  ;;  %v3486_v39 = vld [vmem:[%s7041_s5 + $0x48] sm:$0xf] }
 0x14d   :  { %2664 = vmatpush.bf16.msra.mxu0 %v4323_v22  ;;  %v6040_v44 = vpack.c.bf16 %v1094_v38, %v1094_v38  ;;  %2615 = vmatpush.bf16.msrb.mxu1 %v4223_v9  ;;  %v1090_v49 = vpop.f32.mrf.mxu0  ;;  %v4501_v22 = vld [vmem:[%s7041_s5 + $0xcc] sm:$0xf]  ;;  %v4506_v27 = vld [vmem:[%s7041_s5 + $0xec] sm:$0xf0]  ;;  %v3870_v20 = vld [vmem:[%s7041_s5 + $0x348] sm:$0xf] }
 0x14e   :  { %v3555_v28 = vor.u32 %v4501_v22, %v3552_v23  ;;  %v3520_v9 = vld [vmem:[%s7041_s5 + $0xa8] sm:$0xf0]  ;;  %v3559_v47 = vor.u32 %v4506_v27, %v3558_v35  ;;  %v3910_v18 = vld [vmem:[%s7041_s5 + $0x390] sm:$0xf]  ;;  %v4585_v22 = vld [vmem:[%s7041_s5 + $0x364] sm:$0xf0] }
 0x14f   :  { %v1051_v53 = vpop.f32.mrf.mxu1  ;;  %2499 = vmatmul.bf16.vlgmr.msrb.gmra.mxu2 %v6040_v44  ;;  %v3523_v38 = vor.u32 %v4493_v32, %v3520_v9  ;;  %v4594_v19 = vld [vmem:[%s7041_s5 + $0x3ac] sm:$0xf0]  ;;  %v3871_v30 = vor.u32 %v4585_v22, %v3870_v20  ;;  %v3872_v32 = vld [vmem:[%s7041_s5 + $0x368] sm:$0xf0]  ;;  %v4590_v27 = vld [vmem:[%s7041_s5 + $0x394] sm:$0xf] }
 0x150   :  { %2551 = vmatmul.bf16.vlgmr.msra.gmra.mxu1 %v6040_v44  ;;  %2569 = vmatpush.bf16.msrb.mxu2 %v3679_v43  ;;  %v4485_v43 = vld [vmem:[%s7041_s5 + $0x4c] sm:$0xf]  ;;  %v4498_v53 = vld [vmem:[%s7041_s5 + $0xac] sm:$0xf0]  ;;  %v3911_v26 = vor.u32 %v4594_v19, %v3910_v18 }
 0x151   :  { %2665 = vmatpush.bf16.msra.mxu0 %v4291_v36  ;;  %2621 = vmatpush.bf16.msra.mxu1 %v3683_v46  ;;  %v3488_v46 = vld [vmem:[%s7041_s5 + $0x68] sm:$0xf0]  ;;  %v3527_v10 = vor.u32 %v4498_v53, %v3526_v52  ;;  %v4482_v2 = vld [vmem:[%s7041_s5 + $0x2c] sm:$0xf0]  ;;  %v4582_v52 = vld [vmem:[%s7041_s5 + $0x354] sm:$0xf] }
 0x152   :  { %2603 = vmatmul.bf16.vlgmr.msrb.gmra.mxu0 %v6040_v44  ;;  %v3491_v54 = vor.u32 %v4485_v43, %v3488_v46  ;;  %v3878_v9 = vld [vmem:[%s7041_s5 + $0x350] sm:$0xf]  ;;  %v3840_v43 = vld [vmem:[%s7041_s5 + $0x328] sm:$0xf0] }
 0x153   :  { %v3846_v46 = vld [vmem:[%s7041_s5 + $0x310] sm:$0xf]  ;;  %v4549_v18 = vld [vmem:[%s7041_s5 + $0x24c] sm:$0xf] }
 0x154   :  { %2570 = vmatpush.bf16.msrb.mxu2 %v3647_v57  ;;  %v4477_v57 = vld [vmem:[%s7041_s5 + $0xc] sm:$0xf]  ;;  %v3750_v22 = vld [vmem:[%s7041_s5 + $0x250] sm:$0xf] }
 0x155   :  { %2666 = vmatpush.bf16.msra.mxu0 %v4259_v50  ;;  %2622 = vmatpush.bf16.msra.mxu1 %v3651_v61  ;;  %v3487_v50 = vor.u32 %v4489_v41, %v3486_v39  ;;  %v4597_v61 = vld [vmem:[%s7041_s5 + $0x3cc] sm:$0xf]  ;;  %v3459_v11 = vor.u32 %v4477_v57, %v3456_v59  ;;  %v3912_v41 = vld [vmem:[%s7041_s5 + $0x3b0] sm:$0xf0]  ;;  %v4570_v59 = vld [vmem:[%s7041_s5 + $0x2ec] sm:$0xf0] }
 0x156   :  { %v3744_v19 = vld [vmem:[%s7041_s5 + $0x268] sm:$0xf0] }
 0x158   :  { %2571 = vmatpush.bf16.msrb.mxu2 %v3615_v6 }
 0x159   :  { %2667 = vmatpush.bf16.msra.mxu0 %v4227_v0  ;;  %2623 = vmatpush.bf16.msra.mxu1 %v3619_v8  ;;  %v3936_v0 = vld [vmem:[%s7041_s5 + $0x3e8] sm:$0xf0]  ;;  %v4593_v8 = vld [vmem:[%s7041_s5 + $0x3a4] sm:$0xf0] }
 0x15a   :  { %v3939_v3 = vor.u32 %v4597_v61, %v3936_v0  ;;  %v3903_v16 = vor.u32 %v4593_v8, %v3902_v45  ;;  %v3774_v61 = vld [vmem:[%s7041_s5 + $0x288] sm:$0xf]  ;;  %v3776_v45 = vld [vmem:[%s7041_s5 + $0x2a8] sm:$0xf0] }
 0x15c   :  { %2572 = vmatpush.bf16.msrb.mxu2 %v3583_v14  ;;  %v4490_v14 = vld [vmem:[%s7041_s5 + $0x6c] sm:$0xf0] }
 0x15d   :  { %2673 = vmatpush.bf16.msrb.mxu0 %v3687_v5  ;;  %2624 = vmatpush.bf16.msra.mxu1 %v3587_v17  ;;  %v3904_v17 = vld [vmem:[%s7041_s5 + $0x3a8] sm:$0xf0] }
 0x160   :  { %2573 = vmatpush.bf16.msrb.mxu2 %v3551_v25  ;;  %v3907_v25 = vor.u32 %v4589_v15, %v3904_v17  ;;  %v4566_v15 = vld [vmem:[%s7041_s5 + $0x2d4] sm:$0xf] }
 0x161   :  { %2674 = vmatpush.bf16.msrb.mxu0 %v3655_v13  ;;  %2625 = vmatpush.bf16.msra.mxu1 %v3555_v28  ;;  %v3494_v13 = vld [vmem:[%s7041_s5 + $0x50] sm:$0xf]  ;;  %v4598_v28 = vld [vmem:[%s7041_s5 + $0x3d4] sm:$0xf] }
 0x162   :  { %v1062_v33 = vpop.f32.mrf.mxu2  ;;  %v3495_v23 = vor.u32 %v4490_v14, %v3494_v13  ;;  %v3816_v17 = vld [vmem:[%s7041_s5 + $0x2f0] sm:$0xf0] }
 0x163   :  { %v1063_v40 = vadd.f32 %v1062_v33, %v1050_v31  ;;  %v1075_v36 = vpop.f32.mrf.mxu3  ;;  %v4581_v31 = vld [vmem:[%s7041_s5 + $0x34c] sm:$0xf]  ;;  %v4586_v33 = vld [vmem:[%s7041_s5 + $0x36c] sm:$0xf0] }
 0x164   :  { %2574 = vmatpush.bf16.msrb.mxu2 %v3519_v37  ;;  %v3947_v37 = vor.u32 %v4598_v28, %v3944_v29  ;;  %v3875_v35 = vor.u32 %v4581_v31, %v3872_v32  ;;  %v4661_v28 = vld [vmem:[%s7041_s5 + $0x5cc] sm:$0xf]  ;;  %v3784_v32 = vld [vmem:[%s7041_s5 + $0x2b0] sm:$0xf0] }
 0x165   :  { %2675 = vmatpush.bf16.msrb.mxu0 %v3623_v24  ;;  %v1076_v42 = vadd.f32 %v1075_v36, %v1063_v40  ;;  %2626 = vmatpush.bf16.msra.mxu1 %v3523_v38  ;;  %v3462_v24 = vld [vmem:[%s7041_s5 + $0x10] sm:$0xf]  ;;  %v4577_v40 = vld [vmem:[%s7041_s5 + $0x324] sm:$0xf0]  ;;  %v3879_v38 = vor.u32 %v4586_v33, %v3878_v9  ;;  %v4192_v29 = vld [vmem:[%s7041_s5 + $0x5e8] sm:$0xf0] }
 0x166   :  { %v3463_v36 = vor.u32 %v4482_v2, %v3462_v24  ;;  %v3710_v24 = vld [vmem:[%s7041_s5 + $0x208] sm:$0xf]  ;;  %v3747_v2 = vor.u32 %v4549_v18, %v3744_v19  ;;  %v4541_v9 = vld [vmem:[%s7041_s5 + $0x20c] sm:$0xf]  ;;  %v4102_v18 = vld [vmem:[%s7041_s5 + $0x510] sm:$0xf] }
 0x167   :  { %v1089_v49 = vadd.f32 %v5998_v21, %v1076_v42  ;;  %v3454_v21 = vld [vmem:[%s7041_s5 + $0x8] sm:$0xf]  ;;  %v4573_v42 = vld [vmem:[%s7041_s5 + $0x30c] sm:$0xf] }
 0x168   :  { %2575 = vmatpush.bf16.msrb.mxu2 %v3487_v50  ;;  %v3455_v7 = vor.u32 %v4481_v55, %v3454_v21  ;;  %v3915_v50 = vor.u32 %v4590_v27, %v3912_v41  ;;  %v3843_v51 = vor.u32 %v4573_v42, %v3840_v43  ;;  %v4565_v21 = vld [vmem:[%s7041_s5 + $0x2cc] sm:$0xf]  ;;  %v4666_v27 = vld [vmem:[%s7041_s5 + $0x5ec] sm:$0xf0] }
 0x169   :  { %2676 = vmatpush.bf16.msrb.mxu0 %v3591_v34  ;;  %v1095_v58 = vmax.f32 %v1089_v49, 0.0  ;;  %2627 = vmatpush.bf16.msra.mxu1 %v3491_v54  ;;  %v3838_v34 = vld [vmem:[%s7041_s5 + $0x308] sm:$0xf]  ;;  %v3880_v54 = vld [vmem:[%s7041_s5 + $0x370] sm:$0xf0] }
 0x16a   :  { %v1064_v62 = vpop.f32.mrf.mxu2  ;;  %v3839_v39 = vor.u32 %v4577_v40, %v3838_v34  ;;  %v4569_v49 = vld [vmem:[%s7041_s5 + $0x2e4] sm:$0xf0]  ;;  %v3808_v55 = vld [vmem:[%s7041_s5 + $0x2e8] sm:$0xf0]  ;;  %v3718_v40 = vld [vmem:[%s7041_s5 + $0x210] sm:$0xf] }
 0x16b   :  { %v6192_v5 = vpack.c.bf16 %v1095_v58, %v1095_v58  ;;  %v1077_v6 = vpop.f32.mrf.mxu3  ;;  %v3807_v57 = vor.u32 %v4569_v49, %v3806_v48  ;;  %v3814_v58 = vld [vmem:[%s7041_s5 + $0x2d0] sm:$0xf]  ;;  %v4561_v62 = vld [vmem:[%s7041_s5 + $0x2a4] sm:$0xf0]  ;;  %v3811_v0 = vor.u32 %v4565_v21, %v3808_v55  ;;  %v3712_v33 = vld [vmem:[%s7041_s5 + $0x228] sm:$0xf0] }
 0x16c   :  { %2576 = vmatpush.bf16.msrb.mxu2 %v3455_v7  ;;  %v3815_v4 = vor.u32 %v4570_v59, %v3814_v58  ;;  %v3848_v6 = vld [vmem:[%s7041_s5 + $0x330] sm:$0xf0]  ;;  %v4557_v7 = vld [vmem:[%s7041_s5 + $0x28c] sm:$0xf]  ;;  %v3775_v8 = vor.u32 %v4561_v62, %v3774_v61  ;;  %v3715_v42 = vor.u32 %v4541_v9, %v3712_v33  ;;  %v4634_v9 = vld [vmem:[%s7041_s5 + $0x4ec] sm:$0xf0] }
 0x16d   :  { %2677 = vmatpush.bf16.msrb.mxu0 %v3559_v47  ;;  %4340 = vmatmul.msk.bf16.vlgmr.msrb.gmra.mxu3 %vm135_vm0, %v6192_v5  ;;  %v4578_v47 = vld [vmem:[%s7041_s5 + $0x32c] sm:$0xf0]  ;;  %v3851_v13 = vor.u32 %v4574_v1, %v3848_v6  ;;  %v3779_v14 = vor.u32 %v4557_v7, %v3776_v45  ;;  %v4653_v43 = vld [vmem:[%s7041_s5 + $0x58c] sm:$0xf]  ;;  %v4550_v48 = vld [vmem:[%s7041_s5 + $0x254] sm:$0xf] }
 0x16e   :  { %4341 = vmatmul.msk.bf16.vlgmr.msra.gmra.mxu2 %vm135_vm0, %v6192_v5  ;;  %2582 = vmatpush.bf16.msrb.mxu3 %v3935_v63  ;;  %v3847_v53 = vor.u32 %v4578_v47, %v3846_v46  ;;  %v3883_v63 = vor.u32 %v4582_v52, %v3880_v54  ;;  %v4160_v46 = vld [vmem:[%s7041_s5 + $0x5a8] sm:$0xf0]  ;;  %v3752_v49 = vld [vmem:[%s7041_s5 + $0x270] sm:$0xf0]  ;;  %v4166_v52 = vld [vmem:[%s7041_s5 + $0x590] sm:$0xf] }
 0x16f   :  { %4342 = vmatmul.msk.bf16.vlgmr.msrb.gmra.mxu1 %vm135_vm0, %v6192_v5  ;;  %4343 = vmatmul.msk.bf16.vlgmr.msra.gmra.mxu0 %vm135_vm0, %v6192_v5  ;;  %v4658_v54 = vld [vmem:[%s7041_s5 + $0x5ac] sm:$0xf0]  ;;  %v4654_v21 = vld [vmem:[%s7041_s5 + $0x594] sm:$0xf]  ;;  %v4645_v58 = vld [vmem:[%s7041_s5 + $0x54c] sm:$0xf] }
 0x170   :  { %2628 = vmatpush.bf16.msra.mxu1 %v3459_v11  ;;  %2634 = vmatpush.bf16.msra.mxu2 %v3939_v3  ;;  %v4562_v11 = vld [vmem:[%s7041_s5 + $0x2ac] sm:$0xf0]  ;;  %v3742_v3 = vld [vmem:[%s7041_s5 + $0x248] sm:$0xf]  ;;  %v4168_v55 = vld [vmem:[%s7041_s5 + $0x5b0] sm:$0xf0] }
 0x171   :  { %2678 = vmatpush.bf16.msrb.mxu0 %v3527_v10  ;;  %v3782_v10 = vld [vmem:[%s7041_s5 + $0x290] sm:$0xf]  ;;  %v4128_v59 = vld [vmem:[%s7041_s5 + $0x568] sm:$0xf0]  ;;  %v4542_v61 = vld [vmem:[%s7041_s5 + $0x214] sm:$0xf] }
 0x172   :  { %2583 = vmatpush.bf16.msrb.mxu3 %v3903_v16  ;;  %v3783_v16 = vor.u32 %v4562_v11, %v3782_v10  ;;  %v3720_v62 = vld [vmem:[%s7041_s5 + $0x230] sm:$0xf0]  ;;  %v4206_v1 = vld [vmem:[%s7041_s5 + $0x5d8] sm:$0xf]  ;;  %v4134_v6 = vld [vmem:[%s7041_s5 + $0x550] sm:$0xf]  ;;  %v4131_v7 = vor.u32 %v4645_v58, %v4128_v59 }
 0x173   :  { %v4650_v45 = vld [vmem:[%s7041_s5 + $0x56c] sm:$0xf0]  ;;  %v4136_v10 = vld [vmem:[%s7041_s5 + $0x570] sm:$0xf0]  ;;  %v3723_v11 = vor.u32 %v4542_v61, %v3720_v62  ;;  %v4605_v61 = vld [vmem:[%s7041_s5 + $0x40c] sm:$0xf] }
 0x174   :  { %2686 = vmatpush.bf16.msrb.mxu1 %v3943_v12  ;;  %2635 = vmatpush.bf16.msra.mxu2 %v3907_v25  ;;  %v4553_v12 = vld [vmem:[%s7041_s5 + $0x264] sm:$0xf0]  ;;  %v4630_v33 = vld [vmem:[%s7041_s5 + $0x4d4] sm:$0xf]  ;;  %v3968_v62 = vld [vmem:[%s7041_s5 + $0x428] sm:$0xf0] }
 0x175   :  { %2679 = vmatpush.bf16.msrb.mxu0 %v3495_v23  ;;  %v3743_v20 = vor.u32 %v4553_v12, %v3742_v3  ;;  %v4554_v23 = vld [vmem:[%s7041_s5 + $0x26c] sm:$0xf0]  ;;  %v4545_v25 = vld [vmem:[%s7041_s5 + $0x224] sm:$0xf0]  ;;  %v4637_v3 = vld [vmem:[%s7041_s5 + $0x50c] sm:$0xf] }
 0x176   :  { %2584 = vmatpush.bf16.msrb.mxu3 %v3871_v30  ;;  %v4558_v30 = vld [vmem:[%s7041_s5 + $0x294] sm:$0xf]  ;;  %v3751_v31 = vor.u32 %v4554_v23, %v3750_v22  ;;  %v3711_v34 = vor.u32 %v4545_v25, %v3710_v24  ;;  %v4096_v12 = vld [vmem:[%s7041_s5 + $0x528] sm:$0xf0] }
 0x177   :  { %v3787_v41 = vor.u32 %v4558_v30, %v3784_v32  ;;  %v4099_v19 = vor.u32 %v4637_v3, %v4096_v12  ;;  %v4638_v22 = vld [vmem:[%s7041_s5 + $0x514] sm:$0xf]  ;;  %v4629_v24 = vld [vmem:[%s7041_s5 + $0x4cc] sm:$0xf]  ;;  %v4651_v30 = vld [vmem:[%s7041_s5 + $0x574] sm:$0xf0] }
 0x178   :  { %2687 = vmatpush.bf16.msrb.mxu1 %v3911_v26  ;;  %2636 = vmatpush.bf16.msra.mxu2 %v3875_v35  ;;  %v3819_v26 = vor.u32 %v4566_v15, %v3816_v17  ;;  %v4195_v35 = vor.u32 %v4661_v28, %v4192_v29  ;;  %v4659_v17 = vld [vmem:[%s7041_s5 + $0x5b4] sm:$0xf0]  ;;  %v4104_v23 = vld [vmem:[%s7041_s5 + $0x530] sm:$0xf0]  ;;  %v4064_v25 = vld [vmem:[%s7041_s5 + $0x4e8] sm:$0xf0] }
 0x179   :  { %2680 = vmatpush.bf16.msrb.mxu0 %v3463_v36  ;;  %v4546_v36 = vld [vmem:[%s7041_s5 + $0x22c] sm:$0xf0]  ;;  %v4107_v28 = vor.u32 %v4638_v22, %v4104_v23  ;;  %v4142_v29 = vld [vmem:[%s7041_s5 + $0x558] sm:$0xf]  ;;  %v4067_v32 = vor.u32 %v4629_v24, %v4064_v25  ;;  %v4614_v58 = vld [vmem:[%s7041_s5 + $0x454] sm:$0xf] }
 0x17a   :  { %2585 = vmatpush.bf16.msrb.mxu3 %v3839_v39  ;;  %v4200_v39 = vld [vmem:[%s7041_s5 + $0x5f0] sm:$0xf0]  ;;  %v3719_v47 = vor.u32 %v4546_v36, %v3718_v40  ;;  %v4621_v40 = vld [vmem:[%s7041_s5 + $0x48c] sm:$0xf]  ;;  %v4014_v23 = vld [vmem:[%s7041_s5 + $0x458] sm:$0xf] }
 0x17b   :  { %v4032_v36 = vld [vmem:[%s7041_s5 + $0x4a8] sm:$0xf0]  ;;  %v4008_v59 = vld [vmem:[%s7041_s5 + $0x470] sm:$0xf0]  ;;  %v4619_v24 = vld [vmem:[%s7041_s5 + $0x474] sm:$0xf0] }
 0x17c   :  { %2688 = vmatpush.bf16.msrb.mxu1 %v3879_v38  ;;  %2637 = vmatpush.bf16.msra.mxu2 %v3843_v51  ;;  %v4662_v38 = vld [vmem:[%s7041_s5 + $0x5d4] sm:$0xf] }
 0x17d   :  { %2738 = vmatpush.bf16.msra.mxu0 %v3947_v37  ;;  %2525 = vmatmul.bf16.vlgmr.msra.gmra.mxu3 %v5861_v60  ;;  %v4198_v37 = vld [vmem:[%s7041_s5 + $0x5d0] sm:$0xf]  ;;  %v4203_v51 = vor.u32 %v4662_v38, %v4200_v39  ;;  %v4110_v38 = vld [vmem:[%s7041_s5 + $0x518] sm:$0xf]  ;;  %v4606_v3 = vld [vmem:[%s7041_s5 + $0x414] sm:$0xf] }
 0x17e   :  { %2577 = vmatmul.bf16.vlgmr.msrb.gmra.mxu2 %v5861_v60  ;;  %2586 = vmatpush.bf16.msrb.mxu3 %v3807_v57  ;;  %v3755_v57 = vor.u32 %v4550_v48, %v3752_v49  ;;  %v4643_v39 = vld [vmem:[%s7041_s5 + $0x534] sm:$0xf0]  ;;  %v4613_v48 = vld [vmem:[%s7041_s5 + $0x44c] sm:$0xf]  ;;  %v3976_v12 = vld [vmem:[%s7041_s5 + $0x430] sm:$0xf0] }
 0x17f   :  { %2629 = vmatmul.bf16.vlgmr.msra.gmra.mxu1 %v5861_v60  ;;  %2681 = vmatmul.bf16.vlgmr.msrb.gmra.mxu0 %v5861_v60  ;;  %v4000_v49 = vld [vmem:[%s7041_s5 + $0x468] sm:$0xf0]  ;;  %v3979_v25 = vor.u32 %v4606_v3, %v3976_v12  ;;  %v3656_v3 = vld [vmem:[%s7041_s5 + $0x1b0] sm:$0xf0]  ;;  %v4679_v12 = vld [vmem:[%s7041_s5 + $0x65c] sm:$0xf] }
 0x180   :  { %2689 = vmatpush.bf16.msrb.mxu1 %v3847_v53  ;;  %2638 = vmatpush.bf16.msra.mxu2 %v3811_v0  ;;  %v4163_v53 = vor.u32 %v4653_v43, %v4160_v46  ;;  %v4171_v0 = vor.u32 %v4654_v21, %v4168_v55  ;;  %v4626_v43 = vld [vmem:[%s7041_s5 + $0x4ac] sm:$0xf0]  ;;  %v4622_v46 = vld [vmem:[%s7041_s5 + $0x494] sm:$0xf]  ;;  %v4003_v55 = vor.u32 %v4613_v48, %v4000_v49  ;;  %v4683_v48 = vld [vmem:[%s7041_s5 + $0x674] sm:$0xf0] }
 0x181   :  { %2739 = vmatpush.bf16.msra.mxu0 %v3915_v50  ;;  %v4199_v50 = vor.u32 %v4666_v27, %v4198_v37  ;;  %v4143_v37 = vor.u32 %v4651_v30, %v4142_v29  ;;  %v4006_v21 = vld [vmem:[%s7041_s5 + $0x450] sm:$0xf]  ;;  %v4686_v29 = vld [vmem:[%s7041_s5 + $0x694] sm:$0xf] }
 0x182   :  { %2587 = vmatpush.bf16.msrb.mxu3 %v3775_v8  ;;  %v4646_v8 = vld [vmem:[%s7041_s5 + $0x554] sm:$0xf]  ;;  %v4230_v49 = vld [vmem:[%s7041_s5 + $0x610] sm:$0xf] }
 0x183   :  { %v4139_v15 = vor.u32 %v4646_v8, %v4136_v10  ;;  %v3974_v8 = vld [vmem:[%s7041_s5 + $0x410] sm:$0xf]  ;;  %v3971_v10 = vor.u32 %v4605_v61, %v3968_v62  ;;  %v4296_v30 = vld [vmem:[%s7041_s5 + $0x6b0] sm:$0xf0]  ;;  %v4238_v61 = vld [vmem:[%s7041_s5 + $0x618] sm:$0xf] }
 0x184   :  { %2690 = vmatpush.bf16.msrb.mxu1 %v3815_v4  ;;  %2639 = vmatpush.bf16.msra.mxu2 %v3779_v14  ;;  %v4667_v4 = vld [vmem:[%s7041_s5 + $0x5f4] sm:$0xf0]  ;;  %v4135_v14 = vor.u32 %v4650_v45, %v4134_v6  ;;  %v4011_v6 = vor.u32 %v4614_v58, %v4008_v59  ;;  %v4670_v58 = vld [vmem:[%s7041_s5 + $0x614] sm:$0xf] }
 0x185   :  { %2740 = vmatpush.bf16.msra.mxu0 %v3883_v63  ;;  %v4167_v63 = vor.u32 %v4658_v54, %v4166_v52  ;;  %v4635_v54 = vld [vmem:[%s7041_s5 + $0x4f4] sm:$0xf0]  ;;  %v4232_v59 = vld [vmem:[%s7041_s5 + $0x630] sm:$0xf0] }
 0x186   :  { %2588 = vmatpush.bf16.msrb.mxu3 %v3743_v20  ;;  %v4642_v20 = vld [vmem:[%s7041_s5 + $0x52c] sm:$0xf0]  ;;  %v4627_v45 = vld [vmem:[%s7041_s5 + $0x4b4] sm:$0xf0] }
 0x188   :  { %2691 = vmatpush.bf16.msrb.mxu1 %v3783_v16  ;;  %2640 = vmatpush.bf16.msra.mxu2 %v3747_v2  ;;  %v4174_v16 = vld [vmem:[%s7041_s5 + $0x598] sm:$0xf]  ;;  %v4103_v2 = vor.u32 %v4642_v20, %v4102_v18  ;;  %v4690_v20 = vld [vmem:[%s7041_s5 + $0x6ac] sm:$0xf0] }
 0x189   :  { %2741 = vmatpush.bf16.msra.mxu0 %v3851_v13  ;;  %v4207_v13 = vor.u32 %v4667_v4, %v4206_v1  ;;  %v4698_v1 = vld [vmem:[%s7041_s5 + $0x6ec] sm:$0xf0]  ;;  %v4699_v18 = vld [vmem:[%s7041_s5 + $0x6f4] sm:$0xf0] }
 0x18a   :  { %2589 = vmatpush.bf16.msrb.mxu3 %v3711_v34  ;;  %v4072_v34 = vld [vmem:[%s7041_s5 + $0x4f0] sm:$0xf0] }
 0x18b   :  { %v4075_v27 = vor.u32 %v4630_v33, %v4072_v34  ;;  %v4262_v33 = vld [vmem:[%s7041_s5 + $0x650] sm:$0xf] }
 0x18c   :  { %2692 = vmatpush.bf16.msrb.mxu1 %v3751_v31  ;;  %2641 = vmatpush.bf16.msra.mxu2 %v3715_v42  ;;  %v4070_v31 = vld [vmem:[%s7041_s5 + $0x4d0] sm:$0xf]  ;;  %v4035_v42 = vor.u32 %v4621_v40, %v4032_v36  ;;  %v3982_v36 = vld [vmem:[%s7041_s5 + $0x418] sm:$0xf] }
 0x18d   :  { %2742 = vmatpush.bf16.msra.mxu0 %v3819_v26  ;;  %2590 = vmatmul.bf16.vlgmr.msrb.gmra.mxu3 %v5954_v56  ;;  %v4175_v26 = vor.u32 %v4659_v17, %v4174_v16  ;;  %v4334_v16 = vld [vmem:[%s7041_s5 + $0x6d8] sm:$0xf]  ;;  %v4682_v34 = vld [vmem:[%s7041_s5 + $0x66c] sm:$0xf0] }
 0x18e   :  { %2647 = vmatpush.bf16.msra.mxu3 %v4195_v35  ;;  %v4071_v35 = vor.u32 %v4634_v9, %v4070_v31  ;;  %v4302_v31 = vld [vmem:[%s7041_s5 + $0x698] sm:$0xf] }
 0x18f   :  { %2642 = vmatmul.bf16.vlgmr.msra.gmra.mxu2 %v5954_v56  ;;  %v4691_v9 = vld [vmem:[%s7041_s5 + $0x6b4] sm:$0xf0] }
 0x190   :  { %2693 = vmatpush.bf16.msrb.mxu1 %v3719_v47  ;;  %2699 = vmatpush.bf16.msrb.mxu2 %v4199_v50  ;;  %v4040_v47 = vld [vmem:[%s7041_s5 + $0x4b0] sm:$0xf0]  ;;  %v4111_v50 = vor.u32 %v4643_v39, %v4110_v38  ;;  %v4336_v38 = vld [vmem:[%s7041_s5 + $0x6f8] sm:$0xf0]  ;;  %v4303_v39 = vor.u32 %v4691_v9, %v4302_v31  ;;  %v3630_v31 = vld [vmem:[%s7041_s5 + $0x158] sm:$0xf] }
 0x191   :  { %2743 = vmatpush.bf16.msra.mxu0 %v3787_v41  ;;  %v4038_v41 = vld [vmem:[%s7041_s5 + $0x490] sm:$0xf]  ;;  %v4043_v52 = vor.u32 %v4622_v46, %v4040_v47  ;;  %v4270_v47 = vld [vmem:[%s7041_s5 + $0x658] sm:$0xf] }
 0x192   :  { %2648 = vmatpush.bf16.msra.mxu3 %v4163_v53  ;;  %v4078_v53 = vld [vmem:[%s7041_s5 + $0x4d8] sm:$0xf] }
 0x193   :  { %2694 = vmatmul.bf16.vlgmr.msrb.gmra.mxu1 %v5954_v56 }
 0x194   :  { %2751 = vmatpush.bf16.msra.mxu1 %v4203_v51  ;;  %2700 = vmatpush.bf16.msrb.mxu2 %v4167_v63  ;;  %v4039_v51 = vor.u32 %v4626_v43, %v4038_v41  ;;  %v4079_v63 = vor.u32 %v4635_v54, %v4078_v53  ;;  %v4263_v41 = vor.u32 %v4682_v34, %v4262_v33  ;;  %v4264_v43 = vld [vmem:[%s7041_s5 + $0x670] sm:$0xf0]  ;;  %v4519_v34 = vld [vmem:[%s7041_s5 + $0x15c] sm:$0xf] }
 0x195   :  { %2744 = vmatpush.bf16.msra.mxu0 %v3755_v57  ;;  %v4618_v57 = vld [vmem:[%s7041_s5 + $0x46c] sm:$0xf0]  ;;  %v3688_v54 = vld [vmem:[%s7041_s5 + $0x1f0] sm:$0xf0] }
 0x196   :  { %2649 = vmatpush.bf16.msra.mxu3 %v4131_v7  ;;  %v4007_v4 = vor.u32 %v4618_v57, %v4006_v21  ;;  %v4046_v7 = vld [vmem:[%s7041_s5 + $0x498] sm:$0xf]  ;;  %v4687_v21 = vld [vmem:[%s7041_s5 + $0x69c] sm:$0xf]  ;;  %v4271_v57 = vor.u32 %v4683_v48, %v4270_v47 }
 0x197   :  { %v4047_v17 = vor.u32 %v4627_v45, %v4046_v7  ;;  %v4535_v7 = vld [vmem:[%s7041_s5 + $0x1dc] sm:$0xf] }
 0x198   :  { %2752 = vmatpush.bf16.msra.mxu1 %v4171_v0  ;;  %2701 = vmatpush.bf16.msrb.mxu2 %v4135_v14  ;;  %v4326_v0 = vld [vmem:[%s7041_s5 + $0x6d0] sm:$0xf]  ;;  %v4694_v14 = vld [vmem:[%s7041_s5 + $0x6d4] sm:$0xf]  ;;  %v3696_v45 = vld [vmem:[%s7041_s5 + $0x1f8] sm:$0xf0] }
 0x199   :  { %2745 = vmatpush.bf16.msra.mxu0 %v3723_v11  ;;  %v4610_v11 = vld [vmem:[%s7041_s5 + $0x42c] sm:$0xf0]  ;;  %v4511_v47 = vld [vmem:[%s7041_s5 + $0x11c] sm:$0xf] }
 0x19a   :  { %2650 = vmatpush.bf16.msra.mxu3 %v4099_v19  ;;  %v4294_v19 = vld [vmem:[%s7041_s5 + $0x690] sm:$0xf]  ;;  %v3975_v22 = vor.u32 %v4610_v11, %v3974_v8  ;;  %v4235_v11 = vor.u32 %v4670_v58, %v4232_v59  ;;  %v3600_v48 = vld [vmem:[%s7041_s5 + $0x138] sm:$0xf0] }
 0x19b   :  { %v4503_v58 = vld [vmem:[%s7041_s5 + $0xdc] sm:$0xf] }
 0x19c   :  { %2753 = vmatpush.bf16.msra.mxu1 %v4139_v15  ;;  %2746 = vmatmul.bf16.vlgmr.msra.gmra.mxu0 %v5954_v56  ;;  %v4328_v15 = vld [vmem:[%s7041_s5 + $0x6f0] sm:$0xf0]  ;;  %v3568_v59 = vld [vmem:[%s7041_s5 + $0xf8] sm:$0xf0] }
 0x19d   :  { %2803 = vmatpush.bf16.msrb.mxu0 %v4207_v13  ;;  %2702 = vmatpush.bf16.msrb.mxu2 %v4103_v2  ;;  %v4327_v13 = vor.u32 %v4698_v1, %v4326_v0  ;;  %v4335_v2 = vor.u32 %v4699_v18, %v4334_v16  ;;  %v3694_v0 = vld [vmem:[%s7041_s5 + $0x1d8] sm:$0xf]  ;;  %v3699_v16 = vor.u32 %v4535_v7, %v3696_v45  ;;  %v4495_v7 = vld [vmem:[%s7041_s5 + $0x9c] sm:$0xf] }
 0x19e   :  { %2651 = vmatpush.bf16.msra.mxu3 %v4067_v32  ;;  %v4015_v32 = vor.u32 %v4619_v24, %v4014_v23  ;;  %v4539_v1 = vld [vmem:[%s7041_s5 + $0x1f4] sm:$0xf0]  ;;  %v6723_v24 = vld [vmem:[%s7042_s6] sm:$0xff] }
 0x19f   :  { %v4531_v18 = vld [vmem:[%s7041_s5 + $0x1b4] sm:$0xf0]  ;;  %v1326_v9 = vperm.slane %v6723_v24, 0 }
 0x1a0   :  { %2754 = vmatpush.bf16.msra.mxu1 %v4107_v28  ;;  %v4295_v28 = vor.u32 %v4690_v20, %v4294_v19  ;;  %v4527_v20 = vld [vmem:[%s7041_s5 + $0x19c] sm:$0xf] }
 0x1a1   :  { %2804 = vmatpush.bf16.msrb.mxu0 %v4175_v26  ;;  %2703 = vmatpush.bf16.msrb.mxu2 %v4071_v35  ;;  %v4331_v26 = vor.u32 %v4694_v14, %v4328_v15  ;;  %v4299_v35 = vor.u32 %v4686_v29, %v4296_v30  ;;  %v3695_v15 = vor.u32 %v4539_v1, %v3694_v0  ;;  %v4240_v29 = vld [vmem:[%s7041_s5 + $0x638] sm:$0xf0]  ;;  %v3534_v1 = vld [vmem:[%s7041_s5 + $0x98] sm:$0xf] }
 0x1a2   :  { %2652 = vmatpush.bf16.msra.mxu3 %v4035_v42  ;;  %v4678_v42 = vld [vmem:[%s7041_s5 + $0x654] sm:$0xf]  ;;  %v3571_v0 = vor.u32 %v4503_v58, %v3568_v59  ;;  %v4575_v59 = vld [vmem:[%s7041_s5 + $0x31c] sm:$0xf] }
 0x1a3   :  { %v4267_v53 = vor.u32 %v4678_v42, %v4264_v43  ;;  %v4515_v42 = vld [vmem:[%s7041_s5 + $0x134] sm:$0xf0] }
 0x1a4   :  { %2755 = vmatpush.bf16.msra.mxu1 %v4075_v27  ;;  %v4695_v27 = vld [vmem:[%s7041_s5 + $0x6dc] sm:$0xf] }
 0x1a5   :  { %2805 = vmatpush.bf16.msrb.mxu0 %v4143_v37  ;;  %2704 = vmatpush.bf16.msrb.mxu2 %v4039_v51  ;;  %v4611_v37 = vld [vmem:[%s7041_s5 + $0x434] sm:$0xf0]  ;;  %v4339_v51 = vor.u32 %v4695_v27, %v4336_v38  ;;  %v3592_v27 = vld [vmem:[%s7041_s5 + $0x130] sm:$0xf0] }
 0x1a6   :  { %2653 = vmatpush.bf16.msra.mxu3 %v4003_v55  ;;  %v3983_v46 = vor.u32 %v4611_v37, %v3982_v36  ;;  %v4304_v55 = vld [vmem:[%s7041_s5 + $0x6b8] sm:$0xf0] }
 0x1a7   :  { %v4307_v8 = vor.u32 %v4687_v21, %v4304_v55  ;;  %v3632_v36 = vld [vmem:[%s7041_s5 + $0x178] sm:$0xf0]  ;;  %v3566_v21 = vld [vmem:[%s7041_s5 + $0xd8] sm:$0xf] }
 0x1a8   :  { %2756 = vmatpush.bf16.msra.mxu1 %v4043_v52  ;;  %v6625_v40 = vpop.f32.mrf.mxu0  ;;  %v4534_v52 = vld [vmem:[%s7041_s5 + $0x1d4] sm:$0xf]  ;;  %v4507_v55 = vld [vmem:[%s7041_s5 + $0xf4] sm:$0xf0] }
 0x1a9   :  { %2806 = vmatpush.bf16.msrb.mxu0 %v4111_v50  ;;  %2705 = vmatpush.bf16.msrb.mxu2 %v4007_v4  ;;  %v4674_v50 = vld [vmem:[%s7041_s5 + $0x62c] sm:$0xf0]  ;;  %v2475_v43 = vadd.f32 %v6625_v40, %v1326_v9  ;;  %v4502_v40 = vld [vmem:[%s7041_s5 + $0xd4] sm:$0xf]  ;;  %v4599_v9 = vld [vmem:[%s7041_s5 + $0x3dc] sm:$0xf] }
 0x1aa   :  { %2654 = vmatpush.bf16.msra.mxu3 %v3971_v10  ;;  %v4231_v62 = vor.u32 %v4674_v50, %v4230_v49  ;;  %v4526_v10 = vld [vmem:[%s7041_s5 + $0x194] sm:$0xf] }
 0x1ab   :  { %v3659_v19 = vor.u32 %v4526_v10, %v3656_v3  ;;  %v4486_v10 = vld [vmem:[%s7041_s5 + $0x54] sm:$0xf] }
 0x1ac   :  { %2757 = vmatpush.bf16.msra.mxu1 %v4011_v6  ;;  %v3691_v6 = vor.u32 %v4534_v52, %v3688_v54  ;;  %v3603_v54 = vor.u32 %v4511_v47, %v3600_v48  ;;  %v4587_v47 = vld [vmem:[%s7041_s5 + $0x374] sm:$0xf0] }
 0x1ad   :  { %2807 = vmatpush.bf16.msrb.mxu0 %v4079_v63  ;;  %2655 = vmatmul.bf16.vlgmr.msra.gmra.mxu3 %v6040_v44  ;;  %v4675_v63 = vld [vmem:[%s7041_s5 + $0x634] sm:$0xf0] }
 0x1ae   :  { %2716 = vmatpush.bf16.msrb.mxu3 %v4327_v13  ;;  %2706 = vmatpush.bf16.msrb.mxu2 %v3975_v22  ;;  %v4272_v13 = vld [vmem:[%s7041_s5 + $0x678] sm:$0xf0]  ;;  %v4239_v14 = vor.u32 %v4675_v63, %v4238_v61  ;;  %v4494_v61 = vld [vmem:[%s7041_s5 + $0x94] sm:$0xf]  ;;  %v3567_v63 = vor.u32 %v4507_v55, %v3566_v21  ;;  %v4579_v55 = vld [vmem:[%s7041_s5 + $0x334] sm:$0xf0] }
 0x1af   :  { %v3664_v22 = vld [vmem:[%s7041_s5 + $0x1b8] sm:$0xf0]  ;;  %v4275_v23 = vor.u32 %v4679_v12, %v4272_v13  ;;  %v3502_v13 = vld [vmem:[%s7041_s5 + $0x58] sm:$0xf] }
 0x1b0   :  { %2758 = vmatpush.bf16.msra.mxu1 %v3979_v25  ;;  %v2476_v4 = vpop.f32.mrf.mxu0  ;;  %v4518_v25 = vld [vmem:[%s7041_s5 + $0x154] sm:$0xf]  ;;  %v3667_v30 = vor.u32 %v4527_v20, %v3664_v22  ;;  %v3950_v22 = vld [vmem:[%s7041_s5 + $0x3d8] sm:$0xf] }
 0x1b1   :  { %2808 = vmatpush.bf16.msrb.mxu0 %v4047_v17  ;;  %2707 = vmatmul.bf16.vlgmr.msrb.gmra.mxu2 %v6040_v44  ;;  %v3662_v17 = vld [vmem:[%s7041_s5 + $0x198] sm:$0xf] }
 0x1b2   :  { %2768 = vmatpush.bf16.msra.mxu2 %v4331_v26  ;;  %2717 = vmatpush.bf16.msrb.mxu3 %v4295_v28  ;;  %v3624_v26 = vld [vmem:[%s7041_s5 + $0x170] sm:$0xf0]  ;;  %v4671_v28 = vld [vmem:[%s7041_s5 + $0x61c] sm:$0xf]  ;;  %v4499_v4 = vld [vmem:[%s7041_s5 + $0xb4] sm:$0xf0] }
 0x1b3   :  { %2759 = vmatmul.bf16.vlgmr.msra.gmra.mxu1 %v6040_v44  ;;  %v3627_v33 = vor.u32 %v4518_v25, %v3624_v26  ;;  %v4243_v37 = vor.u32 %v4671_v28, %v4240_v29  ;;  %v3535_v3 = vor.u32 %v4499_v4, %v3534_v1  ;;  %v3470_v26 = vld [vmem:[%s7041_s5 + $0x18] sm:$0xf]  ;;  %v4479_v29 = vld [vmem:[%s7041_s5 + $0x1c] sm:$0xf] }
 0x1b4   :  { %2820 = vmatpush.bf16.msrb.mxu1 %v4335_v2  ;;  %v3663_v2 = vor.u32 %v4531_v18, %v3662_v17  ;;  %v3504_v17 = vld [vmem:[%s7041_s5 + $0x78] sm:$0xf0]  ;;  %v4478_v18 = vld [vmem:[%s7041_s5 + $0x14] sm:$0xf] }
 0x1b5   :  { %2809 = vmatpush.bf16.msrb.mxu0 %v4015_v32  ;;  %v4523_v32 = vld [vmem:[%s7041_s5 + $0x174] sm:$0xf0]  ;;  %v4567_v4 = vld [vmem:[%s7041_s5 + $0x2dc] sm:$0xf] }
 0x1b6   :  { %2769 = vmatpush.bf16.msra.mxu2 %v4299_v35  ;;  %2718 = vmatpush.bf16.msrb.mxu3 %v4263_v41  ;;  %v4510_v35 = vld [vmem:[%s7041_s5 + $0x114] sm:$0xf]  ;;  %v3631_v38 = vor.u32 %v4523_v32, %v3630_v31  ;;  %v3598_v41 = vld [vmem:[%s7041_s5 + $0x118] sm:$0xf] }
 0x1b8   :  { %2821 = vmatpush.bf16.msrb.mxu1 %v4303_v39  ;;  %v3635_v39 = vor.u32 %v4519_v34, %v3632_v36 }
 0x1b9   :  { %2810 = vmatpush.bf16.msrb.mxu0 %v3983_v46  ;;  %v3595_v46 = vor.u32 %v4510_v35, %v3592_v27  ;;  %v4595_v35 = vld [vmem:[%s7041_s5 + $0x3b4] sm:$0xf0] }
 0x1ba   :  { %2770 = vmatpush.bf16.msra.mxu2 %v4267_v53  ;;  %2719 = vmatpush.bf16.msrb.mxu3 %v4231_v62  ;;  %v3599_v53 = vor.u32 %v4515_v42, %v3598_v41  ;;  %v3528_v62 = vld [vmem:[%s7041_s5 + $0xb0] sm:$0xf0]  ;;  %v4591_v41 = vld [vmem:[%s7041_s5 + $0x39c] sm:$0xf] }
 0x1bb   :  { %v3920_v42 = vld [vmem:[%s7041_s5 + $0x3b8] sm:$0xf0] }
 0x1bc   :  { %2811 = vmatmul.bf16.vlgmr.msrb.gmra.mxu0 %v6040_v44  ;;  %2822 = vmatpush.bf16.msrb.mxu1 %v4271_v57 }
 0x1bd   :  { %2872 = vmatpush.bf16.msra.mxu0 %v4339_v51  ;;  %4344 = vmatmul.msk.bf16.vlgmr.msrb.gmra.mxu3 %vm135_vm0, %v6192_v5  ;;  %v2487_v49 = vpop.f32.mrf.mxu1  ;;  %v6775_v50 = vpop.f32.mrf.mxu0  ;;  %v3560_v51 = vld [vmem:[%s7041_s5 + $0xf0] sm:$0xf0] }
 0x1be   :  { %2725 = vmatpush.bf16.msra.mxu3 %v3691_v6  ;;  %2771 = vmatpush.bf16.msra.mxu2 %v4235_v11  ;;  %v6783_v52 = vadd.f32 %v2487_v49, %v2475_v43  ;;  %v3563_v57 = vor.u32 %v4502_v40, %v3560_v51  ;;  %v3531_v6 = vor.u32 %v4494_v61, %v3528_v62  ;;  %v3496_v11 = vld [vmem:[%s7041_s5 + $0x70] sm:$0xf0]  ;;  %v3822_v62 = vld [vmem:[%s7041_s5 + $0x2d8] sm:$0xf] }
 0x1bf   :  { %v3923_v49 = vor.u32 %v4591_v41, %v3920_v42 }
 0x1c0   :  { %2823 = vmatpush.bf16.msrb.mxu1 %v4239_v14  ;;  %v4491_v14 = vld [vmem:[%s7041_s5 + $0x74] sm:$0xf0] }
 0x1c1   :  { %2873 = vmatpush.bf16.msra.mxu0 %v4307_v8  ;;  %4345 = vmatmul.msk.bf16.vlgmr.msra.gmra.mxu2 %vm135_vm0, %v6192_v5  ;;  %v3503_v20 = vor.u32 %v4491_v14, %v3502_v13 }
 0x1c2   :  { %2777 = vmatpush.bf16.msrb.mxu2 %v3695_v15  ;;  %2726 = vmatpush.bf16.msra.mxu3 %v3659_v19  ;;  %v3499_v15 = vor.u32 %v4486_v10, %v3496_v11  ;;  %v3464_v19 = vld [vmem:[%s7041_s5 + $0x30] sm:$0xf0]  ;;  %v4559_v10 = vld [vmem:[%s7041_s5 + $0x29c] sm:$0xf] }
 0x1c3   :  { %4346 = vmatmul.msk.bf16.vlgmr.msrb.gmra.mxu1 %vm135_vm0, %v6192_v5  ;;  %v3467_v28 = vor.u32 %v4478_v18, %v3464_v19  ;;  %v3792_v11 = vld [vmem:[%s7041_s5 + $0x2b8] sm:$0xf0]  ;;  %v4547_v18 = vld [vmem:[%s7041_s5 + $0x234] sm:$0xf0] }
 0x1c4   :  { %2829 = vmatpush.bf16.msra.mxu1 %v3699_v16  ;;  %v4487_v16 = vld [vmem:[%s7041_s5 + $0x5c] sm:$0xf]  ;;  %v3795_v13 = vor.u32 %v4559_v10, %v3792_v11 }
 0x1c5   :  { %2874 = vmatpush.bf16.msra.mxu0 %v4275_v23  ;;  %v2489_v45 = vpop.f32.mrf.mxu1  ;;  %v2541_v8 = vpop.f32.mrf.mxu0  ;;  %v4603_v23 = vld [vmem:[%s7041_s5 + $0x3f4] sm:$0xf0]  ;;  %v3507_v25 = vor.u32 %v4487_v16, %v3504_v17  ;;  %v3760_v16 = vld [vmem:[%s7041_s5 + $0x278] sm:$0xf0] }
 0x1c6   :  { %2778 = vmatpush.bf16.msrb.mxu2 %v3663_v2  ;;  %2727 = vmatpush.bf16.msra.mxu3 %v3627_v33  ;;  %v4483_v2 = vld [vmem:[%s7041_s5 + $0x34] sm:$0xf0]  ;;  %v3951_v32 = vor.u32 %v4603_v23, %v3950_v22  ;;  %v3952_v33 = vld [vmem:[%s7041_s5 + $0x3f8] sm:$0xf0] }
 0x1c7   :  { %v3471_v36 = vor.u32 %v4483_v2, %v3470_v26  ;;  %v3726_v17 = vld [vmem:[%s7041_s5 + $0x218] sm:$0xf]  ;;  %v4663_v19 = vld [vmem:[%s7041_s5 + $0x5dc] sm:$0xf] }
 0x1c8   :  { %2830 = vmatpush.bf16.msra.mxu1 %v3667_v30  ;;  %v3472_v30 = vld [vmem:[%s7041_s5 + $0x38] sm:$0xf0]  ;;  %v3727_v26 = vor.u32 %v4547_v18, %v3726_v17 }
 0x1c9   :  { %2875 = vmatpush.bf16.msra.mxu0 %v4243_v37  ;;  %v3918_v37 = vld [vmem:[%s7041_s5 + $0x398] sm:$0xf]  ;;  %v3475_v27 = vor.u32 %v4479_v29, %v3472_v30  ;;  %v4543_v2 = vld [vmem:[%s7041_s5 + $0x21c] sm:$0xf] }
 0x1ca   :  { %2779 = vmatpush.bf16.msrb.mxu2 %v3631_v38  ;;  %2728 = vmatpush.bf16.msra.mxu3 %v3595_v46  ;;  %v3955_v38 = vor.u32 %v4599_v9, %v3952_v33  ;;  %v3886_v46 = vld [vmem:[%s7041_s5 + $0x358] sm:$0xf]  ;;  %v4655_v30 = vld [vmem:[%s7041_s5 + $0x59c] sm:$0xf] }
 0x1cb   :  { %v3887_v51 = vor.u32 %v4587_v47, %v3886_v46  ;;  %v4112_v46 = vld [vmem:[%s7041_s5 + $0x538] sm:$0xf0] }
 0x1cc   :  { %2831 = vmatpush.bf16.msra.mxu1 %v3635_v39  ;;  %4347 = vmatmul.msk.bf16.vlgmr.msra.gmra.mxu0 %vm135_vm0, %v6192_v5  ;;  %v3536_v5 = vld [vmem:[%s7041_s5 + $0xb8] sm:$0xf0]  ;;  %v3919_v39 = vor.u32 %v4595_v35, %v3918_v37 }
 0x1cd   :  { %v3539_v12 = vor.u32 %v4495_v7, %v3536_v5  ;;  %v6859_v31 = vpop.f32.mrf.mxu1  ;;  %v3790_v7 = vld [vmem:[%s7041_s5 + $0x298] sm:$0xf] }
 0x1ce   :  { %2780 = vmatpush.bf16.msrb.mxu2 %v3599_v53  ;;  %2729 = vmatpush.bf16.msra.mxu3 %v3563_v57  ;;  %v4583_v53 = vld [vmem:[%s7041_s5 + $0x35c] sm:$0xf]  ;;  %v4563_v5 = vld [vmem:[%s7041_s5 + $0x2b4] sm:$0xf0] }
 0x1cf   :  { %v6867_v34 = vpop.f32.mrf.mxu0  ;;  %v3791_v8 = vor.u32 %v4563_v5, %v3790_v7  ;;  %v4607_v7 = vld [vmem:[%s7041_s5 + $0x41c] sm:$0xf] }
 0x1d0   :  { %2832 = vmatpush.bf16.msra.mxu1 %v3603_v54  ;;  %v3888_v54 = vld [vmem:[%s7041_s5 + $0x378] sm:$0xf0] }
 0x1d1   :  { %v3891_v57 = vor.u32 %v4583_v53, %v3888_v54  ;;  %v3984_v5 = vld [vmem:[%s7041_s5 + $0x438] sm:$0xf0] }
 0x1d2   :  { %2781 = vmatpush.bf16.msrb.mxu2 %v3567_v63  ;;  %2730 = vmatpush.bf16.msra.mxu3 %v3531_v6  ;;  %v2500_v43 = vpop.f32.mrf.mxu2  ;;  %v4571_v63 = vld [vmem:[%s7041_s5 + $0x2f4] sm:$0xf0]  ;;  %v3824_v6 = vld [vmem:[%s7041_s5 + $0x2f8] sm:$0xf0] }
 0x1d3   :  { %v6889_v48 = vadd.f32 %v2500_v43, %v6783_v52  ;;  %v3854_v52 = vld [vmem:[%s7041_s5 + $0x318] sm:$0xf]  ;;  %v3823_v1 = vor.u32 %v4571_v63, %v3822_v62  ;;  %v3827_v45 = vor.u32 %v4567_v4, %v3824_v6  ;;  %v4639_v43 = vld [vmem:[%s7041_s5 + $0x51c] sm:$0xf] }
 0x1d4   :  { %2833 = vmatpush.bf16.msra.mxu1 %v3571_v0  ;;  %v3855_v58 = vor.u32 %v4579_v55, %v3854_v52  ;;  %v4623_v52 = vld [vmem:[%s7041_s5 + $0x49c] sm:$0xf] }
 0x1d5   :  { %v2554_v40 = vpop.f32.mrf.mxu1  ;;  %v4048_v55 = vld [vmem:[%s7041_s5 + $0x4b8] sm:$0xf0] }
 0x1d6   :  { %2782 = vmatpush.bf16.msrb.mxu2 %v3535_v3  ;;  %2731 = vmatpush.bf16.msra.mxu3 %v3499_v15  ;;  %v3758_v3 = vld [vmem:[%s7041_s5 + $0x258] sm:$0xf]  ;;  %v4551_v15 = vld [vmem:[%s7041_s5 + $0x25c] sm:$0xf] }
 0x1d7   :  { %v2606_v21 = vpop.f32.mrf.mxu0  ;;  %v3763_v23 = vor.u32 %v4551_v15, %v3760_v16  ;;  %v4631_v40 = vld [vmem:[%s7041_s5 + $0x4dc] sm:$0xf] }
 0x1d8   :  { %2834 = vmatpush.bf16.msra.mxu1 %v3539_v12  ;;  %v4555_v12 = vld [vmem:[%s7041_s5 + $0x274] sm:$0xf0]  ;;  %v1327_v21 = vperm.slane %v6723_v24, 1  ;;  %v4016_v62 = vld [vmem:[%s7041_s5 + $0x478] sm:$0xf0] }
 0x1d9   :  { %v3759_v14 = vor.u32 %v4555_v12, %v3758_v3  ;;  %v1328_v12 = vperm.slane %v6723_v24, 2 }
 0x1da   :  { %2783 = vmatpush.bf16.msrb.mxu2 %v3503_v20  ;;  %2732 = vmatpush.bf16.msra.mxu3 %v3467_v28  ;;  %v2502_v61 = vpop.f32.mrf.mxu2  ;;  %v4208_v20 = vld [vmem:[%s7041_s5 + $0x5f8] sm:$0xf0] }
 0x1db   :  { %v3728_v28 = vld [vmem:[%s7041_s5 + $0x238] sm:$0xf0]  ;;  %v4211_v29 = vor.u32 %v4663_v19, %v4208_v20 }
 0x1dc   :  { %2835 = vmatpush.bf16.msra.mxu1 %v3507_v25  ;;  %v3731_v9 = vor.u32 %v4543_v2, %v3728_v28  ;;  %v4615_v61 = vld [vmem:[%s7041_s5 + $0x45c] sm:$0xf] }
 0x1dd   :  { %2733 = vmatmul.bf16.vlgmr.msra.gmra.mxu3 %v5861_v60  ;;  %v4019_v4 = vor.u32 %v4615_v61, %v4016_v62 }
 0x1de   :  { %2790 = vmatpush.bf16.msrb.mxu3 %v3951_v32  ;;  %2784 = vmatpush.bf16.msrb.mxu2 %v3471_v36  ;;  %v4176_v32 = vld [vmem:[%s7041_s5 + $0x5b8] sm:$0xf0] }
 0x1df   :  { %v4179_v35 = vor.u32 %v4655_v30, %v4176_v32  ;;  %v1329_v32 = vperm.slane %v6723_v24, 3 }
 0x1e0   :  { %2836 = vmatpush.bf16.msra.mxu1 %v3475_v27  ;;  %v4647_v27 = vld [vmem:[%s7041_s5 + $0x55c] sm:$0xf] }
 0x1e1   :  { %2785 = vmatmul.bf16.vlgmr.msrb.gmra.mxu2 %v5861_v60 }
 0x1e2   :  { %2842 = vmatpush.bf16.msra.mxu2 %v3955_v38  ;;  %2791 = vmatpush.bf16.msrb.mxu3 %v3919_v39  ;;  %v4144_v38 = vld [vmem:[%s7041_s5 + $0x578] sm:$0xf0] }
 0x1e3   :  { %2837 = vmatmul.bf16.vlgmr.msra.gmra.mxu1 %v5861_v60  ;;  %v3856_v60 = vld [vmem:[%s7041_s5 + $0x338] sm:$0xf0]  ;;  %v4147_v42 = vor.u32 %v4647_v27, %v4144_v38 }
 0x1e4   :  { %v3859_v0 = vor.u32 %v4575_v59, %v3856_v60 }
 0x1e6   :  { %2843 = vmatpush.bf16.msra.mxu2 %v3923_v49  ;;  %2792 = vmatpush.bf16.msrb.mxu3 %v3887_v51  ;;  %v4115_v49 = vor.u32 %v4639_v43, %v4112_v46 }
 0x1ea   :  { %2844 = vmatpush.bf16.msra.mxu2 %v3891_v57  ;;  %2793 = vmatpush.bf16.msrb.mxu3 %v3855_v58  ;;  %v4051_v58 = vor.u32 %v4623_v52, %v4048_v55 }
 0x1ec   :  { %v6959_v22 = vpop.f32.mrf.mxu1  ;;  %v6961_v25 = vpop.f32.mrf.mxu0 }
 0x1ee   :  { %2845 = vmatpush.bf16.msra.mxu2 %v3859_v0  ;;  %2794 = vmatpush.bf16.msrb.mxu3 %v3823_v1 }
 0x1f0   :  { %v2513_v33 = vpop.f32.mrf.mxu3 }
 0x1f1   :  { %v2565_v36 = vpop.f32.mrf.mxu2  ;;  %v2514_v37 = vadd.f32 %v2513_v33, %v6889_v48 }
 0x1f2   :  { %2846 = vmatpush.bf16.msra.mxu2 %v3827_v45  ;;  %2795 = vmatpush.bf16.msrb.mxu3 %v3791_v8  ;;  %v1330_v8 = vperm.slane %v6723_v24, 4 }
 0x1f4   :  { %v2619_v39 = vpop.f32.mrf.mxu1  ;;  %v2671_v41 = vpop.f32.mrf.mxu0 }
 0x1f6   :  { %2847 = vmatpush.bf16.msra.mxu2 %v3795_v13  ;;  %2796 = vmatpush.bf16.msrb.mxu3 %v3759_v14 }
 0x1f8   :  { %v2515_v47 = vpop.f32.mrf.mxu3 }
 0x1f9   :  { %v2567_v48 = vpop.f32.mrf.mxu2 }
 0x1fa   :  { %2848 = vmatpush.bf16.msra.mxu2 %v3763_v23  ;;  %2797 = vmatpush.bf16.msrb.mxu3 %v3727_v26 }
 0x1fc   :  { %v2630_v51 = vpop.f32.mrf.mxu1  ;;  %v2682_v53 = vpop.f32.mrf.mxu0 }
 0x1fd   :  { %2798 = vmatmul.bf16.vlgmr.msrb.gmra.mxu3 %v5954_v56  ;;  %v2683_v13 = vadd.f32 %v2682_v53, %v1330_v8 }
 0x1fe   :  { %2855 = vmatpush.bf16.msra.mxu3 %v4211_v29  ;;  %2849 = vmatpush.bf16.msra.mxu2 %v3731_v9  ;;  %v2631_v9 = vadd.f32 %v2630_v51, %v1329_v32 }
 0x200   :  { %v2526_v57 = vpop.f32.mrf.mxu3 }
 0x201   :  { %2850 = vmatmul.bf16.vlgmr.msra.gmra.mxu2 %v5954_v56  ;;  %v4080_v56 = vld [vmem:[%s7041_s5 + $0x4f8] sm:$0xf0]  ;;  %v2527_v59 = vadd.f32 %v2526_v57, %v1327_v21  ;;  %v2578_v60 = vpop.f32.mrf.mxu2  ;;  %v1331_v57 = vperm.slane %v6723_v24, 5  ;;  %s4727_s5 = smov [#allocation2]  }
 0x202   :  { %2856 = vmatpush.bf16.msra.mxu3 %v4179_v35  ;;  %v4083_v54 = vor.u32 %v4631_v40, %v4080_v56  ;;  %v2579_v16 = vadd.f32 %v2578_v60, %v1328_v12  ;;  %s2913_s4 = sshll.u32 %s4727_s5, 4  ;;  %s2914_s4 = int_to_ptr.vmem [resolvable:$true] %s2913_s4 }
 0x203   :  { %v2540_v63 = vadd.f32 %v6775_v50, %v2527_v59  ;;  %v3987_v50 = vor.u32 %v4607_v7, %v3984_v5  ;;  %v1332_v5 = vperm.slane %v6723_v24, 6 }
 0x204   :  { %v2632_v0 = vpop.f32.mrf.mxu1  ;;  %v2684_v1 = vpop.f32.mrf.mxu0 }
 0x205   :  { %v2553_v6 = vadd.f32 %v6859_v31, %v2540_v63 }
 0x206   :  { %2857 = vmatpush.bf16.msra.mxu3 %v4147_v42 }
 0x207   :  { %v2566_v45 = vadd.f32 %v2565_v36, %v2553_v6 }
 0x208   :  { %v2528_v10 = vpop.f32.mrf.mxu3 }
 0x209   :  { %v2889_v11 = vrot.slane %v2566_v45, 6  ;;  %v2580_v3 = vpop.f32.mrf.mxu2 }
 0x20a   :  { %2858 = vmatpush.bf16.msra.mxu3 %v4115_v49 }
 0x20b   :  { %v2896_v31 = vsel %vm2895_vm1, %v2514_v37, %v2889_v11 }
 0x20e   :  { %2859 = vmatpush.bf16.msra.mxu3 %v4083_v54 }
 0x210   :  { %v2695_v14 = vpop.f32.mrf.mxu1  ;;  %v2591_v17 = vpop.f32.mrf.mxu3 }
 0x211   :  { %v2696_v15 = vadd.f32 %v2695_v14, %v2683_v13  ;;  %v2592_v18 = vadd.f32 %v2591_v17, %v2579_v16  ;;  %v1333_v13 = vperm.slane %v6723_v24, 7 }
 0x212   :  { %2860 = vmatpush.bf16.msra.mxu3 %v4051_v58  ;;  %v2643_v19 = vpop.f32.mrf.mxu2 }
 0x213   :  { %v2605_v20 = vadd.f32 %v6867_v34, %v2592_v18  ;;  %v2644_v36 = vadd.f32 %v2643_v19, %v2631_v9 }
 0x215   :  { %v2618_v26 = vadd.f32 %v6959_v22, %v2605_v20 }
 0x216   :  { %2861 = vmatpush.bf16.msra.mxu3 %v4019_v4 }
 0x217   :  { %v2890_v39 = vrot.slane %v2618_v26, 4 }
 0x218   :  { %v2697_v2 = vpop.f32.mrf.mxu1  ;;  %v2593_v28 = vpop.f32.mrf.mxu3 }
 0x219   :  { %v2747_v23 = vpop.f32.mrf.mxu0 }
 0x21a   :  { %2862 = vmatpush.bf16.msra.mxu3 %v3987_v50  ;;  %v2645_v29 = vpop.f32.mrf.mxu2 }
 0x21d   :  { %2863 = vmatmul.bf16.vlgmr.msra.gmra.mxu3 %v6040_v44 }
 0x221   :  { %v2749_v30 = vpop.f32.mrf.mxu0 }
 0x230   :  { %v2760_v33 = vpop.f32.mrf.mxu1  ;;  %v2656_v37 = vpop.f32.mrf.mxu3 }
 0x231   :  { %v2657_v35 = vadd.f32 %v2656_v37, %v2644_v36 }
 0x233   :  { %v2670_v44 = vadd.f32 %v6961_v25, %v2657_v35 }
 0x234   :  { %v2708_v27 = vpop.f32.mrf.mxu2 }
 0x235   :  { %v2709_v38 = vadd.f32 %v2708_v27, %v2696_v15  ;;  %v2891_v41 = vrot.slane %v2670_v44, 2 }
 0x237   :  { %v2898_v42 = vsel %vm2897_vm2, %v2890_v39, %v2891_v41 }
 0x238   :  { %v2762_v22 = vpop.f32.mrf.mxu1  ;;  %v2658_v43 = vpop.f32.mrf.mxu3  ;;  %v2900_v46 = vsel %vm2899_vm3, %v2896_v31, %v2898_v42 }
 0x239   :  { %v2812_v34 = vpop.f32.mrf.mxu0  ;;  %2906 = vst [vmem:[#allocation2] sm:$0xff] %v2900_v46 }
 0x23c   :  { %v2710_v47 = vpop.f32.mrf.mxu2 }
 0x240   :  { %v2825_v49 = vpop.f32.mrf.mxu1  ;;  %v2721_v40 = vpop.f32.mrf.mxu3 }
 0x241   :  { %v2814_v48 = vpop.f32.mrf.mxu0  ;;  %v2722_v56 = vadd.f32 %v2721_v40, %v2709_v38 }
 0x244   :  { %v2773_v25 = vpop.f32.mrf.mxu2 }
 0x248   :  { %v2827_v53 = vpop.f32.mrf.mxu1  ;;  %v2723_v54 = vpop.f32.mrf.mxu3 }
 0x249   :  { %v2877_v51 = vpop.f32.mrf.mxu0 }
 0x24c   :  { %v2775_v21 = vpop.f32.mrf.mxu2 }
 0x251   :  { %v2879_v52 = vpop.f32.mrf.mxu0 }
 0x260   :  { %v2838_v55 = vpop.f32.mrf.mxu1  ;;  %v2734_v58 = vpop.f32.mrf.mxu3 }
 0x261   :  { %v2735_v59 = vadd.f32 %v2734_v58, %v1331_v57  ;;  %v2839_v14 = vadd.f32 %v2838_v55, %v1333_v13 }
 0x263   :  { %v2748_v61 = vadd.f32 %v2747_v23, %v2735_v59 }
 0x264   :  { %v2786_v60 = vpop.f32.mrf.mxu2 }
 0x265   :  { %v2761_v62 = vadd.f32 %v2760_v33, %v2748_v61  ;;  %v2787_v45 = vadd.f32 %v2786_v60, %v1332_v5 }
 0x267   :  { %v2774_v0 = vadd.f32 %v2773_v25, %v2761_v62 }
 0x268   :  { %v2840_v63 = vpop.f32.mrf.mxu1  ;;  %v2736_v1 = vpop.f32.mrf.mxu3 }
 0x269   :  { %v2892_v4 = vrot.slane %v2774_v0, 6 }
 0x26b   :  { %v2901_v7 = vsel %vm2895_vm1, %v2722_v56, %v2892_v4 }
 0x26c   :  { %v2788_v6 = vpop.f32.mrf.mxu2 }
 0x280   :  { %v2799_v8 = vpop.f32.mrf.mxu3 }
 0x281   :  { %v2800_v10 = vadd.f32 %v2799_v8, %v2787_v45 }
 0x283   :  { %v2813_v50 = vadd.f32 %v2812_v34, %v2800_v10 }
 0x284   :  { %v2851_v11 = vpop.f32.mrf.mxu2 }
 0x285   :  { %v2826_v3 = vadd.f32 %v2825_v49, %v2813_v50  ;;  %v2852_v15 = vadd.f32 %v2851_v11, %v2839_v14 }
 0x287   :  { %v2893_v19 = vrot.slane %v2826_v3, 4 }
 0x288   :  { %v2801_v12 = vpop.f32.mrf.mxu3 }
 0x28c   :  { %v2853_v31 = vpop.f32.mrf.mxu2 }
 0x2a0   :  { %v2864_v16 = vpop.f32.mrf.mxu3 }
 0x2a1   :  { %v2865_v17 = vadd.f32 %v2864_v16, %v2852_v15 }
 0x2a3   :  { %v2878_v18 = vadd.f32 %v2877_v51, %v2865_v17 }
 0x2a5   :  { %v2894_v20 = vrot.slane %v2878_v18, 2 }
 0x2a7   :  { %v2902_v23 = vsel %vm2897_vm2, %v2893_v19, %v2894_v20 }
 0x2a8   :  { %v2866_v26 = vpop.f32.mrf.mxu3  ;;  %v2903_v24 = vsel %vm2899_vm3, %v2901_v7, %v2902_v23 }
 0x2a9   :  { %2907 = vst [vmem:[#allocation2 + $0x8] sm:$0xff] %v2903_v24 }
 0x2aa   :  { %2918 = dma.vmem_to_hbm [thread:$0]  %s2914_s4, 256, %s2916_s18, [#allocation3]  }
 0x2ab   :  { %4725 = dma.done.wait [#allocation3], 256  }
 0x2ac   :  { %4726 = vsyncadd [#allocation3], 4294967040 }
 0x2ad   :  { %2923 = vsyncpa [#allocation3], 1 }

</bundles_post_ra>
